<compile_context>
chip_gen: v5e
topology: v5e:2x2
jax: 0.10.0
libtpu: 0.0.40
codegen_flags: <defaults>
</compile_context>

<pallas_src>
import jax
import jax.numpy as jnp
from jax import lax
from jax.experimental import pallas as pl
from jax.experimental.pallas import tpu as pltpu


# --------------------------------------------------------------------------
# Fused forward kernel: per-layer LSTM (hoisted input projection + unrolled
# recurrence) -> fused flatten/fc1 -> fc2 -> head.
# --------------------------------------------------------------------------
def _make_fused_forward_kernel(L, T, B, H):
    def kernel(*refs):
        x_ref = refs[0]                              # (T*B, D) time-major rows
        wih_refs = refs[1:1 + L]                     # layer l: (Din_l, 4H), g-cols x2
        whh_refs = refs[1 + L:1 + 2 * L]             # (H, 4H), g-cols x2
        b_refs = refs[1 + 2 * L:1 + 3 * L]           # (1, 4H), g-cols x2
        h0_ref = refs[1 + 3 * L]                     # (L, B, H)
        c0_ref = refs[2 + 3 * L]                     # (L, B, H)
        (fw1_ref, fb1_ref, fw2_ref, fb2_ref,
         fw3_ref, fb3_ref) = refs[3 + 3 * L:9 + 3 * L]
        out_ref = refs[9 + 3 * L]                    # (B, n_out)
        g_sc = refs[10 + 3 * L]                      # (T*B, 4H) scratch
        hseq_sc = refs[11 + 3 * L]                   # (T*B, H) scratch

        L1 = fw1_ref.shape[1]
        a1 = jnp.zeros((B, L1), jnp.float32)         # fused flatten+fc1 accumulator

        for l in range(L):
            # Hoisted, batched input projection for this layer: ONE MXU dot of
            # shape (T*B, Din) x (Din, 4H); not on the per-step dependency chain.
            src = x_ref[...] if l == 0 else hseq_sc[...]
            g_sc[...] = (jnp.dot(src, wih_refs[l][...],
                                 preferred_element_type=jnp.float32)
                         + b_refs[l][...])

            h = h0_ref[l]                            # (B, H) in registers
            c = c0_ref[l]
            whh = whh_refs[l][...]                   # (H, 4H)

            for t in range(T):                       # fully unrolled recurrence
                # Dependent dot per step: (B, H) x (H, 4H), K = 32.
                gates = (g_sc[t * B:(t + 1) * B, :]
                         + jnp.dot(h, whh, preferred_element_type=jnp.float32))
                # Single full-width sigmoid; g gate recovered via
                # tanh(z) = 2*sigmoid(2z) - 1 (g columns pre-scaled by 2).
                s = jax.nn.sigmoid(gates)
                i_g = s[:, 0:H]
                f_g = s[:, H:2 * H]
                g_g = 2.0 * s[:, 2 * H:3 * H] - 1.0
                o_g = s[:, 3 * H:4 * H]
                c = f_g * c + i_g * g_g
                h = o_g * jnp.tanh(c)

                if l == L - 1:
                    # Fused flatten + fc1 (== Flatten of batch-first (B,T,H) @ W1):
                    # a1 += h_t @ W1[t*H:(t+1)*H, :]   (off the serial chain).
                    a1 = a1 + jnp.dot(h, fw1_ref[t * H:(t + 1) * H, :],
                                      preferred_element_type=jnp.float32)
                else:
                    hseq_sc[t * B:(t + 1) * B, :] = h

        # TODO(synk): nn.Dropout1d(p=0.2) is stochastic in train mode;
        # implemented as identity (eval-mode semantics).
        a1 = a1 + fb1_ref[...]
        a2 = jnp.dot(a1, fw2_ref[...],
                     preferred_element_type=jnp.float32) + fb2_ref[...]
        a3 = jnp.dot(a2, fw3_ref[...],
                     preferred_element_type=jnp.float32) + fb3_ref[...]
        out_ref[...] = a3.astype(out_ref.dtype)

    return kernel


# --------------------------------------------------------------------------
# One-time parameter prep (hoisted OUT of the jitted forward): pre-scale the
# g-gate columns of W_ih / W_hh / b by 2 so the kernel can use a single
# full-width sigmoid per cell (tanh(z) = 2*sigmoid(2z) - 1).
# --------------------------------------------------------------------------
def prepare_params(params):
    lstm = []
    for (w_ih, w_hh, b) in params["lstm"]:
        H = w_hh.shape[0]
        scale = jnp.ones((1, 4 * H), jnp.float32).at[:, 2 * H:3 * H].set(2.0)
        lstm.append((w_ih * scale, w_hh * scale, b * scale))
    return {"lstm": lstm, "mlp": params["mlp"]}


# --------------------------------------------------------------------------
# Public wrapper: batch-first (B, T, D) like the PyTorch module -> (B, 2).
# `params` must be the output of prepare_params().
# --------------------------------------------------------------------------
def exvivo_lstm_forward(x, params, h0, c0):
    B, T, D = x.shape
    L = len(params["lstm"])
    H = h0.shape[-1]

    # The only per-call wrapper op: batch-first -> time-major, flattened to
    # (T*B, D) rows (row t*B + b == x[b, t]).
    x_tm = jnp.transpose(x, (1, 0, 2)).reshape(T * B, D)

    w_ih = [w for (w, _, _) in params["lstm"]]
    w_hh = [w for (_, w, _) in params["lstm"]]
    bias = [b for (_, _, b) in params["lstm"]]
    w1, b1, w2, b2, w3, b3 = params["mlp"]
    n_out = w3.shape[1]

    operands = [x_tm, *w_ih, *w_hh, *bias, h0, c0, w1, b1, w2, b2, w3, b3]

    def full_spec(a):
        zeros = (0,) * a.ndim
        return pl.BlockSpec(a.shape, lambda i, _z=zeros: _z)

    return pl.pallas_call(
        _make_fused_forward_kernel(L, T, B, H),
        out_shape=jax.ShapeDtypeStruct((B, n_out), jnp.float32),
        grid_spec=pltpu.PrefetchScalarGridSpec(
            num_scalar_prefetch=0,
            grid=(1,),
            in_specs=[full_spec(a) for a in operands],
            out_specs=pl.BlockSpec((B, n_out), lambda i: (0, 0)),
            scratch_shapes=[
                pltpu.VMEM((T * B, 4 * H), jnp.float32),  # hoisted gate projections
                pltpu.VMEM((T * B, H), jnp.float32),      # inter-layer hidden sequence
            ],
        ),
        compiler_params=pltpu.CompilerParams(
            dimension_semantics=("arbitrary",)),
    )(*operands)


# --------------------------------------------------------------------------
# Pure-JAX reference (PyTorch-shaped two-dot LSTM form, raw un-scaled params).
# --------------------------------------------------------------------------
def _lstm_layer_ref(x_tm, w_ih, w_hh, b, h0, c0):
    H = h0.shape[-1]

    def step(carry, x_t):
        h, c = carry
        gates = x_t @ w_ih + h @ w_hh + b
        i = jax.nn.sigmoid(gates[:, 0:H])
        f = jax.nn.sigmoid(gates[:, H:2 * H])
        g = jnp.tanh(gates[:, 2 * H:3 * H])
        o = jax.nn.sigmoid(gates[:, 3 * H:4 * H])
        c = f * c + i * g
        h = o * jnp.tanh(c)
        return (h, c), h

    _, hs = lax.scan(step, (h0, c0), x_tm)
    return hs


def forward_ref(x, params, h0, c0):
    B, T, D = x.shape
    x_tm = jnp.transpose(x, (1, 0, 2))
    for layer, (w_ih, w_hh, b) in enumerate(params["lstm"]):
        x_tm = _lstm_layer_ref(x_tm, w_ih, w_hh, b, h0[layer], c0[layer])
    flat = jnp.transpose(x_tm, (1, 0, 2)).reshape(B, -1)
    w1, b1, w2, b2, w3, b3 = params["mlp"]
    return ((flat @ w1 + b1) @ w2 + b2) @ w3 + b3


# --------------------------------------------------------------------------
# Deterministic parameter init (PyTorch-style uniform scales).
# Note: loading a real PyTorch checkpoint requires transposing weight_ih /
# weight_hh from (4H, Din) to (Din, 4H) and fc weights from (out, in) to
# (in, out), summing b_ih + b_hh, then running prepare_params().
# --------------------------------------------------------------------------
def init_params(key, D, H, L, T, L1, L2):
    params = {"lstm": [], "mlp": None}
    k_lstm = H ** -0.5
    for layer in range(L):
        din = D if layer == 0 else H
        key, k1, k2, k3, k4 = jax.random.split(key, 5)
        w_ih = jax.random.uniform(k1, (din, 4 * H), jnp.float32,
                                  -k_lstm, k_lstm)
        w_hh = jax.random.uniform(k2, (H, 4 * H), jnp.float32,
                                  -k_lstm, k_lstm)
        b_ih = jax.random.uniform(k3, (4 * H,), jnp.float32, -k_lstm, k_lstm)
        b_hh = jax.random.uniform(k4, (4 * H,), jnp.float32, -k_lstm, k_lstm)
        params["lstm"].append((w_ih, w_hh, (b_ih + b_hh)[None, :]))

    F = T * H
    key, k1, k2, k3, k4, k5, k6 = jax.random.split(key, 7)
    s1, s2, s3 = F ** -0.5, L1 ** -0.5, L2 ** -0.5
    w1 = jax.random.uniform(k1, (F, L1), jnp.float32, -s1, s1)
    b1 = jax.random.uniform(k2, (1, L1), jnp.float32, -s1, s1)
    w2 = jax.random.uniform(k3, (L1, L2), jnp.float32, -s2, s2)
    b2 = jax.random.uniform(k4, (1, L2), jnp.float32, -s2, s2)
    w3 = jax.random.uniform(k5, (L2, 2), jnp.float32, -s3, s3)
    b3 = jax.random.uniform(k6, (1, 2), jnp.float32, -s3, s3)
    params["mlp"] = (w1, b1, w2, b2, w3, b3)
    return params


if __name__ == "__main__":
    # Small shapes consistent with the module's forward:
    #   x: (batch, seq, features), 3-layer LSTM hidden H, fc dims 120/64/2.
    B, T, D = 2, 8, 64
    H, L = 32, 3
    L1, L2 = 120, 64

    key = jax.random.PRNGKey(0)
    key, kx, kh, kc, kp = jax.random.split(key, 5)
    x = jax.random.normal(kx, (B, T, D), jnp.float32)
    # Deterministic stand-in for the module's per-forward torch.rand states.
    h0 = jax.random.uniform(kh, (L, B, H), jnp.float32)
    c0 = jax.random.uniform(kc, (L, B, H), jnp.float32)
    params = init_params(kp, D, H, L, T, L1, L2)

    # One-time prep (g-gate 2x pre-scale) hoisted out of the jitted forward.
    prepped = prepare_params(params)

    fwd = jax.jit(exvivo_lstm_forward)
    out = jax.block_until_ready(fwd(x, prepped, h0, c0))

    ref = forward_ref(x, params, h0, c0)
    assert out.shape == (B, 2), out.shape
    # Kernel (MXU, sigmoid-based tanh) and XLA reference may differ in f32
    # matmul pass counts / transcendental approximations, so exact 1e-5
    # agreement is not guaranteed; layout/gate-order bugs give O(0.1-1) errors
    # and are still caught.
    max_err = float(jnp.max(jnp.abs(out - ref)))
    assert jnp.allclose(out, ref, atol=2e-3, rtol=2e-3), \
        f"max abs err {max_err}"

    print("KERNEL_OK")
</pallas_src>

<mosaic_0001>
module attributes {stable_mosaic.version = 11 : i64} {
  func.func @kernel(%arg0: i32, %arg1: memref<16x64xf32, #tpu.memory_space<vmem>>, %arg2: memref<64x128xf32, #tpu.memory_space<vmem>>, %arg3: memref<32x128xf32, #tpu.memory_space<vmem>>, %arg4: memref<32x128xf32, #tpu.memory_space<vmem>>, %arg5: memref<32x128xf32, #tpu.memory_space<vmem>>, %arg6: memref<32x128xf32, #tpu.memory_space<vmem>>, %arg7: memref<32x128xf32, #tpu.memory_space<vmem>>, %arg8: memref<1x128xf32, #tpu.memory_space<vmem>>, %arg9: memref<1x128xf32, #tpu.memory_space<vmem>>, %arg10: memref<1x128xf32, #tpu.memory_space<vmem>>, %arg11: memref<3x2x32xf32, #tpu.memory_space<vmem>>, %arg12: memref<3x2x32xf32, #tpu.memory_space<vmem>>, %arg13: memref<256x120xf32, #tpu.memory_space<vmem>>, %arg14: memref<1x120xf32, #tpu.memory_space<vmem>>, %arg15: memref<120x64xf32, #tpu.memory_space<vmem>>, %arg16: memref<1x64xf32, #tpu.memory_space<vmem>>, %arg17: memref<64x2xf32, #tpu.memory_space<vmem>>, %arg18: memref<1x2xf32, #tpu.memory_space<vmem>>, %arg19: memref<2x2xf32, #tpu.memory_space<vmem>>, %arg20: memref<16x128xf32, #tpu.memory_space<vmem>>, %arg21: memref<16x32xf32, #tpu.memory_space<vmem>>) attributes {dimension_semantics = [#tpu.dimension_semantics<arbitrary>], iteration_bounds = array<i64: 1>, scalar_prefetch = 0 : i64, scratch_operands = 2 : i64, tpu.core_type = #tpu.core_type<tc>, window_params = [{pipeline_mode = #tpu.pipeline_mode<synchronous>, transform_indices = @transform_0, window_bounds = array<i64: 16, 64>}, {pipeline_mode = #tpu.pipeline_mode<synchronous>, transform_indices = @transform_1, window_bounds = array<i64: 64, 128>}, {pipeline_mode = #tpu.pipeline_mode<synchronous>, transform_indices = @transform_2, window_bounds = array<i64: 32, 128>}, {pipeline_mode = #tpu.pipeline_mode<synchronous>, transform_indices = @transform_3, window_bounds = array<i64: 32, 128>}, {pipeline_mode = #tpu.pipeline_mode<synchronous>, transform_indices = @transform_4, window_bounds = array<i64: 32, 128>}, {pipeline_mode = #tpu.pipeline_mode<synchronous>, transform_indices = @transform_5, window_bounds = array<i64: 32, 128>}, {pipeline_mode = #tpu.pipeline_mode<synchronous>, transform_indices = @transform_6, window_bounds = array<i64: 32, 128>}, {pipeline_mode = #tpu.pipeline_mode<synchronous>, transform_indices = @transform_7, window_bounds = array<i64: 1, 128>}, {pipeline_mode = #tpu.pipeline_mode<synchronous>, transform_indices = @transform_8, window_bounds = array<i64: 1, 128>}, {pipeline_mode = #tpu.pipeline_mode<synchronous>, transform_indices = @transform_9, window_bounds = array<i64: 1, 128>}, {pipeline_mode = #tpu.pipeline_mode<synchronous>, transform_indices = @transform_10, window_bounds = array<i64: 3, 2, 32>}, {pipeline_mode = #tpu.pipeline_mode<synchronous>, transform_indices = @transform_11, window_bounds = array<i64: 3, 2, 32>}, {pipeline_mode = #tpu.pipeline_mode<synchronous>, transform_indices = @transform_12, window_bounds = array<i64: 256, 120>}, {pipeline_mode = #tpu.pipeline_mode<synchronous>, transform_indices = @transform_13, window_bounds = array<i64: 1, 120>}, {pipeline_mode = #tpu.pipeline_mode<synchronous>, transform_indices = @transform_14, window_bounds = array<i64: 120, 64>}, {pipeline_mode = #tpu.pipeline_mode<synchronous>, transform_indices = @transform_15, window_bounds = array<i64: 1, 64>}, {pipeline_mode = #tpu.pipeline_mode<synchronous>, transform_indices = @transform_16, window_bounds = array<i64: 64, 2>}, {pipeline_mode = #tpu.pipeline_mode<synchronous>, transform_indices = @transform_17, window_bounds = array<i64: 1, 2>}, {pipeline_mode = #tpu.pipeline_mode<synchronous>, transform_indices = @transform_18, window_bounds = array<i64: 2, 2>}]} {
    %cst = arith.constant 0.000000e+00 : f32
    %0 = vector.broadcast %cst : f32 to vector<2x120xf32>
    %c0 = arith.constant 0 : index
    %c0_0 = arith.constant 0 : index
    %1 = vector.load %arg1[%c0, %c0_0] : memref<16x64xf32, #tpu.memory_space<vmem>>, vector<16x64xf32>
    %c0_1 = arith.constant 0 : index
    %c0_2 = arith.constant 0 : index
    %2 = vector.load %arg2[%c0_1, %c0_2] : memref<64x128xf32, #tpu.memory_space<vmem>>, vector<64x128xf32>
    %cst_3 = arith.constant dense<0.000000e+00> : vector<16x128xf32>
    %3 = tpu.matmul %1, %2, %cst_3 {dimension_numbers = #tpu.dot_dimension_numbers<[1], [0], [0], [1], [0, 0, 1, 1], [], []>} : vector<16x64xf32>, vector<64x128xf32>, vector<16x128xf32> -> vector<16x128xf32>
    %c0_4 = arith.constant 0 : index
    %c0_5 = arith.constant 0 : index
    %4 = vector.load %arg8[%c0_4, %c0_5] : memref<1x128xf32, #tpu.memory_space<vmem>>, vector<1x128xf32>
    %5 = vector.broadcast %4 : vector<1x128xf32> to vector<16x128xf32>
    %6 = arith.addf %3, %5 : vector<16x128xf32>
    %c0_6 = arith.constant 0 : index
    %c0_7 = arith.constant 0 : index
    %7 = vector.load %arg20[%c0_6, %c0_7] : memref<16x128xf32, #tpu.memory_space<vmem>>, vector<16x128xf32>
    tpu.vector_store %arg20[%c0_6, %c0_7], %6 {strides = array<i32>} : memref<16x128xf32, #tpu.memory_space<vmem>>, vector<16x128xf32>,
    %c0_8 = arith.constant 0 : index
    %c0_9 = arith.constant 0 : index
    %c0_10 = arith.constant 0 : index
    %8 = vector.load %arg11[%c0_8, %c0_9, %c0_10] : memref<3x2x32xf32, #tpu.memory_space<vmem>>, vector<1x2x32xf32>
    %9 = vector.shape_cast %8 : vector<1x2x32xf32> to vector<2x32xf32>
    %c0_11 = arith.constant 0 : index
    %c0_12 = arith.constant 0 : index
    %c0_13 = arith.constant 0 : index
    %10 = vector.load %arg12[%c0_11, %c0_12, %c0_13] : memref<3x2x32xf32, #tpu.memory_space<vmem>>, vector<1x2x32xf32>
    %11 = vector.shape_cast %10 : vector<1x2x32xf32> to vector<2x32xf32>
    %c0_14 = arith.constant 0 : index
    %c0_15 = arith.constant 0 : index
    %12 = vector.load %arg5[%c0_14, %c0_15] : memref<32x128xf32, #tpu.memory_space<vmem>>, vector<32x128xf32>
    %c0_16 = arith.constant 0 : index
    %c0_17 = arith.constant 0 : index
    %13 = vector.load %arg20[%c0_16, %c0_17] : memref<16x128xf32, #tpu.memory_space<vmem>>, vector<2x128xf32>
    %cst_18 = arith.constant dense<0.000000e+00> : vector<2x128xf32>
    %14 = tpu.matmul %9, %12, %cst_18 {dimension_numbers = #tpu.dot_dimension_numbers<[1], [0], [0], [1], [0, 0, 1, 1], [], []>} : vector<2x32xf32>, vector<32x128xf32>, vector<2x128xf32> -> vector<2x128xf32>
    %15 = arith.addf %13, %14 : vector<2x128xf32>
    %16 = arith.negf %15 : vector<2x128xf32>
    %17 = math.exp %16 : vector<2x128xf32>
    %cst_19 = arith.constant 1.000000e+00 : f32
    %18 = vector.broadcast %cst_19 : f32 to vector<2x128xf32>
    %19 = arith.addf %18, %17 : vector<2x128xf32>
    %20 = arith.divf %18, %19 : vector<2x128xf32>
    %21 = vector.extract_strided_slice %20 {offsets = [0, 0], sizes = [2, 32], strides = [1, 1]} : vector<2x128xf32> to vector<2x32xf32>
    %22 = vector.extract_strided_slice %20 {offsets = [0, 32], sizes = [2, 32], strides = [1, 1]} : vector<2x128xf32> to vector<2x32xf32>
    %23 = vector.extract_strided_slice %20 {offsets = [0, 64], sizes = [2, 32], strides = [1, 1]} : vector<2x128xf32> to vector<2x32xf32>
    %cst_20 = arith.constant 2.000000e+00 : f32
    %24 = vector.broadcast %cst_20 : f32 to vector<2x32xf32>
    %25 = arith.mulf %24, %23 : vector<2x32xf32>
    %cst_21 = arith.constant 1.000000e+00 : f32
    %26 = vector.broadcast %cst_21 : f32 to vector<2x32xf32>
    %27 = arith.subf %25, %26 : vector<2x32xf32>
    %28 = vector.extract_strided_slice %20 {offsets = [0, 96], sizes = [2, 32], strides = [1, 1]} : vector<2x128xf32> to vector<2x32xf32>
    %29 = arith.mulf %22, %11 : vector<2x32xf32>
    %30 = arith.mulf %21, %27 : vector<2x32xf32>
    %31 = arith.addf %29, %30 : vector<2x32xf32>
    %32 = math.tanh %31 : vector<2x32xf32>
    %33 = arith.mulf %28, %32 : vector<2x32xf32>
    %c0_22 = arith.constant 0 : index
    %c0_23 = arith.constant 0 : index
    %34 = vector.load %arg21[%c0_22, %c0_23] : memref<16x32xf32, #tpu.memory_space<vmem>>, vector<2x32xf32>
    tpu.vector_store %arg21[%c0_22, %c0_23], %33 {strides = array<i32>} : memref<16x32xf32, #tpu.memory_space<vmem>>, vector<2x32xf32>,
    %c2 = arith.constant 2 : index
    %c0_24 = arith.constant 0 : index
    %35 = vector.load %arg20[%c2, %c0_24] : memref<16x128xf32, #tpu.memory_space<vmem>>, vector<2x128xf32>
    %cst_25 = arith.constant dense<0.000000e+00> : vector<2x128xf32>
    %36 = tpu.matmul %33, %12, %cst_25 {dimension_numbers = #tpu.dot_dimension_numbers<[1], [0], [0], [1], [0, 0, 1, 1], [], []>} : vector<2x32xf32>, vector<32x128xf32>, vector<2x128xf32> -> vector<2x128xf32>
    %37 = arith.addf %35, %36 : vector<2x128xf32>
    %38 = arith.negf %37 : vector<2x128xf32>
    %39 = math.exp %38 : vector<2x128xf32>
    %cst_26 = arith.constant 1.000000e+00 : f32
    %40 = vector.broadcast %cst_26 : f32 to vector<2x128xf32>
    %41 = arith.addf %40, %39 : vector<2x128xf32>
    %42 = arith.divf %40, %41 : vector<2x128xf32>
    %43 = vector.extract_strided_slice %42 {offsets = [0, 0], sizes = [2, 32], strides = [1, 1]} : vector<2x128xf32> to vector<2x32xf32>
    %44 = vector.extract_strided_slice %42 {offsets = [0, 32], sizes = [2, 32], strides = [1, 1]} : vector<2x128xf32> to vector<2x32xf32>
    %45 = vector.extract_strided_slice %42 {offsets = [0, 64], sizes = [2, 32], strides = [1, 1]} : vector<2x128xf32> to vector<2x32xf32>
    %cst_27 = arith.constant 2.000000e+00 : f32
    %46 = vector.broadcast %cst_27 : f32 to vector<2x32xf32>
    %47 = arith.mulf %46, %45 : vector<2x32xf32>
    %cst_28 = arith.constant 1.000000e+00 : f32
    %48 = vector.broadcast %cst_28 : f32 to vector<2x32xf32>
    %49 = arith.subf %47, %48 : vector<2x32xf32>
    %50 = vector.extract_strided_slice %42 {offsets = [0, 96], sizes = [2, 32], strides = [1, 1]} : vector<2x128xf32> to vector<2x32xf32>
    %51 = arith.mulf %44, %31 : vector<2x32xf32>
    %52 = arith.mulf %43, %49 : vector<2x32xf32>
    %53 = arith.addf %51, %52 : vector<2x32xf32>
    %54 = math.tanh %53 : vector<2x32xf32>
    %55 = arith.mulf %50, %54 : vector<2x32xf32>
    %c2_29 = arith.constant 2 : index
    %c0_30 = arith.constant 0 : index
    %56 = vector.load %arg21[%c2_29, %c0_30] : memref<16x32xf32, #tpu.memory_space<vmem>>, vector<2x32xf32>
    tpu.vector_store %arg21[%c2_29, %c0_30], %55 {strides = array<i32>} : memref<16x32xf32, #tpu.memory_space<vmem>>, vector<2x32xf32>,
    %c4 = arith.constant 4 : index
    %c0_31 = arith.constant 0 : index
    %57 = vector.load %arg20[%c4, %c0_31] : memref<16x128xf32, #tpu.memory_space<vmem>>, vector<2x128xf32>
    %cst_32 = arith.constant dense<0.000000e+00> : vector<2x128xf32>
    %58 = tpu.matmul %55, %12, %cst_32 {dimension_numbers = #tpu.dot_dimension_numbers<[1], [0], [0], [1], [0, 0, 1, 1], [], []>} : vector<2x32xf32>, vector<32x128xf32>, vector<2x128xf32> -> vector<2x128xf32>
    %59 = arith.addf %57, %58 : vector<2x128xf32>
    %60 = arith.negf %59 : vector<2x128xf32>
    %61 = math.exp %60 : vector<2x128xf32>
    %cst_33 = arith.constant 1.000000e+00 : f32
    %62 = vector.broadcast %cst_33 : f32 to vector<2x128xf32>
    %63 = arith.addf %62, %61 : vector<2x128xf32>
    %64 = arith.divf %62, %63 : vector<2x128xf32>
    %65 = vector.extract_strided_slice %64 {offsets = [0, 0], sizes = [2, 32], strides = [1, 1]} : vector<2x128xf32> to vector<2x32xf32>
    %66 = vector.extract_strided_slice %64 {offsets = [0, 32], sizes = [2, 32], strides = [1, 1]} : vector<2x128xf32> to vector<2x32xf32>
    %67 = vector.extract_strided_slice %64 {offsets = [0, 64], sizes = [2, 32], strides = [1, 1]} : vector<2x128xf32> to vector<2x32xf32>
    %cst_34 = arith.constant 2.000000e+00 : f32
    %68 = vector.broadcast %cst_34 : f32 to vector<2x32xf32>
    %69 = arith.mulf %68, %67 : vector<2x32xf32>
    %cst_35 = arith.constant 1.000000e+00 : f32
    %70 = vector.broadcast %cst_35 : f32 to vector<2x32xf32>
    %71 = arith.subf %69, %70 : vector<2x32xf32>
    %72 = vector.extract_strided_slice %64 {offsets = [0, 96], sizes = [2, 32], strides = [1, 1]} : vector<2x128xf32> to vector<2x32xf32>
    %73 = arith.mulf %66, %53 : vector<2x32xf32>
    %74 = arith.mulf %65, %71 : vector<2x32xf32>
    %75 = arith.addf %73, %74 : vector<2x32xf32>
    %76 = math.tanh %75 : vector<2x32xf32>
    %77 = arith.mulf %72, %76 : vector<2x32xf32>
    %c4_36 = arith.constant 4 : index
    %c0_37 = arith.constant 0 : index
    %78 = vector.load %arg21[%c4_36, %c0_37] : memref<16x32xf32, #tpu.memory_space<vmem>>, vector<2x32xf32>
    tpu.vector_store %arg21[%c4_36, %c0_37], %77 {strides = array<i32>} : memref<16x32xf32, #tpu.memory_space<vmem>>, vector<2x32xf32>,
    %c6 = arith.constant 6 : index
    %c0_38 = arith.constant 0 : index
    %79 = vector.load %arg20[%c6, %c0_38] : memref<16x128xf32, #tpu.memory_space<vmem>>, vector<2x128xf32>
    %cst_39 = arith.constant dense<0.000000e+00> : vector<2x128xf32>
    %80 = tpu.matmul %77, %12, %cst_39 {dimension_numbers = #tpu.dot_dimension_numbers<[1], [0], [0], [1], [0, 0, 1, 1], [], []>} : vector<2x32xf32>, vector<32x128xf32>, vector<2x128xf32> -> vector<2x128xf32>
    %81 = arith.addf %79, %80 : vector<2x128xf32>
    %82 = arith.negf %81 : vector<2x128xf32>
    %83 = math.exp %82 : vector<2x128xf32>
    %cst_40 = arith.constant 1.000000e+00 : f32
    %84 = vector.broadcast %cst_40 : f32 to vector<2x128xf32>
    %85 = arith.addf %84, %83 : vector<2x128xf32>
    %86 = arith.divf %84, %85 : vector<2x128xf32>
    %87 = vector.extract_strided_slice %86 {offsets = [0, 0], sizes = [2, 32], strides = [1, 1]} : vector<2x128xf32> to vector<2x32xf32>
    %88 = vector.extract_strided_slice %86 {offsets = [0, 32], sizes = [2, 32], strides = [1, 1]} : vector<2x128xf32> to vector<2x32xf32>
    %89 = vector.extract_strided_slice %86 {offsets = [0, 64], sizes = [2, 32], strides = [1, 1]} : vector<2x128xf32> to vector<2x32xf32>
    %cst_41 = arith.constant 2.000000e+00 : f32
    %90 = vector.broadcast %cst_41 : f32 to vector<2x32xf32>
    %91 = arith.mulf %90, %89 : vector<2x32xf32>
    %cst_42 = arith.constant 1.000000e+00 : f32
    %92 = vector.broadcast %cst_42 : f32 to vector<2x32xf32>
    %93 = arith.subf %91, %92 : vector<2x32xf32>
    %94 = vector.extract_strided_slice %86 {offsets = [0, 96], sizes = [2, 32], strides = [1, 1]} : vector<2x128xf32> to vector<2x32xf32>
    %95 = arith.mulf %88, %75 : vector<2x32xf32>
    %96 = arith.mulf %87, %93 : vector<2x32xf32>
    %97 = arith.addf %95, %96 : vector<2x32xf32>
    %98 = math.tanh %97 : vector<2x32xf32>
    %99 = arith.mulf %94, %98 : vector<2x32xf32>
    %c6_43 = arith.constant 6 : index
    %c0_44 = arith.constant 0 : index
    %100 = vector.load %arg21[%c6_43, %c0_44] : memref<16x32xf32, #tpu.memory_space<vmem>>, vector<2x32xf32>
    tpu.vector_store %arg21[%c6_43, %c0_44], %99 {strides = array<i32>} : memref<16x32xf32, #tpu.memory_space<vmem>>, vector<2x32xf32>,
    %c8 = arith.constant 8 : index
    %c0_45 = arith.constant 0 : index
    %101 = vector.load %arg20[%c8, %c0_45] : memref<16x128xf32, #tpu.memory_space<vmem>>, vector<2x128xf32>
    %cst_46 = arith.constant dense<0.000000e+00> : vector<2x128xf32>
    %102 = tpu.matmul %99, %12, %cst_46 {dimension_numbers = #tpu.dot_dimension_numbers<[1], [0], [0], [1], [0, 0, 1, 1], [], []>} : vector<2x32xf32>, vector<32x128xf32>, vector<2x128xf32> -> vector<2x128xf32>
    %103 = arith.addf %101, %102 : vector<2x128xf32>
    %104 = arith.negf %103 : vector<2x128xf32>
    %105 = math.exp %104 : vector<2x128xf32>
    %cst_47 = arith.constant 1.000000e+00 : f32
    %106 = vector.broadcast %cst_47 : f32 to vector<2x128xf32>
    %107 = arith.addf %106, %105 : vector<2x128xf32>
    %108 = arith.divf %106, %107 : vector<2x128xf32>
    %109 = vector.extract_strided_slice %108 {offsets = [0, 0], sizes = [2, 32], strides = [1, 1]} : vector<2x128xf32> to vector<2x32xf32>
    %110 = vector.extract_strided_slice %108 {offsets = [0, 32], sizes = [2, 32], strides = [1, 1]} : vector<2x128xf32> to vector<2x32xf32>
    %111 = vector.extract_strided_slice %108 {offsets = [0, 64], sizes = [2, 32], strides = [1, 1]} : vector<2x128xf32> to vector<2x32xf32>
    %cst_48 = arith.constant 2.000000e+00 : f32
    %112 = vector.broadcast %cst_48 : f32 to vector<2x32xf32>
    %113 = arith.mulf %112, %111 : vector<2x32xf32>
    %cst_49 = arith.constant 1.000000e+00 : f32
    %114 = vector.broadcast %cst_49 : f32 to vector<2x32xf32>
    %115 = arith.subf %113, %114 : vector<2x32xf32>
    %116 = vector.extract_strided_slice %108 {offsets = [0, 96], sizes = [2, 32], strides = [1, 1]} : vector<2x128xf32> to vector<2x32xf32>
    %117 = arith.mulf %110, %97 : vector<2x32xf32>
    %118 = arith.mulf %109, %115 : vector<2x32xf32>
    %119 = arith.addf %117, %118 : vector<2x32xf32>
    %120 = math.tanh %119 : vector<2x32xf32>
    %121 = arith.mulf %116, %120 : vector<2x32xf32>
    %c8_50 = arith.constant 8 : index
    %c0_51 = arith.constant 0 : index
    %122 = vector.load %arg21[%c8_50, %c0_51] : memref<16x32xf32, #tpu.memory_space<vmem>>, vector<2x32xf32>
    tpu.vector_store %arg21[%c8_50, %c0_51], %121 {strides = array<i32>} : memref<16x32xf32, #tpu.memory_space<vmem>>, vector<2x32xf32>,
    %c10 = arith.constant 10 : index
    %c0_52 = arith.constant 0 : index
    %123 = vector.load %arg20[%c10, %c0_52] : memref<16x128xf32, #tpu.memory_space<vmem>>, vector<2x128xf32>
    %cst_53 = arith.constant dense<0.000000e+00> : vector<2x128xf32>
    %124 = tpu.matmul %121, %12, %cst_53 {dimension_numbers = #tpu.dot_dimension_numbers<[1], [0], [0], [1], [0, 0, 1, 1], [], []>} : vector<2x32xf32>, vector<32x128xf32>, vector<2x128xf32> -> vector<2x128xf32>
    %125 = arith.addf %123, %124 : vector<2x128xf32>
    %126 = arith.negf %125 : vector<2x128xf32>
    %127 = math.exp %126 : vector<2x128xf32>
    %cst_54 = arith.constant 1.000000e+00 : f32
    %128 = vector.broadcast %cst_54 : f32 to vector<2x128xf32>
    %129 = arith.addf %128, %127 : vector<2x128xf32>
    %130 = arith.divf %128, %129 : vector<2x128xf32>
    %131 = vector.extract_strided_slice %130 {offsets = [0, 0], sizes = [2, 32], strides = [1, 1]} : vector<2x128xf32> to vector<2x32xf32>
    %132 = vector.extract_strided_slice %130 {offsets = [0, 32], sizes = [2, 32], strides = [1, 1]} : vector<2x128xf32> to vector<2x32xf32>
    %133 = vector.extract_strided_slice %130 {offsets = [0, 64], sizes = [2, 32], strides = [1, 1]} : vector<2x128xf32> to vector<2x32xf32>
    %cst_55 = arith.constant 2.000000e+00 : f32
    %134 = vector.broadcast %cst_55 : f32 to vector<2x32xf32>
    %135 = arith.mulf %134, %133 : vector<2x32xf32>
    %cst_56 = arith.constant 1.000000e+00 : f32
    %136 = vector.broadcast %cst_56 : f32 to vector<2x32xf32>
    %137 = arith.subf %135, %136 : vector<2x32xf32>
    %138 = vector.extract_strided_slice %130 {offsets = [0, 96], sizes = [2, 32], strides = [1, 1]} : vector<2x128xf32> to vector<2x32xf32>
    %139 = arith.mulf %132, %119 : vector<2x32xf32>
    %140 = arith.mulf %131, %137 : vector<2x32xf32>
    %141 = arith.addf %139, %140 : vector<2x32xf32>
    %142 = math.tanh %141 : vector<2x32xf32>
    %143 = arith.mulf %138, %142 : vector<2x32xf32>
    %c10_57 = arith.constant 10 : index
    %c0_58 = arith.constant 0 : index
    %144 = vector.load %arg21[%c10_57, %c0_58] : memref<16x32xf32, #tpu.memory_space<vmem>>, vector<2x32xf32>
    tpu.vector_store %arg21[%c10_57, %c0_58], %143 {strides = array<i32>} : memref<16x32xf32, #tpu.memory_space<vmem>>, vector<2x32xf32>,
    %c12 = arith.constant 12 : index
    %c0_59 = arith.constant 0 : index
    %145 = vector.load %arg20[%c12, %c0_59] : memref<16x128xf32, #tpu.memory_space<vmem>>, vector<2x128xf32>
    %cst_60 = arith.constant dense<0.000000e+00> : vector<2x128xf32>
    %146 = tpu.matmul %143, %12, %cst_60 {dimension_numbers = #tpu.dot_dimension_numbers<[1], [0], [0], [1], [0, 0, 1, 1], [], []>} : vector<2x32xf32>, vector<32x128xf32>, vector<2x128xf32> -> vector<2x128xf32>
    %147 = arith.addf %145, %146 : vector<2x128xf32>
    %148 = arith.negf %147 : vector<2x128xf32>
    %149 = math.exp %148 : vector<2x128xf32>
    %cst_61 = arith.constant 1.000000e+00 : f32
    %150 = vector.broadcast %cst_61 : f32 to vector<2x128xf32>
    %151 = arith.addf %150, %149 : vector<2x128xf32>
    %152 = arith.divf %150, %151 : vector<2x128xf32>
    %153 = vector.extract_strided_slice %152 {offsets = [0, 0], sizes = [2, 32], strides = [1, 1]} : vector<2x128xf32> to vector<2x32xf32>
    %154 = vector.extract_strided_slice %152 {offsets = [0, 32], sizes = [2, 32], strides = [1, 1]} : vector<2x128xf32> to vector<2x32xf32>
    %155 = vector.extract_strided_slice %152 {offsets = [0, 64], sizes = [2, 32], strides = [1, 1]} : vector<2x128xf32> to vector<2x32xf32>
    %cst_62 = arith.constant 2.000000e+00 : f32
    %156 = vector.broadcast %cst_62 : f32 to vector<2x32xf32>
    %157 = arith.mulf %156, %155 : vector<2x32xf32>
    %cst_63 = arith.constant 1.000000e+00 : f32
    %158 = vector.broadcast %cst_63 : f32 to vector<2x32xf32>
    %159 = arith.subf %157, %158 : vector<2x32xf32>
    %160 = vector.extract_strided_slice %152 {offsets = [0, 96], sizes = [2, 32], strides = [1, 1]} : vector<2x128xf32> to vector<2x32xf32>
    %161 = arith.mulf %154, %141 : vector<2x32xf32>
    %162 = arith.mulf %153, %159 : vector<2x32xf32>
    %163 = arith.addf %161, %162 : vector<2x32xf32>
    %164 = math.tanh %163 : vector<2x32xf32>
    %165 = arith.mulf %160, %164 : vector<2x32xf32>
    %c12_64 = arith.constant 12 : index
    %c0_65 = arith.constant 0 : index
    %166 = vector.load %arg21[%c12_64, %c0_65] : memref<16x32xf32, #tpu.memory_space<vmem>>, vector<2x32xf32>
    tpu.vector_store %arg21[%c12_64, %c0_65], %165 {strides = array<i32>} : memref<16x32xf32, #tpu.memory_space<vmem>>, vector<2x32xf32>,
    %c14 = arith.constant 14 : index
    %c0_66 = arith.constant 0 : index
    %167 = vector.load %arg20[%c14, %c0_66] : memref<16x128xf32, #tpu.memory_space<vmem>>, vector<2x128xf32>
    %cst_67 = arith.constant dense<0.000000e+00> : vector<2x128xf32>
    %168 = tpu.matmul %165, %12, %cst_67 {dimension_numbers = #tpu.dot_dimension_numbers<[1], [0], [0], [1], [0, 0, 1, 1], [], []>} : vector<2x32xf32>, vector<32x128xf32>, vector<2x128xf32> -> vector<2x128xf32>
    %169 = arith.addf %167, %168 : vector<2x128xf32>
    %170 = arith.negf %169 : vector<2x128xf32>
    %171 = math.exp %170 : vector<2x128xf32>
    %cst_68 = arith.constant 1.000000e+00 : f32
    %172 = vector.broadcast %cst_68 : f32 to vector<2x128xf32>
    %173 = arith.addf %172, %171 : vector<2x128xf32>
    %174 = arith.divf %172, %173 : vector<2x128xf32>
    %175 = vector.extract_strided_slice %174 {offsets = [0, 0], sizes = [2, 32], strides = [1, 1]} : vector<2x128xf32> to vector<2x32xf32>
    %176 = vector.extract_strided_slice %174 {offsets = [0, 32], sizes = [2, 32], strides = [1, 1]} : vector<2x128xf32> to vector<2x32xf32>
    %177 = vector.extract_strided_slice %174 {offsets = [0, 64], sizes = [2, 32], strides = [1, 1]} : vector<2x128xf32> to vector<2x32xf32>
    %cst_69 = arith.constant 2.000000e+00 : f32
    %178 = vector.broadcast %cst_69 : f32 to vector<2x32xf32>
    %179 = arith.mulf %178, %177 : vector<2x32xf32>
    %cst_70 = arith.constant 1.000000e+00 : f32
    %180 = vector.broadcast %cst_70 : f32 to vector<2x32xf32>
    %181 = arith.subf %179, %180 : vector<2x32xf32>
    %182 = vector.extract_strided_slice %174 {offsets = [0, 96], sizes = [2, 32], strides = [1, 1]} : vector<2x128xf32> to vector<2x32xf32>
    %183 = arith.mulf %176, %163 : vector<2x32xf32>
    %184 = arith.mulf %175, %181 : vector<2x32xf32>
    %185 = arith.addf %183, %184 : vector<2x32xf32>
    %186 = math.tanh %185 : vector<2x32xf32>
    %187 = arith.mulf %182, %186 : vector<2x32xf32>
    %c14_71 = arith.constant 14 : index
    %c0_72 = arith.constant 0 : index
    %188 = vector.load %arg21[%c14_71, %c0_72] : memref<16x32xf32, #tpu.memory_space<vmem>>, vector<2x32xf32>
    tpu.vector_store %arg21[%c14_71, %c0_72], %187 {strides = array<i32>} : memref<16x32xf32, #tpu.memory_space<vmem>>, vector<2x32xf32>,
    %c0_73 = arith.constant 0 : index
    %c0_74 = arith.constant 0 : index
    %189 = vector.load %arg21[%c0_73, %c0_74] : memref<16x32xf32, #tpu.memory_space<vmem>>, vector<16x32xf32>
    %c0_75 = arith.constant 0 : index
    %c0_76 = arith.constant 0 : index
    %190 = vector.load %arg3[%c0_75, %c0_76] : memref<32x128xf32, #tpu.memory_space<vmem>>, vector<32x128xf32>
    %cst_77 = arith.constant dense<0.000000e+00> : vector<16x128xf32>
    %191 = tpu.matmul %189, %190, %cst_77 {dimension_numbers = #tpu.dot_dimension_numbers<[1], [0], [0], [1], [0, 0, 1, 1], [], []>} : vector<16x32xf32>, vector<32x128xf32>, vector<16x128xf32> -> vector<16x128xf32>
    %c0_78 = arith.constant 0 : index
    %c0_79 = arith.constant 0 : index
    %192 = vector.load %arg9[%c0_78, %c0_79] : memref<1x128xf32, #tpu.memory_space<vmem>>, vector<1x128xf32>
    %193 = vector.broadcast %192 : vector<1x128xf32> to vector<16x128xf32>
    %194 = arith.addf %191, %193 : vector<16x128xf32>
    %c0_80 = arith.constant 0 : index
    %c0_81 = arith.constant 0 : index
    %195 = vector.load %arg20[%c0_80, %c0_81] : memref<16x128xf32, #tpu.memory_space<vmem>>, vector<16x128xf32>
    tpu.vector_store %arg20[%c0_80, %c0_81], %194 {strides = array<i32>} : memref<16x128xf32, #tpu.memory_space<vmem>>, vector<16x128xf32>,
    %c1 = arith.constant 1 : index
    %c0_82 = arith.constant 0 : index
    %c0_83 = arith.constant 0 : index
    %196 = vector.load %arg11[%c1, %c0_82, %c0_83] : memref<3x2x32xf32, #tpu.memory_space<vmem>>, vector<1x2x32xf32>
    %197 = vector.shape_cast %196 : vector<1x2x32xf32> to vector<2x32xf32>
    %c1_84 = arith.constant 1 : index
    %c0_85 = arith.constant 0 : index
    %c0_86 = arith.constant 0 : index
    %198 = vector.load %arg12[%c1_84, %c0_85, %c0_86] : memref<3x2x32xf32, #tpu.memory_space<vmem>>, vector<1x2x32xf32>
    %199 = vector.shape_cast %198 : vector<1x2x32xf32> to vector<2x32xf32>
    %c0_87 = arith.constant 0 : index
    %c0_88 = arith.constant 0 : index
    %200 = vector.load %arg6[%c0_87, %c0_88] : memref<32x128xf32, #tpu.memory_space<vmem>>, vector<32x128xf32>
    %c0_89 = arith.constant 0 : index
    %c0_90 = arith.constant 0 : index
    %201 = vector.load %arg20[%c0_89, %c0_90] : memref<16x128xf32, #tpu.memory_space<vmem>>, vector<2x128xf32>
    %cst_91 = arith.constant dense<0.000000e+00> : vector<2x128xf32>
    %202 = tpu.matmul %197, %200, %cst_91 {dimension_numbers = #tpu.dot_dimension_numbers<[1], [0], [0], [1], [0, 0, 1, 1], [], []>} : vector<2x32xf32>, vector<32x128xf32>, vector<2x128xf32> -> vector<2x128xf32>
    %203 = arith.addf %201, %202 : vector<2x128xf32>
    %204 = arith.negf %203 : vector<2x128xf32>
    %205 = math.exp %204 : vector<2x128xf32>
    %cst_92 = arith.constant 1.000000e+00 : f32
    %206 = vector.broadcast %cst_92 : f32 to vector<2x128xf32>
    %207 = arith.addf %206, %205 : vector<2x128xf32>
    %208 = arith.divf %206, %207 : vector<2x128xf32>
    %209 = vector.extract_strided_slice %208 {offsets = [0, 0], sizes = [2, 32], strides = [1, 1]} : vector<2x128xf32> to vector<2x32xf32>
    %210 = vector.extract_strided_slice %208 {offsets = [0, 32], sizes = [2, 32], strides = [1, 1]} : vector<2x128xf32> to vector<2x32xf32>
    %211 = vector.extract_strided_slice %208 {offsets = [0, 64], sizes = [2, 32], strides = [1, 1]} : vector<2x128xf32> to vector<2x32xf32>
    %cst_93 = arith.constant 2.000000e+00 : f32
    %212 = vector.broadcast %cst_93 : f32 to vector<2x32xf32>
    %213 = arith.mulf %212, %211 : vector<2x32xf32>
    %cst_94 = arith.constant 1.000000e+00 : f32
    %214 = vector.broadcast %cst_94 : f32 to vector<2x32xf32>
    %215 = arith.subf %213, %214 : vector<2x32xf32>
    %216 = vector.extract_strided_slice %208 {offsets = [0, 96], sizes = [2, 32], strides = [1, 1]} : vector<2x128xf32> to vector<2x32xf32>
    %217 = arith.mulf %210, %199 : vector<2x32xf32>
    %218 = arith.mulf %209, %215 : vector<2x32xf32>
    %219 = arith.addf %217, %218 : vector<2x32xf32>
    %220 = math.tanh %219 : vector<2x32xf32>
    %221 = arith.mulf %216, %220 : vector<2x32xf32>
    %c0_95 = arith.constant 0 : index
    %c0_96 = arith.constant 0 : index
    %222 = vector.load %arg21[%c0_95, %c0_96] : memref<16x32xf32, #tpu.memory_space<vmem>>, vector<2x32xf32>
    tpu.vector_store %arg21[%c0_95, %c0_96], %221 {strides = array<i32>} : memref<16x32xf32, #tpu.memory_space<vmem>>, vector<2x32xf32>,
    %c2_97 = arith.constant 2 : index
    %c0_98 = arith.constant 0 : index
    %223 = vector.load %arg20[%c2_97, %c0_98] : memref<16x128xf32, #tpu.memory_space<vmem>>, vector<2x128xf32>
    %cst_99 = arith.constant dense<0.000000e+00> : vector<2x128xf32>
    %224 = tpu.matmul %221, %200, %cst_99 {dimension_numbers = #tpu.dot_dimension_numbers<[1], [0], [0], [1], [0, 0, 1, 1], [], []>} : vector<2x32xf32>, vector<32x128xf32>, vector<2x128xf32> -> vector<2x128xf32>
    %225 = arith.addf %223, %224 : vector<2x128xf32>
    %226 = arith.negf %225 : vector<2x128xf32>
    %227 = math.exp %226 : vector<2x128xf32>
    %cst_100 = arith.constant 1.000000e+00 : f32
    %228 = vector.broadcast %cst_100 : f32 to vector<2x128xf32>
    %229 = arith.addf %228, %227 : vector<2x128xf32>
    %230 = arith.divf %228, %229 : vector<2x128xf32>
    %231 = vector.extract_strided_slice %230 {offsets = [0, 0], sizes = [2, 32], strides = [1, 1]} : vector<2x128xf32> to vector<2x32xf32>
    %232 = vector.extract_strided_slice %230 {offsets = [0, 32], sizes = [2, 32], strides = [1, 1]} : vector<2x128xf32> to vector<2x32xf32>
    %233 = vector.extract_strided_slice %230 {offsets = [0, 64], sizes = [2, 32], strides = [1, 1]} : vector<2x128xf32> to vector<2x32xf32>
    %cst_101 = arith.constant 2.000000e+00 : f32
    %234 = vector.broadcast %cst_101 : f32 to vector<2x32xf32>
    %235 = arith.mulf %234, %233 : vector<2x32xf32>
    %cst_102 = arith.constant 1.000000e+00 : f32
    %236 = vector.broadcast %cst_102 : f32 to vector<2x32xf32>
    %237 = arith.subf %235, %236 : vector<2x32xf32>
    %238 = vector.extract_strided_slice %230 {offsets = [0, 96], sizes = [2, 32], strides = [1, 1]} : vector<2x128xf32> to vector<2x32xf32>
    %239 = arith.mulf %232, %219 : vector<2x32xf32>
    %240 = arith.mulf %231, %237 : vector<2x32xf32>
    %241 = arith.addf %239, %240 : vector<2x32xf32>
    %242 = math.tanh %241 : vector<2x32xf32>
    %243 = arith.mulf %238, %242 : vector<2x32xf32>
    %c2_103 = arith.constant 2 : index
    %c0_104 = arith.constant 0 : index
    %244 = vector.load %arg21[%c2_103, %c0_104] : memref<16x32xf32, #tpu.memory_space<vmem>>, vector<2x32xf32>
    tpu.vector_store %arg21[%c2_103, %c0_104], %243 {strides = array<i32>} : memref<16x32xf32, #tpu.memory_space<vmem>>, vector<2x32xf32>,
    %c4_105 = arith.constant 4 : index
    %c0_106 = arith.constant 0 : index
    %245 = vector.load %arg20[%c4_105, %c0_106] : memref<16x128xf32, #tpu.memory_space<vmem>>, vector<2x128xf32>
    %cst_107 = arith.constant dense<0.000000e+00> : vector<2x128xf32>
    %246 = tpu.matmul %243, %200, %cst_107 {dimension_numbers = #tpu.dot_dimension_numbers<[1], [0], [0], [1], [0, 0, 1, 1], [], []>} : vector<2x32xf32>, vector<32x128xf32>, vector<2x128xf32> -> vector<2x128xf32>
    %247 = arith.addf %245, %246 : vector<2x128xf32>
    %248 = arith.negf %247 : vector<2x128xf32>
    %249 = math.exp %248 : vector<2x128xf32>
    %cst_108 = arith.constant 1.000000e+00 : f32
    %250 = vector.broadcast %cst_108 : f32 to vector<2x128xf32>
    %251 = arith.addf %250, %249 : vector<2x128xf32>
    %252 = arith.divf %250, %251 : vector<2x128xf32>
    %253 = vector.extract_strided_slice %252 {offsets = [0, 0], sizes = [2, 32], strides = [1, 1]} : vector<2x128xf32> to vector<2x32xf32>
    %254 = vector.extract_strided_slice %252 {offsets = [0, 32], sizes = [2, 32], strides = [1, 1]} : vector<2x128xf32> to vector<2x32xf32>
    %255 = vector.extract_strided_slice %252 {offsets = [0, 64], sizes = [2, 32], strides = [1, 1]} : vector<2x128xf32> to vector<2x32xf32>
    %cst_109 = arith.constant 2.000000e+00 : f32
    %256 = vector.broadcast %cst_109 : f32 to vector<2x32xf32>
    %257 = arith.mulf %256, %255 : vector<2x32xf32>
    %cst_110 = arith.constant 1.000000e+00 : f32
    %258 = vector.broadcast %cst_110 : f32 to vector<2x32xf32>
    %259 = arith.subf %257, %258 : vector<2x32xf32>
    %260 = vector.extract_strided_slice %252 {offsets = [0, 96], sizes = [2, 32], strides = [1, 1]} : vector<2x128xf32> to vector<2x32xf32>
    %261 = arith.mulf %254, %241 : vector<2x32xf32>
    %262 = arith.mulf %253, %259 : vector<2x32xf32>
    %263 = arith.addf %261, %262 : vector<2x32xf32>
    %264 = math.tanh %263 : vector<2x32xf32>
    %265 = arith.mulf %260, %264 : vector<2x32xf32>
    %c4_111 = arith.constant 4 : index
    %c0_112 = arith.constant 0 : index
    %266 = vector.load %arg21[%c4_111, %c0_112] : memref<16x32xf32, #tpu.memory_space<vmem>>, vector<2x32xf32>
    tpu.vector_store %arg21[%c4_111, %c0_112], %265 {strides = array<i32>} : memref<16x32xf32, #tpu.memory_space<vmem>>, vector<2x32xf32>,
    %c6_113 = arith.constant 6 : index
    %c0_114 = arith.constant 0 : index
    %267 = vector.load %arg20[%c6_113, %c0_114] : memref<16x128xf32, #tpu.memory_space<vmem>>, vector<2x128xf32>
    %cst_115 = arith.constant dense<0.000000e+00> : vector<2x128xf32>
    %268 = tpu.matmul %265, %200, %cst_115 {dimension_numbers = #tpu.dot_dimension_numbers<[1], [0], [0], [1], [0, 0, 1, 1], [], []>} : vector<2x32xf32>, vector<32x128xf32>, vector<2x128xf32> -> vector<2x128xf32>
    %269 = arith.addf %267, %268 : vector<2x128xf32>
    %270 = arith.negf %269 : vector<2x128xf32>
    %271 = math.exp %270 : vector<2x128xf32>
    %cst_116 = arith.constant 1.000000e+00 : f32
    %272 = vector.broadcast %cst_116 : f32 to vector<2x128xf32>
    %273 = arith.addf %272, %271 : vector<2x128xf32>
    %274 = arith.divf %272, %273 : vector<2x128xf32>
    %275 = vector.extract_strided_slice %274 {offsets = [0, 0], sizes = [2, 32], strides = [1, 1]} : vector<2x128xf32> to vector<2x32xf32>
    %276 = vector.extract_strided_slice %274 {offsets = [0, 32], sizes = [2, 32], strides = [1, 1]} : vector<2x128xf32> to vector<2x32xf32>
    %277 = vector.extract_strided_slice %274 {offsets = [0, 64], sizes = [2, 32], strides = [1, 1]} : vector<2x128xf32> to vector<2x32xf32>
    %cst_117 = arith.constant 2.000000e+00 : f32
    %278 = vector.broadcast %cst_117 : f32 to vector<2x32xf32>
    %279 = arith.mulf %278, %277 : vector<2x32xf32>
    %cst_118 = arith.constant 1.000000e+00 : f32
    %280 = vector.broadcast %cst_118 : f32 to vector<2x32xf32>
    %281 = arith.subf %279, %280 : vector<2x32xf32>
    %282 = vector.extract_strided_slice %274 {offsets = [0, 96], sizes = [2, 32], strides = [1, 1]} : vector<2x128xf32> to vector<2x32xf32>
    %283 = arith.mulf %276, %263 : vector<2x32xf32>
    %284 = arith.mulf %275, %281 : vector<2x32xf32>
    %285 = arith.addf %283, %284 : vector<2x32xf32>
    %286 = math.tanh %285 : vector<2x32xf32>
    %287 = arith.mulf %282, %286 : vector<2x32xf32>
    %c6_119 = arith.constant 6 : index
    %c0_120 = arith.constant 0 : index
    %288 = vector.load %arg21[%c6_119, %c0_120] : memref<16x32xf32, #tpu.memory_space<vmem>>, vector<2x32xf32>
    tpu.vector_store %arg21[%c6_119, %c0_120], %287 {strides = array<i32>} : memref<16x32xf32, #tpu.memory_space<vmem>>, vector<2x32xf32>,
    %c8_121 = arith.constant 8 : index
    %c0_122 = arith.constant 0 : index
    %289 = vector.load %arg20[%c8_121, %c0_122] : memref<16x128xf32, #tpu.memory_space<vmem>>, vector<2x128xf32>
    %cst_123 = arith.constant dense<0.000000e+00> : vector<2x128xf32>
    %290 = tpu.matmul %287, %200, %cst_123 {dimension_numbers = #tpu.dot_dimension_numbers<[1], [0], [0], [1], [0, 0, 1, 1], [], []>} : vector<2x32xf32>, vector<32x128xf32>, vector<2x128xf32> -> vector<2x128xf32>
    %291 = arith.addf %289, %290 : vector<2x128xf32>
    %292 = arith.negf %291 : vector<2x128xf32>
    %293 = math.exp %292 : vector<2x128xf32>
    %cst_124 = arith.constant 1.000000e+00 : f32
    %294 = vector.broadcast %cst_124 : f32 to vector<2x128xf32>
    %295 = arith.addf %294, %293 : vector<2x128xf32>
    %296 = arith.divf %294, %295 : vector<2x128xf32>
    %297 = vector.extract_strided_slice %296 {offsets = [0, 0], sizes = [2, 32], strides = [1, 1]} : vector<2x128xf32> to vector<2x32xf32>
    %298 = vector.extract_strided_slice %296 {offsets = [0, 32], sizes = [2, 32], strides = [1, 1]} : vector<2x128xf32> to vector<2x32xf32>
    %299 = vector.extract_strided_slice %296 {offsets = [0, 64], sizes = [2, 32], strides = [1, 1]} : vector<2x128xf32> to vector<2x32xf32>
    %cst_125 = arith.constant 2.000000e+00 : f32
    %300 = vector.broadcast %cst_125 : f32 to vector<2x32xf32>
    %301 = arith.mulf %300, %299 : vector<2x32xf32>
    %cst_126 = arith.constant 1.000000e+00 : f32
    %302 = vector.broadcast %cst_126 : f32 to vector<2x32xf32>
    %303 = arith.subf %301, %302 : vector<2x32xf32>
    %304 = vector.extract_strided_slice %296 {offsets = [0, 96], sizes = [2, 32], strides = [1, 1]} : vector<2x128xf32> to vector<2x32xf32>
    %305 = arith.mulf %298, %285 : vector<2x32xf32>
    %306 = arith.mulf %297, %303 : vector<2x32xf32>
    %307 = arith.addf %305, %306 : vector<2x32xf32>
    %308 = math.tanh %307 : vector<2x32xf32>
    %309 = arith.mulf %304, %308 : vector<2x32xf32>
    %c8_127 = arith.constant 8 : index
    %c0_128 = arith.constant 0 : index
    %310 = vector.load %arg21[%c8_127, %c0_128] : memref<16x32xf32, #tpu.memory_space<vmem>>, vector<2x32xf32>
    tpu.vector_store %arg21[%c8_127, %c0_128], %309 {strides = array<i32>} : memref<16x32xf32, #tpu.memory_space<vmem>>, vector<2x32xf32>,
    %c10_129 = arith.constant 10 : index
    %c0_130 = arith.constant 0 : index
    %311 = vector.load %arg20[%c10_129, %c0_130] : memref<16x128xf32, #tpu.memory_space<vmem>>, vector<2x128xf32>
    %cst_131 = arith.constant dense<0.000000e+00> : vector<2x128xf32>
    %312 = tpu.matmul %309, %200, %cst_131 {dimension_numbers = #tpu.dot_dimension_numbers<[1], [0], [0], [1], [0, 0, 1, 1], [], []>} : vector<2x32xf32>, vector<32x128xf32>, vector<2x128xf32> -> vector<2x128xf32>
    %313 = arith.addf %311, %312 : vector<2x128xf32>
    %314 = arith.negf %313 : vector<2x128xf32>
    %315 = math.exp %314 : vector<2x128xf32>
    %cst_132 = arith.constant 1.000000e+00 : f32
    %316 = vector.broadcast %cst_132 : f32 to vector<2x128xf32>
    %317 = arith.addf %316, %315 : vector<2x128xf32>
    %318 = arith.divf %316, %317 : vector<2x128xf32>
    %319 = vector.extract_strided_slice %318 {offsets = [0, 0], sizes = [2, 32], strides = [1, 1]} : vector<2x128xf32> to vector<2x32xf32>
    %320 = vector.extract_strided_slice %318 {offsets = [0, 32], sizes = [2, 32], strides = [1, 1]} : vector<2x128xf32> to vector<2x32xf32>
    %321 = vector.extract_strided_slice %318 {offsets = [0, 64], sizes = [2, 32], strides = [1, 1]} : vector<2x128xf32> to vector<2x32xf32>
    %cst_133 = arith.constant 2.000000e+00 : f32
    %322 = vector.broadcast %cst_133 : f32 to vector<2x32xf32>
    %323 = arith.mulf %322, %321 : vector<2x32xf32>
    %cst_134 = arith.constant 1.000000e+00 : f32
    %324 = vector.broadcast %cst_134 : f32 to vector<2x32xf32>
    %325 = arith.subf %323, %324 : vector<2x32xf32>
    %326 = vector.extract_strided_slice %318 {offsets = [0, 96], sizes = [2, 32], strides = [1, 1]} : vector<2x128xf32> to vector<2x32xf32>
    %327 = arith.mulf %320, %307 : vector<2x32xf32>
    %328 = arith.mulf %319, %325 : vector<2x32xf32>
    %329 = arith.addf %327, %328 : vector<2x32xf32>
    %330 = math.tanh %329 : vector<2x32xf32>
    %331 = arith.mulf %326, %330 : vector<2x32xf32>
    %c10_135 = arith.constant 10 : index
    %c0_136 = arith.constant 0 : index
    %332 = vector.load %arg21[%c10_135, %c0_136] : memref<16x32xf32, #tpu.memory_space<vmem>>, vector<2x32xf32>
    tpu.vector_store %arg21[%c10_135, %c0_136], %331 {strides = array<i32>} : memref<16x32xf32, #tpu.memory_space<vmem>>, vector<2x32xf32>,
    %c12_137 = arith.constant 12 : index
    %c0_138 = arith.constant 0 : index
    %333 = vector.load %arg20[%c12_137, %c0_138] : memref<16x128xf32, #tpu.memory_space<vmem>>, vector<2x128xf32>
    %cst_139 = arith.constant dense<0.000000e+00> : vector<2x128xf32>
    %334 = tpu.matmul %331, %200, %cst_139 {dimension_numbers = #tpu.dot_dimension_numbers<[1], [0], [0], [1], [0, 0, 1, 1], [], []>} : vector<2x32xf32>, vector<32x128xf32>, vector<2x128xf32> -> vector<2x128xf32>
    %335 = arith.addf %333, %334 : vector<2x128xf32>
    %336 = arith.negf %335 : vector<2x128xf32>
    %337 = math.exp %336 : vector<2x128xf32>
    %cst_140 = arith.constant 1.000000e+00 : f32
    %338 = vector.broadcast %cst_140 : f32 to vector<2x128xf32>
    %339 = arith.addf %338, %337 : vector<2x128xf32>
    %340 = arith.divf %338, %339 : vector<2x128xf32>
    %341 = vector.extract_strided_slice %340 {offsets = [0, 0], sizes = [2, 32], strides = [1, 1]} : vector<2x128xf32> to vector<2x32xf32>
    %342 = vector.extract_strided_slice %340 {offsets = [0, 32], sizes = [2, 32], strides = [1, 1]} : vector<2x128xf32> to vector<2x32xf32>
    %343 = vector.extract_strided_slice %340 {offsets = [0, 64], sizes = [2, 32], strides = [1, 1]} : vector<2x128xf32> to vector<2x32xf32>
    %cst_141 = arith.constant 2.000000e+00 : f32
    %344 = vector.broadcast %cst_141 : f32 to vector<2x32xf32>
    %345 = arith.mulf %344, %343 : vector<2x32xf32>
    %cst_142 = arith.constant 1.000000e+00 : f32
    %346 = vector.broadcast %cst_142 : f32 to vector<2x32xf32>
    %347 = arith.subf %345, %346 : vector<2x32xf32>
    %348 = vector.extract_strided_slice %340 {offsets = [0, 96], sizes = [2, 32], strides = [1, 1]} : vector<2x128xf32> to vector<2x32xf32>
    %349 = arith.mulf %342, %329 : vector<2x32xf32>
    %350 = arith.mulf %341, %347 : vector<2x32xf32>
    %351 = arith.addf %349, %350 : vector<2x32xf32>
    %352 = math.tanh %351 : vector<2x32xf32>
    %353 = arith.mulf %348, %352 : vector<2x32xf32>
    %c12_143 = arith.constant 12 : index
    %c0_144 = arith.constant 0 : index
    %354 = vector.load %arg21[%c12_143, %c0_144] : memref<16x32xf32, #tpu.memory_space<vmem>>, vector<2x32xf32>
    tpu.vector_store %arg21[%c12_143, %c0_144], %353 {strides = array<i32>} : memref<16x32xf32, #tpu.memory_space<vmem>>, vector<2x32xf32>,
    %c14_145 = arith.constant 14 : index
    %c0_146 = arith.constant 0 : index
    %355 = vector.load %arg20[%c14_145, %c0_146] : memref<16x128xf32, #tpu.memory_space<vmem>>, vector<2x128xf32>
    %cst_147 = arith.constant dense<0.000000e+00> : vector<2x128xf32>
    %356 = tpu.matmul %353, %200, %cst_147 {dimension_numbers = #tpu.dot_dimension_numbers<[1], [0], [0], [1], [0, 0, 1, 1], [], []>} : vector<2x32xf32>, vector<32x128xf32>, vector<2x128xf32> -> vector<2x128xf32>
    %357 = arith.addf %355, %356 : vector<2x128xf32>
    %358 = arith.negf %357 : vector<2x128xf32>
    %359 = math.exp %358 : vector<2x128xf32>
    %cst_148 = arith.constant 1.000000e+00 : f32
    %360 = vector.broadcast %cst_148 : f32 to vector<2x128xf32>
    %361 = arith.addf %360, %359 : vector<2x128xf32>
    %362 = arith.divf %360, %361 : vector<2x128xf32>
    %363 = vector.extract_strided_slice %362 {offsets = [0, 0], sizes = [2, 32], strides = [1, 1]} : vector<2x128xf32> to vector<2x32xf32>
    %364 = vector.extract_strided_slice %362 {offsets = [0, 32], sizes = [2, 32], strides = [1, 1]} : vector<2x128xf32> to vector<2x32xf32>
    %365 = vector.extract_strided_slice %362 {offsets = [0, 64], sizes = [2, 32], strides = [1, 1]} : vector<2x128xf32> to vector<2x32xf32>
    %cst_149 = arith.constant 2.000000e+00 : f32
    %366 = vector.broadcast %cst_149 : f32 to vector<2x32xf32>
    %367 = arith.mulf %366, %365 : vector<2x32xf32>
    %cst_150 = arith.constant 1.000000e+00 : f32
    %368 = vector.broadcast %cst_150 : f32 to vector<2x32xf32>
    %369 = arith.subf %367, %368 : vector<2x32xf32>
    %370 = vector.extract_strided_slice %362 {offsets = [0, 96], sizes = [2, 32], strides = [1, 1]} : vector<2x128xf32> to vector<2x32xf32>
    %371 = arith.mulf %364, %351 : vector<2x32xf32>
    %372 = arith.mulf %363, %369 : vector<2x32xf32>
    %373 = arith.addf %371, %372 : vector<2x32xf32>
    %374 = math.tanh %373 : vector<2x32xf32>
    %375 = arith.mulf %370, %374 : vector<2x32xf32>
    %c14_151 = arith.constant 14 : index
    %c0_152 = arith.constant 0 : index
    %376 = vector.load %arg21[%c14_151, %c0_152] : memref<16x32xf32, #tpu.memory_space<vmem>>, vector<2x32xf32>
    tpu.vector_store %arg21[%c14_151, %c0_152], %375 {strides = array<i32>} : memref<16x32xf32, #tpu.memory_space<vmem>>, vector<2x32xf32>,
    %c0_153 = arith.constant 0 : index
    %c0_154 = arith.constant 0 : index
    %377 = vector.load %arg21[%c0_153, %c0_154] : memref<16x32xf32, #tpu.memory_space<vmem>>, vector<16x32xf32>
    %c0_155 = arith.constant 0 : index
    %c0_156 = arith.constant 0 : index
    %378 = vector.load %arg4[%c0_155, %c0_156] : memref<32x128xf32, #tpu.memory_space<vmem>>, vector<32x128xf32>
    %cst_157 = arith.constant dense<0.000000e+00> : vector<16x128xf32>
    %379 = tpu.matmul %377, %378, %cst_157 {dimension_numbers = #tpu.dot_dimension_numbers<[1], [0], [0], [1], [0, 0, 1, 1], [], []>} : vector<16x32xf32>, vector<32x128xf32>, vector<16x128xf32> -> vector<16x128xf32>
    %c0_158 = arith.constant 0 : index
    %c0_159 = arith.constant 0 : index
    %380 = vector.load %arg10[%c0_158, %c0_159] : memref<1x128xf32, #tpu.memory_space<vmem>>, vector<1x128xf32>
    %381 = vector.broadcast %380 : vector<1x128xf32> to vector<16x128xf32>
    %382 = arith.addf %379, %381 : vector<16x128xf32>
    %c0_160 = arith.constant 0 : index
    %c0_161 = arith.constant 0 : index
    %383 = vector.load %arg20[%c0_160, %c0_161] : memref<16x128xf32, #tpu.memory_space<vmem>>, vector<16x128xf32>
    tpu.vector_store %arg20[%c0_160, %c0_161], %382 {strides = array<i32>} : memref<16x128xf32, #tpu.memory_space<vmem>>, vector<16x128xf32>,
    %c2_162 = arith.constant 2 : index
    %c0_163 = arith.constant 0 : index
    %c0_164 = arith.constant 0 : index
    %384 = vector.load %arg11[%c2_162, %c0_163, %c0_164] : memref<3x2x32xf32, #tpu.memory_space<vmem>>, vector<1x2x32xf32>
    %385 = vector.shape_cast %384 : vector<1x2x32xf32> to vector<2x32xf32>
    %c2_165 = arith.constant 2 : index
    %c0_166 = arith.constant 0 : index
    %c0_167 = arith.constant 0 : index
    %386 = vector.load %arg12[%c2_165, %c0_166, %c0_167] : memref<3x2x32xf32, #tpu.memory_space<vmem>>, vector<1x2x32xf32>
    %387 = vector.shape_cast %386 : vector<1x2x32xf32> to vector<2x32xf32>
    %c0_168 = arith.constant 0 : index
    %c0_169 = arith.constant 0 : index
    %388 = vector.load %arg7[%c0_168, %c0_169] : memref<32x128xf32, #tpu.memory_space<vmem>>, vector<32x128xf32>
    %c0_170 = arith.constant 0 : index
    %c0_171 = arith.constant 0 : index
    %389 = vector.load %arg20[%c0_170, %c0_171] : memref<16x128xf32, #tpu.memory_space<vmem>>, vector<2x128xf32>
    %cst_172 = arith.constant dense<0.000000e+00> : vector<2x128xf32>
    %390 = tpu.matmul %385, %388, %cst_172 {dimension_numbers = #tpu.dot_dimension_numbers<[1], [0], [0], [1], [0, 0, 1, 1], [], []>} : vector<2x32xf32>, vector<32x128xf32>, vector<2x128xf32> -> vector<2x128xf32>
    %391 = arith.addf %389, %390 : vector<2x128xf32>
    %392 = arith.negf %391 : vector<2x128xf32>
    %393 = math.exp %392 : vector<2x128xf32>
    %cst_173 = arith.constant 1.000000e+00 : f32
    %394 = vector.broadcast %cst_173 : f32 to vector<2x128xf32>
    %395 = arith.addf %394, %393 : vector<2x128xf32>
    %396 = arith.divf %394, %395 : vector<2x128xf32>
    %397 = vector.extract_strided_slice %396 {offsets = [0, 0], sizes = [2, 32], strides = [1, 1]} : vector<2x128xf32> to vector<2x32xf32>
    %398 = vector.extract_strided_slice %396 {offsets = [0, 32], sizes = [2, 32], strides = [1, 1]} : vector<2x128xf32> to vector<2x32xf32>
    %399 = vector.extract_strided_slice %396 {offsets = [0, 64], sizes = [2, 32], strides = [1, 1]} : vector<2x128xf32> to vector<2x32xf32>
    %cst_174 = arith.constant 2.000000e+00 : f32
    %400 = vector.broadcast %cst_174 : f32 to vector<2x32xf32>
    %401 = arith.mulf %400, %399 : vector<2x32xf32>
    %cst_175 = arith.constant 1.000000e+00 : f32
    %402 = vector.broadcast %cst_175 : f32 to vector<2x32xf32>
    %403 = arith.subf %401, %402 : vector<2x32xf32>
    %404 = vector.extract_strided_slice %396 {offsets = [0, 96], sizes = [2, 32], strides = [1, 1]} : vector<2x128xf32> to vector<2x32xf32>
    %405 = arith.mulf %398, %387 : vector<2x32xf32>
    %406 = arith.mulf %397, %403 : vector<2x32xf32>
    %407 = arith.addf %405, %406 : vector<2x32xf32>
    %408 = math.tanh %407 : vector<2x32xf32>
    %409 = arith.mulf %404, %408 : vector<2x32xf32>
    %c0_176 = arith.constant 0 : index
    %c0_177 = arith.constant 0 : index
    %410 = vector.load %arg13[%c0_176, %c0_177] : memref<256x120xf32, #tpu.memory_space<vmem>>, vector<32x120xf32>
    %cst_178 = arith.constant dense<0.000000e+00> : vector<2x120xf32>
    %411 = tpu.matmul %409, %410, %cst_178 {dimension_numbers = #tpu.dot_dimension_numbers<[1], [0], [0], [1], [0, 0, 1, 1], [], []>} : vector<2x32xf32>, vector<32x120xf32>, vector<2x120xf32> -> vector<2x120xf32>
    %412 = arith.addf %0, %411 : vector<2x120xf32>
    %c2_179 = arith.constant 2 : index
    %c0_180 = arith.constant 0 : index
    %413 = vector.load %arg20[%c2_179, %c0_180] : memref<16x128xf32, #tpu.memory_space<vmem>>, vector<2x128xf32>
    %cst_181 = arith.constant dense<0.000000e+00> : vector<2x128xf32>
    %414 = tpu.matmul %409, %388, %cst_181 {dimension_numbers = #tpu.dot_dimension_numbers<[1], [0], [0], [1], [0, 0, 1, 1], [], []>} : vector<2x32xf32>, vector<32x128xf32>, vector<2x128xf32> -> vector<2x128xf32>
    %415 = arith.addf %413, %414 : vector<2x128xf32>
    %416 = arith.negf %415 : vector<2x128xf32>
    %417 = math.exp %416 : vector<2x128xf32>
    %cst_182 = arith.constant 1.000000e+00 : f32
    %418 = vector.broadcast %cst_182 : f32 to vector<2x128xf32>
    %419 = arith.addf %418, %417 : vector<2x128xf32>
    %420 = arith.divf %418, %419 : vector<2x128xf32>
    %421 = vector.extract_strided_slice %420 {offsets = [0, 0], sizes = [2, 32], strides = [1, 1]} : vector<2x128xf32> to vector<2x32xf32>
    %422 = vector.extract_strided_slice %420 {offsets = [0, 32], sizes = [2, 32], strides = [1, 1]} : vector<2x128xf32> to vector<2x32xf32>
    %423 = vector.extract_strided_slice %420 {offsets = [0, 64], sizes = [2, 32], strides = [1, 1]} : vector<2x128xf32> to vector<2x32xf32>
    %cst_183 = arith.constant 2.000000e+00 : f32
    %424 = vector.broadcast %cst_183 : f32 to vector<2x32xf32>
    %425 = arith.mulf %424, %423 : vector<2x32xf32>
    %cst_184 = arith.constant 1.000000e+00 : f32
    %426 = vector.broadcast %cst_184 : f32 to vector<2x32xf32>
    %427 = arith.subf %425, %426 : vector<2x32xf32>
    %428 = vector.extract_strided_slice %420 {offsets = [0, 96], sizes = [2, 32], strides = [1, 1]} : vector<2x128xf32> to vector<2x32xf32>
    %429 = arith.mulf %422, %407 : vector<2x32xf32>
    %430 = arith.mulf %421, %427 : vector<2x32xf32>
    %431 = arith.addf %429, %430 : vector<2x32xf32>
    %432 = math.tanh %431 : vector<2x32xf32>
    %433 = arith.mulf %428, %432 : vector<2x32xf32>
    %c32 = arith.constant 32 : index
    %c0_185 = arith.constant 0 : index
    %434 = vector.load %arg13[%c32, %c0_185] : memref<256x120xf32, #tpu.memory_space<vmem>>, vector<32x120xf32>
    %cst_186 = arith.constant dense<0.000000e+00> : vector<2x120xf32>
    %435 = tpu.matmul %433, %434, %cst_186 {dimension_numbers = #tpu.dot_dimension_numbers<[1], [0], [0], [1], [0, 0, 1, 1], [], []>} : vector<2x32xf32>, vector<32x120xf32>, vector<2x120xf32> -> vector<2x120xf32>
    %436 = arith.addf %412, %435 : vector<2x120xf32>
    %c4_187 = arith.constant 4 : index
    %c0_188 = arith.constant 0 : index
    %437 = vector.load %arg20[%c4_187, %c0_188] : memref<16x128xf32, #tpu.memory_space<vmem>>, vector<2x128xf32>
    %cst_189 = arith.constant dense<0.000000e+00> : vector<2x128xf32>
    %438 = tpu.matmul %433, %388, %cst_189 {dimension_numbers = #tpu.dot_dimension_numbers<[1], [0], [0], [1], [0, 0, 1, 1], [], []>} : vector<2x32xf32>, vector<32x128xf32>, vector<2x128xf32> -> vector<2x128xf32>
    %439 = arith.addf %437, %438 : vector<2x128xf32>
    %440 = arith.negf %439 : vector<2x128xf32>
    %441 = math.exp %440 : vector<2x128xf32>
    %cst_190 = arith.constant 1.000000e+00 : f32
    %442 = vector.broadcast %cst_190 : f32 to vector<2x128xf32>
    %443 = arith.addf %442, %441 : vector<2x128xf32>
    %444 = arith.divf %442, %443 : vector<2x128xf32>
    %445 = vector.extract_strided_slice %444 {offsets = [0, 0], sizes = [2, 32], strides = [1, 1]} : vector<2x128xf32> to vector<2x32xf32>
    %446 = vector.extract_strided_slice %444 {offsets = [0, 32], sizes = [2, 32], strides = [1, 1]} : vector<2x128xf32> to vector<2x32xf32>
    %447 = vector.extract_strided_slice %444 {offsets = [0, 64], sizes = [2, 32], strides = [1, 1]} : vector<2x128xf32> to vector<2x32xf32>
    %cst_191 = arith.constant 2.000000e+00 : f32
    %448 = vector.broadcast %cst_191 : f32 to vector<2x32xf32>
    %449 = arith.mulf %448, %447 : vector<2x32xf32>
    %cst_192 = arith.constant 1.000000e+00 : f32
    %450 = vector.broadcast %cst_192 : f32 to vector<2x32xf32>
    %451 = arith.subf %449, %450 : vector<2x32xf32>
    %452 = vector.extract_strided_slice %444 {offsets = [0, 96], sizes = [2, 32], strides = [1, 1]} : vector<2x128xf32> to vector<2x32xf32>
    %453 = arith.mulf %446, %431 : vector<2x32xf32>
    %454 = arith.mulf %445, %451 : vector<2x32xf32>
    %455 = arith.addf %453, %454 : vector<2x32xf32>
    %456 = math.tanh %455 : vector<2x32xf32>
    %457 = arith.mulf %452, %456 : vector<2x32xf32>
    %c64 = arith.constant 64 : index
    %c0_193 = arith.constant 0 : index
    %458 = vector.load %arg13[%c64, %c0_193] : memref<256x120xf32, #tpu.memory_space<vmem>>, vector<32x120xf32>
    %cst_194 = arith.constant dense<0.000000e+00> : vector<2x120xf32>
    %459 = tpu.matmul %457, %458, %cst_194 {dimension_numbers = #tpu.dot_dimension_numbers<[1], [0], [0], [1], [0, 0, 1, 1], [], []>} : vector<2x32xf32>, vector<32x120xf32>, vector<2x120xf32> -> vector<2x120xf32>
    %460 = arith.addf %436, %459 : vector<2x120xf32>
    %c6_195 = arith.constant 6 : index
    %c0_196 = arith.constant 0 : index
    %461 = vector.load %arg20[%c6_195, %c0_196] : memref<16x128xf32, #tpu.memory_space<vmem>>, vector<2x128xf32>
    %cst_197 = arith.constant dense<0.000000e+00> : vector<2x128xf32>
    %462 = tpu.matmul %457, %388, %cst_197 {dimension_numbers = #tpu.dot_dimension_numbers<[1], [0], [0], [1], [0, 0, 1, 1], [], []>} : vector<2x32xf32>, vector<32x128xf32>, vector<2x128xf32> -> vector<2x128xf32>
    %463 = arith.addf %461, %462 : vector<2x128xf32>
    %464 = arith.negf %463 : vector<2x128xf32>
    %465 = math.exp %464 : vector<2x128xf32>
    %cst_198 = arith.constant 1.000000e+00 : f32
    %466 = vector.broadcast %cst_198 : f32 to vector<2x128xf32>
    %467 = arith.addf %466, %465 : vector<2x128xf32>
    %468 = arith.divf %466, %467 : vector<2x128xf32>
    %469 = vector.extract_strided_slice %468 {offsets = [0, 0], sizes = [2, 32], strides = [1, 1]} : vector<2x128xf32> to vector<2x32xf32>
    %470 = vector.extract_strided_slice %468 {offsets = [0, 32], sizes = [2, 32], strides = [1, 1]} : vector<2x128xf32> to vector<2x32xf32>
    %471 = vector.extract_strided_slice %468 {offsets = [0, 64], sizes = [2, 32], strides = [1, 1]} : vector<2x128xf32> to vector<2x32xf32>
    %cst_199 = arith.constant 2.000000e+00 : f32
    %472 = vector.broadcast %cst_199 : f32 to vector<2x32xf32>
    %473 = arith.mulf %472, %471 : vector<2x32xf32>
    %cst_200 = arith.constant 1.000000e+00 : f32
    %474 = vector.broadcast %cst_200 : f32 to vector<2x32xf32>
    %475 = arith.subf %473, %474 : vector<2x32xf32>
    %476 = vector.extract_strided_slice %468 {offsets = [0, 96], sizes = [2, 32], strides = [1, 1]} : vector<2x128xf32> to vector<2x32xf32>
    %477 = arith.mulf %470, %455 : vector<2x32xf32>
    %478 = arith.mulf %469, %475 : vector<2x32xf32>
    %479 = arith.addf %477, %478 : vector<2x32xf32>
    %480 = math.tanh %479 : vector<2x32xf32>
    %481 = arith.mulf %476, %480 : vector<2x32xf32>
    %c96 = arith.constant 96 : index
    %c0_201 = arith.constant 0 : index
    %482 = vector.load %arg13[%c96, %c0_201] : memref<256x120xf32, #tpu.memory_space<vmem>>, vector<32x120xf32>
    %cst_202 = arith.constant dense<0.000000e+00> : vector<2x120xf32>
    %483 = tpu.matmul %481, %482, %cst_202 {dimension_numbers = #tpu.dot_dimension_numbers<[1], [0], [0], [1], [0, 0, 1, 1], [], []>} : vector<2x32xf32>, vector<32x120xf32>, vector<2x120xf32> -> vector<2x120xf32>
    %484 = arith.addf %460, %483 : vector<2x120xf32>
    %c8_203 = arith.constant 8 : index
    %c0_204 = arith.constant 0 : index
    %485 = vector.load %arg20[%c8_203, %c0_204] : memref<16x128xf32, #tpu.memory_space<vmem>>, vector<2x128xf32>
    %cst_205 = arith.constant dense<0.000000e+00> : vector<2x128xf32>
    %486 = tpu.matmul %481, %388, %cst_205 {dimension_numbers = #tpu.dot_dimension_numbers<[1], [0], [0], [1], [0, 0, 1, 1], [], []>} : vector<2x32xf32>, vector<32x128xf32>, vector<2x128xf32> -> vector<2x128xf32>
    %487 = arith.addf %485, %486 : vector<2x128xf32>
    %488 = arith.negf %487 : vector<2x128xf32>
    %489 = math.exp %488 : vector<2x128xf32>
    %cst_206 = arith.constant 1.000000e+00 : f32
    %490 = vector.broadcast %cst_206 : f32 to vector<2x128xf32>
    %491 = arith.addf %490, %489 : vector<2x128xf32>
    %492 = arith.divf %490, %491 : vector<2x128xf32>
    %493 = vector.extract_strided_slice %492 {offsets = [0, 0], sizes = [2, 32], strides = [1, 1]} : vector<2x128xf32> to vector<2x32xf32>
    %494 = vector.extract_strided_slice %492 {offsets = [0, 32], sizes = [2, 32], strides = [1, 1]} : vector<2x128xf32> to vector<2x32xf32>
    %495 = vector.extract_strided_slice %492 {offsets = [0, 64], sizes = [2, 32], strides = [1, 1]} : vector<2x128xf32> to vector<2x32xf32>
    %cst_207 = arith.constant 2.000000e+00 : f32
    %496 = vector.broadcast %cst_207 : f32 to vector<2x32xf32>
    %497 = arith.mulf %496, %495 : vector<2x32xf32>
    %cst_208 = arith.constant 1.000000e+00 : f32
    %498 = vector.broadcast %cst_208 : f32 to vector<2x32xf32>
    %499 = arith.subf %497, %498 : vector<2x32xf32>
    %500 = vector.extract_strided_slice %492 {offsets = [0, 96], sizes = [2, 32], strides = [1, 1]} : vector<2x128xf32> to vector<2x32xf32>
    %501 = arith.mulf %494, %479 : vector<2x32xf32>
    %502 = arith.mulf %493, %499 : vector<2x32xf32>
    %503 = arith.addf %501, %502 : vector<2x32xf32>
    %504 = math.tanh %503 : vector<2x32xf32>
    %505 = arith.mulf %500, %504 : vector<2x32xf32>
    %c128 = arith.constant 128 : index
    %c0_209 = arith.constant 0 : index
    %506 = vector.load %arg13[%c128, %c0_209] : memref<256x120xf32, #tpu.memory_space<vmem>>, vector<32x120xf32>
    %cst_210 = arith.constant dense<0.000000e+00> : vector<2x120xf32>
    %507 = tpu.matmul %505, %506, %cst_210 {dimension_numbers = #tpu.dot_dimension_numbers<[1], [0], [0], [1], [0, 0, 1, 1], [], []>} : vector<2x32xf32>, vector<32x120xf32>, vector<2x120xf32> -> vector<2x120xf32>
    %508 = arith.addf %484, %507 : vector<2x120xf32>
    %c10_211 = arith.constant 10 : index
    %c0_212 = arith.constant 0 : index
    %509 = vector.load %arg20[%c10_211, %c0_212] : memref<16x128xf32, #tpu.memory_space<vmem>>, vector<2x128xf32>
    %cst_213 = arith.constant dense<0.000000e+00> : vector<2x128xf32>
    %510 = tpu.matmul %505, %388, %cst_213 {dimension_numbers = #tpu.dot_dimension_numbers<[1], [0], [0], [1], [0, 0, 1, 1], [], []>} : vector<2x32xf32>, vector<32x128xf32>, vector<2x128xf32> -> vector<2x128xf32>
    %511 = arith.addf %509, %510 : vector<2x128xf32>
    %512 = arith.negf %511 : vector<2x128xf32>
    %513 = math.exp %512 : vector<2x128xf32>
    %cst_214 = arith.constant 1.000000e+00 : f32
    %514 = vector.broadcast %cst_214 : f32 to vector<2x128xf32>
    %515 = arith.addf %514, %513 : vector<2x128xf32>
    %516 = arith.divf %514, %515 : vector<2x128xf32>
    %517 = vector.extract_strided_slice %516 {offsets = [0, 0], sizes = [2, 32], strides = [1, 1]} : vector<2x128xf32> to vector<2x32xf32>
    %518 = vector.extract_strided_slice %516 {offsets = [0, 32], sizes = [2, 32], strides = [1, 1]} : vector<2x128xf32> to vector<2x32xf32>
    %519 = vector.extract_strided_slice %516 {offsets = [0, 64], sizes = [2, 32], strides = [1, 1]} : vector<2x128xf32> to vector<2x32xf32>
    %cst_215 = arith.constant 2.000000e+00 : f32
    %520 = vector.broadcast %cst_215 : f32 to vector<2x32xf32>
    %521 = arith.mulf %520, %519 : vector<2x32xf32>
    %cst_216 = arith.constant 1.000000e+00 : f32
    %522 = vector.broadcast %cst_216 : f32 to vector<2x32xf32>
    %523 = arith.subf %521, %522 : vector<2x32xf32>
    %524 = vector.extract_strided_slice %516 {offsets = [0, 96], sizes = [2, 32], strides = [1, 1]} : vector<2x128xf32> to vector<2x32xf32>
    %525 = arith.mulf %518, %503 : vector<2x32xf32>
    %526 = arith.mulf %517, %523 : vector<2x32xf32>
    %527 = arith.addf %525, %526 : vector<2x32xf32>
    %528 = math.tanh %527 : vector<2x32xf32>
    %529 = arith.mulf %524, %528 : vector<2x32xf32>
    %c160 = arith.constant 160 : index
    %c0_217 = arith.constant 0 : index
    %530 = vector.load %arg13[%c160, %c0_217] : memref<256x120xf32, #tpu.memory_space<vmem>>, vector<32x120xf32>
    %cst_218 = arith.constant dense<0.000000e+00> : vector<2x120xf32>
    %531 = tpu.matmul %529, %530, %cst_218 {dimension_numbers = #tpu.dot_dimension_numbers<[1], [0], [0], [1], [0, 0, 1, 1], [], []>} : vector<2x32xf32>, vector<32x120xf32>, vector<2x120xf32> -> vector<2x120xf32>
    %532 = arith.addf %508, %531 : vector<2x120xf32>
    %c12_219 = arith.constant 12 : index
    %c0_220 = arith.constant 0 : index
    %533 = vector.load %arg20[%c12_219, %c0_220] : memref<16x128xf32, #tpu.memory_space<vmem>>, vector<2x128xf32>
    %cst_221 = arith.constant dense<0.000000e+00> : vector<2x128xf32>
    %534 = tpu.matmul %529, %388, %cst_221 {dimension_numbers = #tpu.dot_dimension_numbers<[1], [0], [0], [1], [0, 0, 1, 1], [], []>} : vector<2x32xf32>, vector<32x128xf32>, vector<2x128xf32> -> vector<2x128xf32>
    %535 = arith.addf %533, %534 : vector<2x128xf32>
    %536 = arith.negf %535 : vector<2x128xf32>
    %537 = math.exp %536 : vector<2x128xf32>
    %cst_222 = arith.constant 1.000000e+00 : f32
    %538 = vector.broadcast %cst_222 : f32 to vector<2x128xf32>
    %539 = arith.addf %538, %537 : vector<2x128xf32>
    %540 = arith.divf %538, %539 : vector<2x128xf32>
    %541 = vector.extract_strided_slice %540 {offsets = [0, 0], sizes = [2, 32], strides = [1, 1]} : vector<2x128xf32> to vector<2x32xf32>
    %542 = vector.extract_strided_slice %540 {offsets = [0, 32], sizes = [2, 32], strides = [1, 1]} : vector<2x128xf32> to vector<2x32xf32>
    %543 = vector.extract_strided_slice %540 {offsets = [0, 64], sizes = [2, 32], strides = [1, 1]} : vector<2x128xf32> to vector<2x32xf32>
    %cst_223 = arith.constant 2.000000e+00 : f32
    %544 = vector.broadcast %cst_223 : f32 to vector<2x32xf32>
    %545 = arith.mulf %544, %543 : vector<2x32xf32>
    %cst_224 = arith.constant 1.000000e+00 : f32
    %546 = vector.broadcast %cst_224 : f32 to vector<2x32xf32>
    %547 = arith.subf %545, %546 : vector<2x32xf32>
    %548 = vector.extract_strided_slice %540 {offsets = [0, 96], sizes = [2, 32], strides = [1, 1]} : vector<2x128xf32> to vector<2x32xf32>
    %549 = arith.mulf %542, %527 : vector<2x32xf32>
    %550 = arith.mulf %541, %547 : vector<2x32xf32>
    %551 = arith.addf %549, %550 : vector<2x32xf32>
    %552 = math.tanh %551 : vector<2x32xf32>
    %553 = arith.mulf %548, %552 : vector<2x32xf32>
    %c192 = arith.constant 192 : index
    %c0_225 = arith.constant 0 : index
    %554 = vector.load %arg13[%c192, %c0_225] : memref<256x120xf32, #tpu.memory_space<vmem>>, vector<32x120xf32>
    %cst_226 = arith.constant dense<0.000000e+00> : vector<2x120xf32>
    %555 = tpu.matmul %553, %554, %cst_226 {dimension_numbers = #tpu.dot_dimension_numbers<[1], [0], [0], [1], [0, 0, 1, 1], [], []>} : vector<2x32xf32>, vector<32x120xf32>, vector<2x120xf32> -> vector<2x120xf32>
    %556 = arith.addf %532, %555 : vector<2x120xf32>
    %c14_227 = arith.constant 14 : index
    %c0_228 = arith.constant 0 : index
    %557 = vector.load %arg20[%c14_227, %c0_228] : memref<16x128xf32, #tpu.memory_space<vmem>>, vector<2x128xf32>
    %cst_229 = arith.constant dense<0.000000e+00> : vector<2x128xf32>
    %558 = tpu.matmul %553, %388, %cst_229 {dimension_numbers = #tpu.dot_dimension_numbers<[1], [0], [0], [1], [0, 0, 1, 1], [], []>} : vector<2x32xf32>, vector<32x128xf32>, vector<2x128xf32> -> vector<2x128xf32>
    %559 = arith.addf %557, %558 : vector<2x128xf32>
    %560 = arith.negf %559 : vector<2x128xf32>
    %561 = math.exp %560 : vector<2x128xf32>
    %cst_230 = arith.constant 1.000000e+00 : f32
    %562 = vector.broadcast %cst_230 : f32 to vector<2x128xf32>
    %563 = arith.addf %562, %561 : vector<2x128xf32>
    %564 = arith.divf %562, %563 : vector<2x128xf32>
    %565 = vector.extract_strided_slice %564 {offsets = [0, 0], sizes = [2, 32], strides = [1, 1]} : vector<2x128xf32> to vector<2x32xf32>
    %566 = vector.extract_strided_slice %564 {offsets = [0, 32], sizes = [2, 32], strides = [1, 1]} : vector<2x128xf32> to vector<2x32xf32>
    %567 = vector.extract_strided_slice %564 {offsets = [0, 64], sizes = [2, 32], strides = [1, 1]} : vector<2x128xf32> to vector<2x32xf32>
    %cst_231 = arith.constant 2.000000e+00 : f32
    %568 = vector.broadcast %cst_231 : f32 to vector<2x32xf32>
    %569 = arith.mulf %568, %567 : vector<2x32xf32>
    %cst_232 = arith.constant 1.000000e+00 : f32
    %570 = vector.broadcast %cst_232 : f32 to vector<2x32xf32>
    %571 = arith.subf %569, %570 : vector<2x32xf32>
    %572 = vector.extract_strided_slice %564 {offsets = [0, 96], sizes = [2, 32], strides = [1, 1]} : vector<2x128xf32> to vector<2x32xf32>
    %573 = arith.mulf %566, %551 : vector<2x32xf32>
    %574 = arith.mulf %565, %571 : vector<2x32xf32>
    %575 = arith.addf %573, %574 : vector<2x32xf32>
    %576 = math.tanh %575 : vector<2x32xf32>
    %577 = arith.mulf %572, %576 : vector<2x32xf32>
    %c224 = arith.constant 224 : index
    %c0_233 = arith.constant 0 : index
    %578 = vector.load %arg13[%c224, %c0_233] : memref<256x120xf32, #tpu.memory_space<vmem>>, vector<32x120xf32>
    %cst_234 = arith.constant dense<0.000000e+00> : vector<2x120xf32>
    %579 = tpu.matmul %577, %578, %cst_234 {dimension_numbers = #tpu.dot_dimension_numbers<[1], [0], [0], [1], [0, 0, 1, 1], [], []>} : vector<2x32xf32>, vector<32x120xf32>, vector<2x120xf32> -> vector<2x120xf32>
    %580 = arith.addf %556, %579 : vector<2x120xf32>
    %c0_235 = arith.constant 0 : index
    %c0_236 = arith.constant 0 : index
    %581 = vector.load %arg14[%c0_235, %c0_236] : memref<1x120xf32, #tpu.memory_space<vmem>>, vector<1x120xf32>
    %582 = vector.broadcast %581 : vector<1x120xf32> to vector<2x120xf32>
    %583 = arith.addf %580, %582 : vector<2x120xf32>
    %c0_237 = arith.constant 0 : index
    %c0_238 = arith.constant 0 : index
    %584 = vector.load %arg15[%c0_237, %c0_238] : memref<120x64xf32, #tpu.memory_space<vmem>>, vector<120x64xf32>
    %cst_239 = arith.constant dense<0.000000e+00> : vector<2x64xf32>
    %585 = tpu.matmul %583, %584, %cst_239 {dimension_numbers = #tpu.dot_dimension_numbers<[1], [0], [0], [1], [0, 0, 1, 1], [], []>} : vector<2x120xf32>, vector<120x64xf32>, vector<2x64xf32> -> vector<2x64xf32>
    %c0_240 = arith.constant 0 : index
    %c0_241 = arith.constant 0 : index
    %586 = vector.load %arg16[%c0_240, %c0_241] : memref<1x64xf32, #tpu.memory_space<vmem>>, vector<1x64xf32>
    %587 = vector.broadcast %586 : vector<1x64xf32> to vector<2x64xf32>
    %588 = arith.addf %585, %587 : vector<2x64xf32>
    %c0_242 = arith.constant 0 : index
    %c0_243 = arith.constant 0 : index
    %589 = vector.load %arg17[%c0_242, %c0_243] : memref<64x2xf32, #tpu.memory_space<vmem>>, vector<64x2xf32>
    %cst_244 = arith.constant dense<0.000000e+00> : vector<2x2xf32>
    %590 = tpu.matmul %588, %589, %cst_244 {dimension_numbers = #tpu.dot_dimension_numbers<[1], [0], [0], [1], [0, 0, 1, 1], [], []>} : vector<2x64xf32>, vector<64x2xf32>, vector<2x2xf32> -> vector<2x2xf32>
    %c0_245 = arith.constant 0 : index
    %c0_246 = arith.constant 0 : index
    %591 = vector.load %arg18[%c0_245, %c0_246] : memref<1x2xf32, #tpu.memory_space<vmem>>, vector<1x2xf32>
    %592 = vector.broadcast %591 : vector<1x2xf32> to vector<2x2xf32>
    %593 = arith.addf %590, %592 : vector<2x2xf32>
    %c0_247 = arith.constant 0 : index
    %c0_248 = arith.constant 0 : index
    %594 = vector.load %arg19[%c0_247, %c0_248] : memref<2x2xf32, #tpu.memory_space<vmem>>, vector<2x2xf32>
    tpu.vector_store %arg19[%c0_247, %c0_248], %593 {strides = array<i32>} : memref<2x2xf32, #tpu.memory_space<vmem>>, vector<2x2xf32>,
    return
  }
  func.func @transform_0(%arg0: i32) -> (i32, i32) {
    %c0_i32 = arith.constant 0 : i32
    %c0_i32_0 = arith.constant 0 : i32
    %c0_i32_1 = arith.constant 0 : i32
    return %c0_i32, %c0_i32_0 : i32, i32
  }
  func.func @transform_1(%arg0: i32) -> (i32, i32) {
    %c0_i32 = arith.constant 0 : i32
    %c0_i32_0 = arith.constant 0 : i32
    %c0_i32_1 = arith.constant 0 : i32
    return %c0_i32, %c0_i32_0 : i32, i32
  }
  func.func @transform_2(%arg0: i32) -> (i32, i32) {
    %c0_i32 = arith.constant 0 : i32
    %c0_i32_0 = arith.constant 0 : i32
    %c0_i32_1 = arith.constant 0 : i32
    return %c0_i32, %c0_i32_0 : i32, i32
  }
  func.func @transform_3(%arg0: i32) -> (i32, i32) {
    %c0_i32 = arith.constant 0 : i32
    %c0_i32_0 = arith.constant 0 : i32
    %c0_i32_1 = arith.constant 0 : i32
    return %c0_i32, %c0_i32_0 : i32, i32
  }
  func.func @transform_4(%arg0: i32) -> (i32, i32) {
    %c0_i32 = arith.constant 0 : i32
    %c0_i32_0 = arith.constant 0 : i32
    %c0_i32_1 = arith.constant 0 : i32
    return %c0_i32, %c0_i32_0 : i32, i32
  }
  func.func @transform_5(%arg0: i32) -> (i32, i32) {
    %c0_i32 = arith.constant 0 : i32
    %c0_i32_0 = arith.constant 0 : i32
    %c0_i32_1 = arith.constant 0 : i32
    return %c0_i32, %c0_i32_0 : i32, i32
  }
  func.func @transform_6(%arg0: i32) -> (i32, i32) {
    %c0_i32 = arith.constant 0 : i32
    %c0_i32_0 = arith.constant 0 : i32
    %c0_i32_1 = arith.constant 0 : i32
    return %c0_i32, %c0_i32_0 : i32, i32
  }
  func.func @transform_7(%arg0: i32) -> (i32, i32) {
    %c0_i32 = arith.constant 0 : i32
    %c0_i32_0 = arith.constant 0 : i32
    %c0_i32_1 = arith.constant 0 : i32
    return %c0_i32, %c0_i32_0 : i32, i32
  }
  func.func @transform_8(%arg0: i32) -> (i32, i32) {
    %c0_i32 = arith.constant 0 : i32
    %c0_i32_0 = arith.constant 0 : i32
    %c0_i32_1 = arith.constant 0 : i32
    return %c0_i32, %c0_i32_0 : i32, i32
  }
  func.func @transform_9(%arg0: i32) -> (i32, i32) {
    %c0_i32 = arith.constant 0 : i32
    %c0_i32_0 = arith.constant 0 : i32
    %c0_i32_1 = arith.constant 0 : i32
    return %c0_i32, %c0_i32_0 : i32, i32
  }
  func.func @transform_10(%arg0: i32) -> (i32, i32, i32) {
    %c0_i32 = arith.constant 0 : i32
    %c0_i32_0 = arith.constant 0 : i32
    %c0_i32_1 = arith.constant 0 : i32
    %c0_i32_2 = arith.constant 0 : i32
    return %c0_i32, %c0_i32_0, %c0_i32_1 : i32, i32, i32
  }
  func.func @transform_11(%arg0: i32) -> (i32, i32, i32) {
    %c0_i32 = arith.constant 0 : i32
    %c0_i32_0 = arith.constant 0 : i32
    %c0_i32_1 = arith.constant 0 : i32
    %c0_i32_2 = arith.constant 0 : i32
    return %c0_i32, %c0_i32_0, %c0_i32_1 : i32, i32, i32
  }
  func.func @transform_12(%arg0: i32) -> (i32, i32) {
    %c0_i32 = arith.constant 0 : i32
    %c0_i32_0 = arith.constant 0 : i32
    %c0_i32_1 = arith.constant 0 : i32
    return %c0_i32, %c0_i32_0 : i32, i32
  }
  func.func @transform_13(%arg0: i32) -> (i32, i32) {
    %c0_i32 = arith.constant 0 : i32
    %c0_i32_0 = arith.constant 0 : i32
    %c0_i32_1 = arith.constant 0 : i32
    return %c0_i32, %c0_i32_0 : i32, i32
  }
  func.func @transform_14(%arg0: i32) -> (i32, i32) {
    %c0_i32 = arith.constant 0 : i32
    %c0_i32_0 = arith.constant 0 : i32
    %c0_i32_1 = arith.constant 0 : i32
    return %c0_i32, %c0_i32_0 : i32, i32
  }
  func.func @transform_15(%arg0: i32) -> (i32, i32) {
    %c0_i32 = arith.constant 0 : i32
    %c0_i32_0 = arith.constant 0 : i32
    %c0_i32_1 = arith.constant 0 : i32
    return %c0_i32, %c0_i32_0 : i32, i32
  }
  func.func @transform_16(%arg0: i32) -> (i32, i32) {
    %c0_i32 = arith.constant 0 : i32
    %c0_i32_0 = arith.constant 0 : i32
    %c0_i32_1 = arith.constant 0 : i32
    return %c0_i32, %c0_i32_0 : i32, i32
  }
  func.func @transform_17(%arg0: i32) -> (i32, i32) {
    %c0_i32 = arith.constant 0 : i32
    %c0_i32_0 = arith.constant 0 : i32
    %c0_i32_1 = arith.constant 0 : i32
    return %c0_i32, %c0_i32_0 : i32, i32
  }
  func.func @transform_18(%arg0: i32) -> (i32, i32) {
    %c0_i32 = arith.constant 0 : i32
    %c0_i32_0 = arith.constant 0 : i32
    %c0_i32_1 = arith.constant 0 : i32
    return %c0_i32, %c0_i32_0 : i32, i32
  }
}

</mosaic_0001>

<bundles_post_ra>
// kernel: exvivo_lstm_forward.1
= control target key start
LH: loop header
LB: loop body
LE: loop exit
PB: predicated region body
PF: predicated region fallthrough
CT: control target
= control target key end

     0   :  { %s3056_s0 = inlined_call_operand.vmem [shape: f32[16,64], index: 0, kind: input, shape index: {}]   ;;  %s3057_s1 = inlined_call_operand.vmem [shape: f32[64,128], index: 1, kind: input, shape index: {}]   ;;  %s3058_s2 = inlined_call_operand.vmem [shape: f32[32,128], index: 2, kind: input, shape index: {}]   ;;  %s3059_s3 = inlined_call_operand.vmem [shape: f32[32,128], index: 3, kind: input, shape index: {}]   ;;  %s3060_s4 = inlined_call_operand.vmem [shape: f32[32,128], index: 4, kind: input, shape index: {}]   ;;  %s3061_s5 = inlined_call_operand.vmem [shape: f32[32,128], index: 5, kind: input, shape index: {}]   ;;  %s3062_s6 = inlined_call_operand.vmem [shape: f32[32,128], index: 6, kind: input, shape index: {}]   ;;  %s3063_s7 = inlined_call_operand.vmem [shape: f32[1,128], index: 7, kind: input, shape index: {}]   ;;  %s3064_s8 = inlined_call_operand.vmem [shape: f32[1,128], index: 8, kind: input, shape index: {}]   ;;  %s3065_s9 = inlined_call_operand.vmem [shape: f32[1,128], index: 9, kind: input, shape index: {}]   ;;  %s3066_s10 = inlined_call_operand.vmem [shape: f32[3,2,32], index: 10, kind: input, shape index: {}]   ;;  %s3067_s11 = inlined_call_operand.vmem [shape: f32[3,2,32], index: 11, kind: input, shape index: {}]   ;;  %s3068_s12 = inlined_call_operand.vmem [shape: f32[256,120], index: 12, kind: input, shape index: {}]   ;;  %s3069_s13 = inlined_call_operand.vmem [shape: f32[1,120], index: 13, kind: input, shape index: {}]   ;;  %s3070_s14 = inlined_call_operand.vmem [shape: f32[120,64], index: 14, kind: input, shape index: {}]   ;;  %s3071_s15 = inlined_call_operand.vmem [shape: f32[1,64], index: 15, kind: input, shape index: {}]   ;;  %s3072_s16 = inlined_call_operand.vmem [shape: f32[64,2], index: 16, kind: input, shape index: {}]   ;;  %s3073_s17 = inlined_call_operand.vmem [shape: f32[1,2], index: 17, kind: input, shape index: {}]   ;;  %s3074_s18 = inlined_call_operand.hbm [shape: f32[2,2], index: 18, kind: output, shape index: {}]  }
   0x1   :  { %3078 = sst [smem:[#allocation7_spill]] %s3056_s0 }
   0x2   :  { %3079 = sst [smem:[#allocation8_spill]] %s3057_s1 }
   0x3   :  { %3080 = sst [smem:[#allocation9_spill]] %s3058_s2 }
   0x4   :  { %s3081_s29 = sld [smem:[#allocation8_spill]]  ;;  %v2501_v3 = vld [vmem:[%s3060_s4 + $0x18] sm:$0xff]  ;;  %v2506_v4 = vld [vmem:[%s3060_s4 + $0x10] sm:$0xff]  ;;  %v2519_v7 = vld [vmem:[%s3060_s4 + $0x8] sm:$0xff] }
   0x5   :  { %129 = vmatpush.msra.mxu1 %v2501_v3  ;;  %201 = vmatpush.msra.mxu2 %v2501_v3  ;;  %v2527_v8 = vld [vmem:[%s3060_s4] sm:$0xff] }
   0x6   :  { %469 = vmatpush.msra.mxu3 %v2501_v3 }
   0x7   :  { %130 = vmatpush.msra.mxu1 %v2506_v4  ;;  %202 = vmatpush.msra.mxu2 %v2506_v4 }
   0x8   :  { %470 = vmatpush.msra.mxu3 %v2506_v4 }
   0xa   :  { %v69_v0 = vld [vmem:[%s3081_s29 + $0x38] sm:$0xff]  ;;  %v68_v1 = vld [vmem:[%s3081_s29 + $0x30] sm:$0xff]  ;;  %v67_v2 = vld [vmem:[%s3081_s29 + $0x28] sm:$0xff] }
   0xb   :  { %89 = vmatpush.msra.mxu0 %v69_v0  ;;  %v66_v5 = vld [vmem:[%s3081_s29 + $0x20] sm:$0xff]  ;;  %v65_v6 = vld [vmem:[%s3081_s29 + $0x18] sm:$0xff] }
   0xd   :  { %90 = vmatpush.msra.mxu0 %v68_v1 }
   0xf   :  { %91 = vmatpush.msra.mxu0 %v67_v2 }
  0x11   :  { %92 = vmatpush.msra.mxu0 %v66_v5 }
  0x12   :  { %23 = vsyncpa [#allocation5], 0  ;;  %v64_v9 = vld [vmem:[%s3081_s29 + $0x10] sm:$0xff]  ;;  %131 = vmatpush.msra.mxu1 %v2519_v7  ;;  %v106_v10 = vld [vmem:[%s3066_s10] sm:$0x3]  ;;  %vm113_vm0 = vcmask 261120   ;;  %203 = vmatpush.msra.mxu2 %v2519_v7 }
  0x13   :  { %93 = vmatpush.msra.mxu0 %v65_v6  ;;  %471 = vmatpush.msra.mxu3 %v2519_v7  ;;  %v63_v11 = vld [vmem:[%s3081_s29 + $0x8] sm:$0xff]  ;;  %v62_v12 = vld [vmem:[%s3081_s29] sm:$0xff]  ;;  %s3082_s26 = sld [smem:[#allocation7_spill]]  ;;  %vm74_vm1 = vcmask 523264   ;;  %s2392_s0 = smov 32   ;;  %vm184_vm6 = vcmask 254976  }
  0x14   :  { %132 = vmatpush.msra.mxu1 %v2527_v8  ;;  %204 = vmatpush.msra.mxu2 %v2527_v8  ;;  %v2568_v14 = vld [vmem:[%s3063_s7] ss:$0 sm:$0xff]  ;;  %s2391_s7 = smov 64   ;;  %s3083_s4 = sld [smem:[#allocation9_spill]] }
  0x15   :  { %94 = vmatpush.msra.mxu0 %v64_v9  ;;  %2122 = vmatmul.msk.f32.vlgmr.msra.gmra.mxu1 %vm113_vm0, %v106_v10  ;;  %v107_v35 = vld [vmem:[%s3067_s11] sm:$0x3]  ;;  %s2111_s25 = sshll.u32 %s3074_s18, 4  ;;  %s2112_s25 = int_to_ptr.hbm [resolvable:$true] %s2111_s25 }
  0x16   :  { %268 = vmatpush.msrb.mxu1 %v2501_v3  ;;  %402 = vmatpush.msrb.mxu2 %v2501_v3 }
  0x17   :  { %95 = vmatpush.msra.mxu0 %v63_v11  ;;  %472 = vmatpush.msra.mxu3 %v2527_v8 }
  0x18   :  { %269 = vmatpush.msrb.mxu1 %v2506_v4  ;;  %403 = vmatpush.msrb.mxu2 %v2506_v4 }
  0x19   :  { %v60_v13 = vld [vmem:[%s3082_s26] sm:$0xff]  ;;  %96 = vmatpush.msra.mxu0 %v62_v12 }
  0x1a   :  { %2120 = vmatmul.msk.f32.vlgmr.msra.gmra.mxu0 %vm74_vm1, %v60_v13  ;;  %270 = vmatpush.msrb.mxu1 %v2519_v7 }
  0x1b   :  { %404 = vmatpush.msrb.mxu2 %v2519_v7 }
  0x1c   :  { %271 = vmatpush.msrb.mxu1 %v2527_v8 }
  0x1d   :  { %405 = vmatpush.msrb.mxu2 %v2527_v8 }
  0x1e   :  { %335 = vmatpush.msra.mxu1 %v2501_v3 }
  0x20   :  { %336 = vmatpush.msra.mxu1 %v2506_v4 }
  0x22   :  { %337 = vmatpush.msra.mxu1 %v2519_v7 }
  0x24   :  { %338 = vmatpush.msra.mxu1 %v2527_v8 }
  0x92   :  { %v134_v17 = vpop.f32.mrf.mxu1 }
  0x97   :  { %v98_v15 = vpop.f32.mrf.mxu0 }
  0x98   :  { %v99_v16 = vadd.f32 %v2568_v14, %v98_v15 }
  0x9a   :  { %104 = vst [vmem:[#allocation2] sm:$0xff] %v99_v16 }
  0xa1   :  { %v112_v18 = vld [vmem:[#allocation2] sm:$0x3]  ;;  %v186_v46 = vld [vmem:[#allocation2 + $0x2] sm:$0x3]  ;;  %v253_v13 = vld [vmem:[#allocation2 + $0x4] sm:$0x3] }
  0xa2   :  { %v137_v19 = vadd.f32 %v134_v17, %v112_v18 }
  0xa4   :  { %v2123_v20 = vmul.f32 -1.442695, %v137_v19 }
  0xa6   :  { %2221 = vpow2.f32 %v2123_v20 }
  0xac   :  { %v2222_v21 = vpop.eup %2221 }
  0xad   :  { %v141_v22 = vadd.f32 1.0, %v2222_v21 }
  0xaf   :  { %2223 = vrcp.f32 %v141_v22  ;;  %v153_v26 = vand.u32 2147483648, %v141_v22  ;;  %v151_v28 = vand.u32 2147483647, %v141_v22  ;;  %vm147_vm3 = vweird.f32 %v141_v22 }
  0xb1   :  { %v154_v30 = vor.u32 1.1754944e-38, %v153_v26  ;;  %vm152_vm5 = vcmp.eq.f32.partialorder %v151_v28, 8.507059e+37 }
  0xb5   :  { %v2224_v23 = vpop.eup %2223 }
  0xb6   :  { %v143_v24 = vmul.f32 %v2224_v23, %v141_v22  ;;  %vm148_vm2 = vweird.f32 %v2224_v23 }
  0xb7   :  { %vm149_vm4 = vmor %vm147_vm3, %vm148_vm2 }
  0xb8   :  { %v144_v25 = vsub.f32 1.0, %v143_v24 }
  0xba   :  { %v145_v27 = vmul.f32 %v2224_v23, %v144_v25 }
  0xbc   :  { %v146_v29 = vadd.f32 %v2224_v23, %v145_v27 }
  0xbe   :  { %v150_v31 = vsel %vm149_vm4, %v2224_v23, %v146_v29 }
  0xbf   :  { %v155_v32 = vsel %vm152_vm5, %v154_v30, %v150_v31 }
  0xc0   :  { %v157_v33 = vmul.f32 2.0, %v155_v32 }
  0xc2   :  { %v2124_v34 = vadd.f32 -1.0, %v157_v33 }
  0xc4   :  { %165 = vrot.lane.b32.xlu0 %v2124_v34, %s2391_s7 }
  0xcc   :  { %160 = vrot.lane.b32.xlu0 %v107_v35, %s2392_s0 }
 0x136   :  { %v166_v36 = vpop.permute.xlu0 %165 }
 0x137   :  { %v168_v37 = vmul.f32 %v166_v36, %v155_v32 }
 0x139   :  { %170 = vrot.lane.b32.xlu1 %v168_v37, %s2392_s0  ;;  %v320_v37 = vld [vmem:[#allocation2 + $0x6] sm:$0x3] }
 0x13e   :  { %v161_v38 = vpop.permute.xlu0 %160 }
 0x13f   :  { %v163_v39 = vmul.f32 %v161_v38, %v155_v32 }
 0x1ab   :  { %v171_v40 = vpop.permute.xlu1 %170 }
 0x1ac   :  { %v173_v41 = vadd.f32 %v171_v40, %v163_v39 }
 0x1ae   :  { %2225 = vtanh.f32 %v173_v41 }
 0x1b4   :  { %v2226_v42 = vpop.eup %2225 }
 0x1b5   :  { %176 = vrot.lane.b32.xlu1 %v2226_v42, %s2391_s7 }
 0x227   :  { %v177_v43 = vpop.permute.xlu1 %176 }
 0x228   :  { %v179_v44 = vmul.f32 %v177_v43, %v155_v32 }
 0x22a   :  { %181 = vrot.lane.b32.xlu2 %v179_v44, %s2392_s0 }
 0x284   :  { %v182_v45 = vpop.permute.xlu2 %181 }
 0x285   :  { %185 = vst.msk [vmem:[#allocation3] sm:$0x3] %vm184_vm6, %v182_v45  ;;  %2125 = vmatmul.msk.f32.vlgmr.msra.gmra.mxu2 %vm113_vm0, %v182_v45 }
 0x286   :  { %603 = vmatpush.msra.mxu2 %v2501_v3 }
 0x288   :  { %604 = vmatpush.msra.mxu2 %v2506_v4 }
 0x28a   :  { %605 = vmatpush.msra.mxu2 %v2519_v7 }
 0x28c   :  { %606 = vmatpush.msra.mxu2 %v2527_v8 }
 0x308   :  { %v206_v47 = vpop.f32.mrf.mxu2 }
 0x309   :  { %v209_v48 = vadd.f32 %v206_v47, %v186_v46 }
 0x30b   :  { %v2126_v49 = vmul.f32 -1.442695, %v209_v48 }
 0x30d   :  { %2227 = vpow2.f32 %v2126_v49 }
 0x313   :  { %v2228_v50 = vpop.eup %2227 }
 0x314   :  { %v213_v51 = vadd.f32 1.0, %v2228_v50 }
 0x316   :  { %2229 = vrcp.f32 %v213_v51  ;;  %v225_v55 = vand.u32 2147483648, %v213_v51  ;;  %v223_v57 = vand.u32 2147483647, %v213_v51  ;;  %vm219_vm8 = vweird.f32 %v213_v51 }
 0x318   :  { %v226_v59 = vor.u32 1.1754944e-38, %v225_v55  ;;  %vm224_vm10 = vcmp.eq.f32.partialorder %v223_v57, 8.507059e+37 }
 0x31c   :  { %v2230_v52 = vpop.eup %2229 }
 0x31d   :  { %v215_v53 = vmul.f32 %v2230_v52, %v213_v51  ;;  %vm220_vm7 = vweird.f32 %v2230_v52 }
 0x31e   :  { %vm221_vm9 = vmor %vm219_vm8, %vm220_vm7 }
 0x31f   :  { %v216_v54 = vsub.f32 1.0, %v215_v53 }
 0x321   :  { %v217_v56 = vmul.f32 %v2230_v52, %v216_v54 }
 0x323   :  { %v218_v58 = vadd.f32 %v2230_v52, %v217_v56 }
 0x325   :  { %v222_v60 = vsel %vm221_vm9, %v2230_v52, %v218_v58 }
 0x326   :  { %v227_v61 = vsel %vm224_vm10, %v226_v59, %v222_v60 }
 0x327   :  { %v229_v62 = vmul.f32 2.0, %v227_v61  ;;  %v231_v2 = vmul.f32 %v227_v61, %v173_v41 }
 0x329   :  { %v2127_v63 = vadd.f32 -1.0, %v229_v62 }
 0x32b   :  { %233 = vrot.lane.b32.xlu2 %v2127_v63, %s2391_s7 }
 0x385   :  { %v234_v0 = vpop.permute.xlu2 %233 }
 0x386   :  { %v236_v1 = vmul.f32 %v234_v0, %v227_v61 }
 0x388   :  { %238 = vrot.lane.b32.xlu0 %v236_v1, %s2392_s0 }
 0x3fa   :  { %v239_v5 = vpop.permute.xlu0 %238 }
 0x3fb   :  { %v241_v6 = vadd.f32 %v239_v5, %v231_v2 }
 0x3fd   :  { %2231 = vtanh.f32 %v241_v6 }
 0x403   :  { %v2232_v9 = vpop.eup %2231 }
 0x404   :  { %244 = vrot.lane.b32.xlu1 %v2232_v9, %s2391_s7 }
 0x476   :  { %v245_v10 = vpop.permute.xlu1 %244 }
 0x477   :  { %v247_v11 = vmul.f32 %v245_v10, %v227_v61  ;;  %v61_v61 = vld [vmem:[%s3082_s26 + $0x8] sm:$0xff] }
 0x478   :  { %2121 = vmatmul.msk.f32.gmra.mxu0 %vm74_vm1, %v61_v61 }
 0x479   :  { %249 = vrot.lane.b32.xlu2 %v247_v11, %s2392_s0 }
 0x4d3   :  { %v250_v12 = vpop.permute.xlu2 %249 }
 0x4d4   :  { %252 = vst.msk [vmem:[#allocation3 + $0x2] sm:$0x3] %vm184_vm6, %v250_v12  ;;  %2128 = vmatmul.msk.f32.vlgmr.msrb.gmra.mxu1 %vm113_vm0, %v250_v12 }
 0x4d5   :  { %536 = vmatpush.msrb.mxu1 %v2501_v3 }
 0x4d7   :  { %537 = vmatpush.msrb.mxu1 %v2506_v4 }
 0x4d9   :  { %538 = vmatpush.msrb.mxu1 %v2519_v7 }
 0x4db   :  { %539 = vmatpush.msrb.mxu1 %v2527_v8 }
 0x4f5   :  { %v101_v0 = vpop.f32.mrf.mxu0 }
 0x4f6   :  { %v102_v1 = vadd.f32 %v2568_v14, %v101_v0 }
 0x4f8   :  { %105 = vst [vmem:[#allocation2 + $0x8] sm:$0xff] %v102_v1 }
 0x4ff   :  { %v387_v5 = vld [vmem:[#allocation2 + $0x8] sm:$0x3]  ;;  %v521_v1 = vld [vmem:[#allocation2 + $0xc] sm:$0x3] }
 0x551   :  { %v273_v15 = vpop.f32.mrf.mxu1 }
 0x552   :  { %v276_v16 = vadd.f32 %v273_v15, %v253_v13 }
 0x554   :  { %v2129_v17 = vmul.f32 -1.442695, %v276_v16 }
 0x556   :  { %2233 = vpow2.f32 %v2129_v17 }
 0x55c   :  { %v2234_v18 = vpop.eup %2233 }
 0x55d   :  { %v280_v19 = vadd.f32 1.0, %v2234_v18 }
 0x55f   :  { %2235 = vrcp.f32 %v280_v19  ;;  %v292_v23 = vand.u32 2147483648, %v280_v19  ;;  %v290_v3 = vand.u32 2147483647, %v280_v19  ;;  %vm286_vm12 = vweird.f32 %v280_v19 }
 0x561   :  { %v293_v7 = vor.u32 1.1754944e-38, %v292_v23  ;;  %vm291_vm14 = vcmp.eq.f32.partialorder %v290_v3, 8.507059e+37 }
 0x565   :  { %v2236_v20 = vpop.eup %2235 }
 0x566   :  { %v282_v21 = vmul.f32 %v2236_v20, %v280_v19  ;;  %vm287_vm11 = vweird.f32 %v2236_v20 }
 0x567   :  { %vm288_vm13 = vmor %vm286_vm12, %vm287_vm11 }
 0x568   :  { %v283_v22 = vsub.f32 1.0, %v282_v21 }
 0x56a   :  { %v284_v24 = vmul.f32 %v2236_v20, %v283_v22 }
 0x56c   :  { %v285_v4 = vadd.f32 %v2236_v20, %v284_v24 }
 0x56e   :  { %v289_v8 = vsel %vm288_vm13, %v2236_v20, %v285_v4 }
 0x56f   :  { %v294_v25 = vsel %vm291_vm14, %v293_v7, %v289_v8 }
 0x570   :  { %v296_v26 = vmul.f32 2.0, %v294_v25  ;;  %v298_v30 = vmul.f32 %v294_v25, %v241_v6 }
 0x572   :  { %v2130_v27 = vadd.f32 -1.0, %v296_v26 }
 0x574   :  { %300 = vrot.lane.b32.xlu0 %v2130_v27, %s2391_s7 }
 0x5e6   :  { %v301_v28 = vpop.permute.xlu0 %300 }
 0x5e7   :  { %v303_v29 = vmul.f32 %v301_v28, %v294_v25 }
 0x5e9   :  { %305 = vrot.lane.b32.xlu1 %v303_v29, %s2392_s0  ;;  %v660_v29 = vld [vmem:[%s3083_s4 + $0x18] sm:$0xff] }
 0x5ea   :  { %683 = vmatpush.msrb.mxu3 %v660_v29  ;;  %v701_v29 = vld [vmem:[%s3061_s5 + $0x8] sm:$0xff] }
 0x65b   :  { %v306_v31 = vpop.permute.xlu1 %305 }
 0x65c   :  { %v308_v32 = vadd.f32 %v306_v31, %v298_v30  ;;  %v659_v30 = vld [vmem:[%s3083_s4 + $0x10] sm:$0xff]  ;;  %v658_v31 = vld [vmem:[%s3083_s4 + $0x8] sm:$0xff] }
 0x65d   :  { %684 = vmatpush.msrb.mxu3 %v659_v30  ;;  %v700_v30 = vld [vmem:[%s3061_s5] sm:$0xff] }
 0x65e   :  { %2237 = vtanh.f32 %v308_v32 }
 0x65f   :  { %685 = vmatpush.msrb.mxu3 %v658_v31  ;;  %v2149_v31 = vld [vmem:[%s3067_s11 + $0x2] sm:$0x3] }
 0x664   :  { %v2238_v33 = vpop.eup %2237 }
 0x665   :  { %311 = vrot.lane.b32.xlu2 %v2238_v33, %s2391_s7 }
 0x6bf   :  { %v312_v34 = vpop.permute.xlu2 %311 }
 0x6c0   :  { %v314_v35 = vmul.f32 %v312_v34, %v294_v25 }
 0x6c2   :  { %316 = vrot.lane.b32.xlu0 %v314_v35, %s2392_s0  ;;  %v454_v35 = vld [vmem:[#allocation2 + $0xa] sm:$0x3] }
 0x734   :  { %v317_v36 = vpop.permute.xlu0 %316 }
 0x735   :  { %319 = vst.msk [vmem:[#allocation3 + $0x4] sm:$0x3] %vm184_vm6, %v317_v36  ;;  %2131 = vmatmul.msk.f32.vlgmr.msra.gmra.mxu1 %vm113_vm0, %v317_v36 }
 0x7b2   :  { %v340_v38 = vpop.f32.mrf.mxu1 }
 0x7b3   :  { %v343_v39 = vadd.f32 %v340_v38, %v320_v37 }
 0x7b5   :  { %v2132_v40 = vmul.f32 -1.442695, %v343_v39  ;;  %v2634_v39 = vld [vmem:[%s3064_s8] ss:$0 sm:$0xff] }
 0x7b7   :  { %2239 = vpow2.f32 %v2132_v40 }
 0x7bd   :  { %v2240_v41 = vpop.eup %2239 }
 0x7be   :  { %v347_v42 = vadd.f32 1.0, %v2240_v41 }
 0x7c0   :  { %2241 = vrcp.f32 %v347_v42  ;;  %v359_v46 = vand.u32 2147483648, %v347_v42  ;;  %v357_v48 = vand.u32 2147483647, %v347_v42  ;;  %vm353_vm2 = vweird.f32 %v347_v42 }
 0x7c2   :  { %v360_v50 = vor.u32 1.1754944e-38, %v359_v46  ;;  %vm358_vm4 = vcmp.eq.f32.partialorder %v357_v48, 8.507059e+37 }
 0x7c6   :  { %v2242_v43 = vpop.eup %2241 }
 0x7c7   :  { %v349_v44 = vmul.f32 %v2242_v43, %v347_v42  ;;  %vm354_vm15 = vweird.f32 %v2242_v43 }
 0x7c8   :  { %vm355_vm3 = vmor %vm353_vm2, %vm354_vm15 }
 0x7c9   :  { %v350_v45 = vsub.f32 1.0, %v349_v44 }
 0x7cb   :  { %v351_v47 = vmul.f32 %v2242_v43, %v350_v45 }
 0x7cd   :  { %v352_v49 = vadd.f32 %v2242_v43, %v351_v47 }
 0x7cf   :  { %v356_v51 = vsel %vm355_vm3, %v2242_v43, %v352_v49 }
 0x7d0   :  { %v361_v52 = vsel %vm358_vm4, %v360_v50, %v356_v51 }
 0x7d1   :  { %v363_v53 = vmul.f32 2.0, %v361_v52  ;;  %v365_v57 = vmul.f32 %v361_v52, %v308_v32  ;;  %v657_v32 = vld [vmem:[%s3083_s4] sm:$0xff] }
 0x7d2   :  { %686 = vmatpush.msrb.mxu3 %v657_v32 }
 0x7d3   :  { %v2133_v54 = vadd.f32 -1.0, %v363_v53 }
 0x7d5   :  { %367 = vrot.lane.b32.xlu1 %v2133_v54, %s2391_s7 }
 0x847   :  { %v368_v55 = vpop.permute.xlu1 %367 }
 0x848   :  { %v370_v56 = vmul.f32 %v368_v55, %v361_v52 }
 0x84a   :  { %372 = vrot.lane.b32.xlu2 %v370_v56, %s2392_s0 }
 0x8a4   :  { %v373_v58 = vpop.permute.xlu2 %372 }
 0x8a5   :  { %v375_v59 = vadd.f32 %v373_v58, %v365_v57 }
 0x8a7   :  { %2243 = vtanh.f32 %v375_v59 }
 0x8ad   :  { %v2244_v60 = vpop.eup %2243 }
 0x8ae   :  { %378 = vrot.lane.b32.xlu0 %v2244_v60, %s2391_s7 }
 0x920   :  { %v379_v62 = vpop.permute.xlu0 %378 }
 0x921   :  { %v381_v63 = vmul.f32 %v379_v62, %v361_v52 }
 0x923   :  { %383 = vrot.lane.b32.xlu1 %v381_v63, %s2392_s0 }
 0x995   :  { %v384_v2 = vpop.permute.xlu1 %383 }
 0x996   :  { %386 = vst.msk [vmem:[#allocation3 + $0x6] sm:$0x3] %vm184_vm6, %v384_v2  ;;  %2134 = vmatmul.msk.f32.vlgmr.msrb.gmra.mxu2 %vm113_vm0, %v384_v2 }
 0x99d   :  { %v655_v34 = vld [vmem:[#allocation3] sm:$0xff] }
 0xa19   :  { %v407_v6 = vpop.f32.mrf.mxu2 }
 0xa1a   :  { %v410_v9 = vadd.f32 %v407_v6, %v387_v5 }
 0xa1c   :  { %v2135_v10 = vmul.f32 -1.442695, %v410_v9 }
 0xa1e   :  { %2245 = vpow2.f32 %v2135_v10 }
 0xa24   :  { %v2246_v11 = vpop.eup %2245 }
 0xa25   :  { %v414_v12 = vadd.f32 1.0, %v2246_v11 }
 0xa27   :  { %2247 = vrcp.f32 %v414_v12  ;;  %v426_v17 = vand.u32 2147483648, %v414_v12  ;;  %v424_v14 = vand.u32 2147483647, %v414_v12  ;;  %vm420_vm7 = vweird.f32 %v414_v12 }
 0xa29   :  { %v427_v20 = vor.u32 1.1754944e-38, %v426_v17  ;;  %vm425_vm9 = vcmp.eq.f32.partialorder %v424_v14, 8.507059e+37 }
 0xa2d   :  { %v2248_v13 = vpop.eup %2247 }
 0xa2e   :  { %v416_v15 = vmul.f32 %v2248_v13, %v414_v12  ;;  %vm421_vm5 = vweird.f32 %v2248_v13 }
 0xa2f   :  { %vm422_vm8 = vmor %vm420_vm7, %vm421_vm5 }
 0xa30   :  { %v417_v16 = vsub.f32 1.0, %v416_v15 }
 0xa32   :  { %v418_v18 = vmul.f32 %v2248_v13, %v417_v16 }
 0xa34   :  { %v419_v19 = vadd.f32 %v2248_v13, %v418_v18 }
 0xa36   :  { %v423_v21 = vsel %vm422_vm8, %v2248_v13, %v419_v19 }
 0xa37   :  { %v428_v22 = vsel %vm425_vm9, %v427_v20, %v423_v21 }
 0xa38   :  { %v430_v23 = vmul.f32 2.0, %v428_v22  ;;  %v432_v7 = vmul.f32 %v428_v22, %v375_v59 }
 0xa3a   :  { %v2136_v24 = vadd.f32 -1.0, %v430_v23 }
 0xa3c   :  { %434 = vrot.lane.b32.xlu2 %v2136_v24, %s2391_s7 }
 0xa96   :  { %v435_v3 = vpop.permute.xlu2 %434 }
 0xa97   :  { %v437_v4 = vmul.f32 %v435_v3, %v428_v22 }
 0xa99   :  { %439 = vrot.lane.b32.xlu0 %v437_v4, %s2392_s0 }
 0xb0b   :  { %v440_v8 = vpop.permute.xlu0 %439 }
 0xb0c   :  { %v442_v25 = vadd.f32 %v440_v8, %v432_v7 }
 0xb0e   :  { %2249 = vtanh.f32 %v442_v25 }
 0xb14   :  { %v2250_v26 = vpop.eup %2249 }
 0xb15   :  { %445 = vrot.lane.b32.xlu1 %v2250_v26, %s2391_s7 }
 0xb87   :  { %v446_v27 = vpop.permute.xlu1 %445 }
 0xb88   :  { %v448_v28 = vmul.f32 %v446_v27, %v428_v22  ;;  %v703_v27 = vld [vmem:[%s3061_s5 + $0x18] sm:$0xff] }
 0xb89   :  { %720 = vmatpush.msrb.mxu2 %v703_v27  ;;  %791 = vmatpush.msra.mxu1 %v703_v27 }
 0xb8a   :  { %450 = vrot.lane.b32.xlu2 %v448_v28, %s2392_s0  ;;  %v702_v28 = vld [vmem:[%s3061_s5 + $0x10] sm:$0xff]  ;;  %925 = vmatpush.msrb.mxu0 %v703_v27 }
 0xb8b   :  { %721 = vmatpush.msrb.mxu2 %v702_v28  ;;  %792 = vmatpush.msra.mxu1 %v702_v28 }
 0xb8c   :  { %926 = vmatpush.msrb.mxu0 %v702_v28 }
 0xb8d   :  { %722 = vmatpush.msrb.mxu2 %v701_v29  ;;  %793 = vmatpush.msra.mxu1 %v701_v29 }
 0xb8e   :  { %927 = vmatpush.msrb.mxu0 %v701_v29 }
 0xb8f   :  { %723 = vmatpush.msrb.mxu2 %v700_v30  ;;  %794 = vmatpush.msra.mxu1 %v700_v30 }
 0xb90   :  { %928 = vmatpush.msrb.mxu0 %v700_v30 }
 0xb92   :  { %1193 = vmatpush.msra.mxu0 %v703_v27 }
 0xb94   :  { %1194 = vmatpush.msra.mxu0 %v702_v28 }
 0xb96   :  { %1195 = vmatpush.msra.mxu0 %v701_v29 }
 0xb98   :  { %1196 = vmatpush.msra.mxu0 %v700_v30 }
 0xbe4   :  { %v451_v33 = vpop.permute.xlu2 %450 }
 0xbe5   :  { %453 = vst.msk [vmem:[#allocation3 + $0x8] sm:$0x3] %vm184_vm6, %v451_v33  ;;  %2137 = vmatmul.msk.f32.vlgmr.msra.gmra.mxu3 %vm113_vm0, %v451_v33  ;;  %v2148_v33 = vld [vmem:[%s3066_s10 + $0x2] sm:$0x3] }
 0xbe6   :  { %1126 = vmatpush.msra.mxu3 %v703_v27 }
 0xbe8   :  { %1127 = vmatpush.msra.mxu3 %v702_v28 }
 0xbea   :  { %1128 = vmatpush.msra.mxu3 %v701_v29 }
 0xbec   :  { %1129 = vmatpush.msra.mxu3 %v700_v30 }
 0xbed   :  { %2146 = vmatmul.msk.f32.vlgmr.msrb.gmra.mxu3 %vm113_vm0, %v655_v34 }
 0xc68   :  { %v474_v36 = vpop.f32.mrf.mxu3 }
 0xc69   :  { %v477_v37 = vadd.f32 %v474_v36, %v454_v35 }
 0xc6b   :  { %v2138_v38 = vmul.f32 -1.442695, %v477_v37 }
 0xc6d   :  { %2251 = vpow2.f32 %v2138_v38 }
 0xc70   :  { %v688_v40 = vpop.f32.mrf.mxu3 }
 0xc71   :  { %v689_v41 = vadd.f32 %v2634_v39, %v688_v40 }
 0xc73   :  { %v2252_v42 = vpop.eup %2251  ;;  %694 = vst [vmem:[#allocation2] sm:$0xff] %v689_v41 }
 0xc74   :  { %v481_v43 = vadd.f32 1.0, %v2252_v42 }
 0xc76   :  { %2253 = vrcp.f32 %v481_v43  ;;  %v493_v47 = vand.u32 2147483648, %v481_v43  ;;  %v491_v49 = vand.u32 2147483647, %v481_v43  ;;  %vm487_vm11 = vweird.f32 %v481_v43 }
 0xc78   :  { %v494_v51 = vor.u32 1.1754944e-38, %v493_v47  ;;  %vm492_vm13 = vcmp.eq.f32.partialorder %v491_v49, 8.507059e+37 }
 0xc7a   :  { %v704_v35 = vld [vmem:[#allocation2] sm:$0x3] }
 0xc7c   :  { %v2254_v44 = vpop.eup %2253 }
 0xc7d   :  { %v483_v45 = vmul.f32 %v2254_v44, %v481_v43  ;;  %vm488_vm10 = vweird.f32 %v2254_v44 }
 0xc7e   :  { %vm489_vm12 = vmor %vm487_vm11, %vm488_vm10 }
 0xc7f   :  { %v484_v46 = vsub.f32 1.0, %v483_v45 }
 0xc81   :  { %v485_v48 = vmul.f32 %v2254_v44, %v484_v46 }
 0xc83   :  { %v486_v50 = vadd.f32 %v2254_v44, %v485_v48 }
 0xc85   :  { %v490_v52 = vsel %vm489_vm12, %v2254_v44, %v486_v50 }
 0xc86   :  { %v495_v53 = vsel %vm492_vm13, %v494_v51, %v490_v52 }
 0xc87   :  { %v497_v54 = vmul.f32 2.0, %v495_v53  ;;  %v499_v58 = vmul.f32 %v495_v53, %v442_v25 }
 0xc89   :  { %v2139_v55 = vadd.f32 -1.0, %v497_v54 }
 0xc8b   :  { %501 = vrot.lane.b32.xlu0 %v2139_v55, %s2391_s7 }
 0xcfd   :  { %v502_v56 = vpop.permute.xlu0 %501 }
 0xcfe   :  { %v504_v57 = vmul.f32 %v502_v56, %v495_v53 }
 0xd00   :  { %506 = vrot.lane.b32.xlu1 %v504_v57, %s2392_s0 }
 0xd72   :  { %v507_v59 = vpop.permute.xlu1 %506 }
 0xd73   :  { %v509_v60 = vadd.f32 %v507_v59, %v499_v58 }
 0xd75   :  { %2255 = vtanh.f32 %v509_v60 }
 0xd7b   :  { %v2256_v61 = vpop.eup %2255 }
 0xd7c   :  { %512 = vrot.lane.b32.xlu2 %v2256_v61, %s2391_s7 }
 0xdd6   :  { %v513_v62 = vpop.permute.xlu2 %512 }
 0xdd7   :  { %v515_v63 = vmul.f32 %v513_v62, %v495_v53 }
 0xdd9   :  { %517 = vrot.lane.b32.xlu0 %v515_v63, %s2392_s0 }
 0xe4b   :  { %v518_v0 = vpop.permute.xlu0 %517 }
 0xe4c   :  { %520 = vst.msk [vmem:[#allocation3 + $0xa] sm:$0x3] %vm184_vm6, %v518_v0  ;;  %2140 = vmatmul.msk.f32.vlgmr.msrb.gmra.mxu1 %vm113_vm0, %v518_v0  ;;  %v776_v0 = vld [vmem:[#allocation2 + $0x2] sm:$0x3] }
 0xe4d   :  { %992 = vmatpush.msrb.mxu1 %v703_v27 }
 0xe4f   :  { %993 = vmatpush.msrb.mxu1 %v702_v28 }
 0xe51   :  { %994 = vmatpush.msrb.mxu1 %v701_v29 }
 0xe53   :  { %995 = vmatpush.msrb.mxu1 %v700_v30 }
 0xec9   :  { %v541_v2 = vpop.f32.mrf.mxu1 }
 0xeca   :  { %v544_v5 = vadd.f32 %v541_v2, %v521_v1 }
 0xecc   :  { %v2141_v6 = vmul.f32 -1.442695, %v544_v5 }
 0xece   :  { %2257 = vpow2.f32 %v2141_v6 }
 0xed4   :  { %v2258_v9 = vpop.eup %2257 }
 0xed5   :  { %v548_v10 = vadd.f32 1.0, %v2258_v9 }
 0xed7   :  { %2259 = vrcp.f32 %v548_v10  ;;  %v560_v15 = vand.u32 2147483648, %v548_v10  ;;  %v558_v17 = vand.u32 2147483647, %v548_v10  ;;  %vm554_vm15 = vweird.f32 %v548_v10 }
 0xed9   :  { %v561_v14 = vor.u32 1.1754944e-38, %v560_v15  ;;  %vm559_vm3 = vcmp.eq.f32.partialorder %v558_v17, 8.507059e+37 }
 0xedd   :  { %v2260_v11 = vpop.eup %2259 }
 0xede   :  { %v550_v12 = vmul.f32 %v2260_v11, %v548_v10  ;;  %vm555_vm14 = vweird.f32 %v2260_v11 }
 0xedf   :  { %vm556_vm2 = vmor %vm554_vm15, %vm555_vm14 }
 0xee0   :  { %v551_v13 = vsub.f32 1.0, %v550_v12 }
 0xee2   :  { %v552_v16 = vmul.f32 %v2260_v11, %v551_v13 }
 0xee4   :  { %v553_v18 = vadd.f32 %v2260_v11, %v552_v16 }
 0xee6   :  { %v557_v19 = vsel %vm556_vm2, %v2260_v11, %v553_v18 }
 0xee7   :  { %v562_v20 = vsel %vm559_vm3, %v561_v14, %v557_v19 }
 0xee8   :  { %v564_v21 = vmul.f32 2.0, %v562_v20  ;;  %v566_v3 = vmul.f32 %v562_v20, %v509_v60 }
 0xeea   :  { %v2142_v22 = vadd.f32 -1.0, %v564_v21 }
 0xeec   :  { %568 = vrot.lane.b32.xlu1 %v2142_v22, %s2391_s7 }
 0xf5e   :  { %v569_v23 = vpop.permute.xlu1 %568 }
 0xf5f   :  { %v571_v24 = vmul.f32 %v569_v23, %v562_v20 }
 0xf61   :  { %573 = vrot.lane.b32.xlu2 %v571_v24, %s2392_s0 }
 0xfbb   :  { %v574_v4 = vpop.permute.xlu2 %573 }
 0xfbc   :  { %v2645_v7 = vadd.f32 %v574_v4, %v566_v3 }
 0xfbe   :  { %2261 = vtanh.f32 %v2645_v7 }
 0xfc4   :  { %v2262_v8 = vpop.eup %2261 }
 0xfc5   :  { %579 = vrot.lane.b32.xlu0 %v2262_v8, %s2391_s7 }
 0xfcd   :  { %751 = vrot.lane.b32.xlu0 %v2149_v31, %s2392_s0 }
0x1037   :  { %v580_v25 = vpop.permute.xlu0 %579 }
0x1038   :  { %v582_v26 = vmul.f32 %v580_v25, %v562_v20 }
0x103a   :  { %584 = vrot.lane.b32.xlu1 %v582_v26, %s2392_s0 }
0x103f   :  { %v752_v56 = vpop.permute.xlu0 %751 }
0x10ac   :  { %v585_v32 = vpop.permute.xlu1 %584 }
0x10ad   :  { %587 = vst.msk [vmem:[#allocation3 + $0xc] sm:$0x3] %vm184_vm6, %v585_v32  ;;  %2143 = vmatmul.msk.f32.vlgmr.msra.gmra.mxu2 %vm113_vm0, %v585_v32 }
0x10ae   :  { %858 = vmatpush.msra.mxu2 %v703_v27 }
0x10b0   :  { %859 = vmatpush.msra.mxu2 %v702_v28 }
0x10b2   :  { %860 = vmatpush.msra.mxu2 %v701_v29 }
0x10b4   :  { %861 = vmatpush.msra.mxu2 %v700_v30 }
0x10b5   :  { %2150 = vmatmul.msk.f32.vlgmr.msrb.gmra.mxu2 %vm113_vm0, %v2148_v33 }
0x10b6   :  { %1059 = vmatpush.msrb.mxu2 %v703_v27 }
0x10b8   :  { %1060 = vmatpush.msrb.mxu2 %v702_v28  ;;  %v843_v28 = vld [vmem:[#allocation2 + $0x4] sm:$0x3] }
0x10ba   :  { %1061 = vmatpush.msrb.mxu2 %v701_v29 }
0x10bc   :  { %1062 = vmatpush.msrb.mxu2 %v700_v30 }
0x1130   :  { %v2672_v34 = vpop.f32.mrf.mxu2 }
0x1138   :  { %v725_v36 = vpop.f32.mrf.mxu2 }
0x1139   :  { %v728_v37 = vadd.f32 %v725_v36, %v704_v35 }
0x113b   :  { %v2151_v38 = vmul.f32 -1.442695, %v728_v37 }
0x113d   :  { %2263 = vpow2.f32 %v2151_v38 }
0x1143   :  { %v2264_v40 = vpop.eup %2263 }
0x1144   :  { %v732_v41 = vadd.f32 1.0, %v2264_v40 }
0x1146   :  { %2265 = vrcp.f32 %v732_v41  ;;  %v744_v45 = vand.u32 2147483648, %v732_v41  ;;  %v742_v47 = vand.u32 2147483647, %v732_v41  ;;  %vm738_vm5 = vweird.f32 %v732_v41 }
0x1148   :  { %v745_v49 = vor.u32 1.1754944e-38, %v744_v45  ;;  %vm743_vm8 = vcmp.eq.f32.partialorder %v742_v47, 8.507059e+37 }
0x114c   :  { %v2266_v42 = vpop.eup %2265 }
0x114d   :  { %v734_v43 = vmul.f32 %v2266_v42, %v732_v41  ;;  %vm739_vm4 = vweird.f32 %v2266_v42 }
0x114e   :  { %vm740_vm7 = vmor %vm738_vm5, %vm739_vm4 }
0x114f   :  { %v735_v44 = vsub.f32 1.0, %v734_v43 }
0x1151   :  { %v736_v46 = vmul.f32 %v2266_v42, %v735_v44 }
0x1153   :  { %v737_v48 = vadd.f32 %v2266_v42, %v736_v46 }
0x1155   :  { %v741_v50 = vsel %vm740_vm7, %v2266_v42, %v737_v48  ;;  %v588_v48 = vld [vmem:[#allocation2 + $0xe] sm:$0x3] }
0x1156   :  { %v746_v51 = vsel %vm743_vm8, %v745_v49, %v741_v50  ;;  %v611_v49 = vadd.f32 %v2672_v34, %v588_v48 }
0x1157   :  { %v748_v52 = vmul.f32 2.0, %v746_v51  ;;  %v754_v57 = vmul.f32 %v752_v56, %v746_v51 }
0x1158   :  { %v2144_v50 = vmul.f32 -1.442695, %v611_v49  ;;  %v1250_v49 = vld [vmem:[%s3059_s3 + $0x18] sm:$0xff] }
0x1159   :  { %v2152_v53 = vadd.f32 -1.0, %v748_v52 }
0x115b   :  { %756 = vrot.lane.b32.xlu2 %v2152_v53, %s2391_s7 }
0x11b5   :  { %v757_v54 = vpop.permute.xlu2 %756 }
0x11b6   :  { %v759_v55 = vmul.f32 %v757_v54, %v746_v51 }
0x11b8   :  { %761 = vrot.lane.b32.xlu1 %v759_v55, %s2392_s0 }
0x122a   :  { %v762_v58 = vpop.permute.xlu1 %761 }
0x122b   :  { %v764_v59 = vadd.f32 %v762_v58, %v754_v57 }
0x122d   :  { %2267 = vtanh.f32 %v764_v59 }
0x1233   :  { %v2268_v60 = vpop.eup %2267 }
0x1234   :  { %767 = vrot.lane.b32.xlu2 %v2268_v60, %s2391_s7 }
0x128e   :  { %v768_v61 = vpop.permute.xlu2 %767 }
0x128f   :  { %v770_v62 = vmul.f32 %v768_v61, %v746_v51 }
0x1291   :  { %772 = vrot.lane.b32.xlu0 %v770_v62, %s2392_s0 }
0x1303   :  { %v773_v63 = vpop.permute.xlu0 %772 }
0x1304   :  { %775 = vst.msk [vmem:[#allocation3] sm:$0x3] %vm184_vm6, %v773_v63  ;;  %2153 = vmatmul.msk.f32.vlgmr.msra.gmra.mxu1 %vm113_vm0, %v773_v63 }
0x1305   :  { %1273 = vmatpush.msra.mxu1 %v1250_v49 }
0x1381   :  { %v796_v1 = vpop.f32.mrf.mxu1 }
0x1382   :  { %v799_v2 = vadd.f32 %v796_v1, %v776_v0 }
0x1384   :  { %v2154_v5 = vmul.f32 -1.442695, %v799_v2 }
0x1386   :  { %2269 = vpow2.f32 %v2154_v5 }
0x138c   :  { %v2270_v6 = vpop.eup %2269 }
0x138d   :  { %v803_v9 = vadd.f32 1.0, %v2270_v6 }
0x138f   :  { %2271 = vrcp.f32 %v803_v9  ;;  %v815_v13 = vand.u32 2147483648, %v803_v9  ;;  %v813_v16 = vand.u32 2147483647, %v803_v9  ;;  %vm809_vm10 = vweird.f32 %v803_v9 }
0x1391   :  { %v816_v18 = vor.u32 1.1754944e-38, %v815_v13  ;;  %vm814_vm12 = vcmp.eq.f32.partialorder %v813_v16, 8.507059e+37  ;;  %v910_v16 = vld [vmem:[#allocation2 + $0x6] sm:$0x3] }
0x1395   :  { %v2272_v10 = vpop.eup %2271 }
0x1396   :  { %v805_v11 = vmul.f32 %v2272_v10, %v803_v9  ;;  %vm810_vm9 = vweird.f32 %v2272_v10 }
0x1397   :  { %vm811_vm11 = vmor %vm809_vm10, %vm810_vm9 }
0x1398   :  { %v806_v12 = vsub.f32 1.0, %v805_v11 }
0x139a   :  { %v807_v15 = vmul.f32 %v2272_v10, %v806_v12 }
0x139c   :  { %v808_v17 = vadd.f32 %v2272_v10, %v807_v15 }
0x139e   :  { %v812_v14 = vsel %vm811_vm11, %v2272_v10, %v808_v17 }
0x139f   :  { %v817_v19 = vsel %vm814_vm12, %v816_v18, %v812_v14 }
0x13a0   :  { %v819_v20 = vmul.f32 2.0, %v817_v19  ;;  %v821_v24 = vmul.f32 %v817_v19, %v764_v59 }
0x13a2   :  { %v2155_v21 = vadd.f32 -1.0, %v819_v20 }
0x13a4   :  { %823 = vrot.lane.b32.xlu1 %v2155_v21, %s2391_s7 }
0x1416   :  { %v824_v22 = vpop.permute.xlu1 %823 }
0x1417   :  { %v826_v23 = vmul.f32 %v824_v22, %v817_v19 }
0x1419   :  { %828 = vrot.lane.b32.xlu2 %v826_v23, %s2392_s0 }
0x1473   :  { %v829_v3 = vpop.permute.xlu2 %828 }
0x1474   :  { %v831_v4 = vadd.f32 %v829_v3, %v821_v24 }
0x1476   :  { %2273 = vtanh.f32 %v831_v4 }
0x147c   :  { %v2274_v8 = vpop.eup %2273 }
0x147d   :  { %834 = vrot.lane.b32.xlu0 %v2274_v8, %s2391_s7 }
0x14ef   :  { %v835_v25 = vpop.permute.xlu0 %834 }
0x14f0   :  { %v837_v26 = vmul.f32 %v835_v25, %v817_v19 }
0x14f2   :  { %839 = vrot.lane.b32.xlu1 %v837_v26, %s2392_s0 }
0x1564   :  { %v840_v27 = vpop.permute.xlu1 %839 }
0x1565   :  { %842 = vst.msk [vmem:[#allocation3 + $0x2] sm:$0x3] %vm184_vm6, %v840_v27  ;;  %2156 = vmatmul.msk.f32.vlgmr.msra.gmra.mxu2 %vm113_vm0, %v840_v27 }
0x15e8   :  { %v863_v29 = vpop.f32.mrf.mxu2 }
0x15e9   :  { %v866_v30 = vadd.f32 %v863_v29, %v843_v28 }
0x15eb   :  { %v2157_v31 = vmul.f32 -1.442695, %v866_v30 }
0x15ed   :  { %2275 = vpow2.f32 %v2157_v31 }
0x15f3   :  { %v2276_v32 = vpop.eup %2275 }
0x15f4   :  { %v870_v33 = vadd.f32 1.0, %v2276_v32 }
0x15f6   :  { %2277 = vrcp.f32 %v870_v33  ;;  %v882_v38 = vand.u32 2147483648, %v870_v33  ;;  %v880_v41 = vand.u32 2147483647, %v870_v33  ;;  %vm876_vm14 = vweird.f32 %v870_v33 }
0x15f7   :  { %2279 = vpow2.f32 %v2144_v50  ;;  %v1249_v50 = vld [vmem:[%s3059_s3 + $0x10] sm:$0xff] }
0x15f8   :  { %v883_v43 = vor.u32 1.1754944e-38, %v882_v38  ;;  %vm881_vm2 = vcmp.eq.f32.partialorder %v880_v41, 8.507059e+37  ;;  %1274 = vmatpush.msra.mxu1 %v1249_v50 }
0x15fc   :  { %v2278_v35 = vpop.eup %2277 }
0x15fd   :  { %v872_v36 = vmul.f32 %v2278_v35, %v870_v33  ;;  %vm877_vm13 = vweird.f32 %v2278_v35  ;;  %v2280_v51 = vpop.eup %2279 }
0x15fe   :  { %vm878_vm15 = vmor %vm876_vm14, %vm877_vm13  ;;  %v615_v52 = vadd.f32 1.0, %v2280_v51  ;;  %v1248_v51 = vld [vmem:[%s3059_s3 + $0x8] sm:$0xff] }
0x15ff   :  { %v873_v37 = vsub.f32 1.0, %v872_v36  ;;  %1275 = vmatpush.msra.mxu1 %v1248_v51 }
0x1600   :  { %2281 = vrcp.f32 %v615_v52  ;;  %v627_v58 = vand.u32 2147483648, %v615_v52  ;;  %vm621_vm4 = vweird.f32 %v615_v52  ;;  %v625_v59 = vand.u32 2147483647, %v615_v52 }
0x1601   :  { %v874_v40 = vmul.f32 %v2278_v35, %v873_v37 }
0x1602   :  { %v628_v62 = vor.u32 1.1754944e-38, %v627_v58  ;;  %vm626_vm7 = vcmp.eq.f32.partialorder %v625_v59, 8.507059e+37  ;;  %v2723_v58 = vld [vmem:[%s3065_s9] ss:$0 sm:$0xff] }
0x1603   :  { %v875_v42 = vadd.f32 %v2278_v35, %v874_v40 }
0x1605   :  { %v879_v44 = vsel %vm878_vm15, %v2278_v35, %v875_v42 }
0x1606   :  { %v884_v45 = vsel %vm881_vm2, %v883_v43, %v879_v44  ;;  %v2282_v53 = vpop.eup %2281 }
0x1607   :  { %v886_v46 = vmul.f32 2.0, %v884_v45  ;;  %v617_v54 = vmul.f32 %v2282_v53, %v615_v52  ;;  %vm622_vm3 = vweird.f32 %v2282_v53  ;;  %v888_v2 = vmul.f32 %v884_v45, %v831_v4  ;;  %v1247_v52 = vld [vmem:[%s3059_s3] sm:$0xff] }
0x1608   :  { %vm623_vm5 = vmor %vm621_vm4, %vm622_vm3  ;;  %1276 = vmatpush.msra.mxu1 %v1247_v52 }
0x1609   :  { %v2158_v47 = vadd.f32 -1.0, %v886_v46  ;;  %v618_v55 = vsub.f32 1.0, %v617_v54 }
0x160b   :  { %890 = vrot.lane.b32.xlu2 %v2158_v47, %s2391_s7  ;;  %v619_v56 = vmul.f32 %v2282_v53, %v618_v55 }
0x160d   :  { %v620_v57 = vadd.f32 %v2282_v53, %v619_v56 }
0x160f   :  { %v624_v60 = vsel %vm623_vm5, %v2282_v53, %v620_v57 }
0x1610   :  { %v629_v34 = vsel %vm626_vm7, %v628_v62, %v624_v60 }
0x1611   :  { %v631_v0 = vmul.f32 2.0, %v629_v34  ;;  %v633_v28 = vmul.f32 %v629_v34, %v2645_v7 }
0x1613   :  { %v2145_v1 = vadd.f32 -1.0, %v631_v0 }
0x1665   :  { %v891_v61 = vpop.permute.xlu2 %890 }
0x1666   :  { %v893_v63 = vmul.f32 %v891_v61, %v884_v45 }
0x1668   :  { %895 = vrot.lane.b32.xlu0 %v893_v63, %s2392_s0 }
0x1670   :  { %635 = vrot.lane.b32.xlu0 %v2145_v1, %s2391_s7 }
0x16da   :  { %v896_v5 = vpop.permute.xlu0 %895 }
0x16db   :  { %v898_v6 = vadd.f32 %v896_v5, %v888_v2 }
0x16dd   :  { %2283 = vtanh.f32 %v898_v6 }
0x16e2   :  { %v636_v12 = vpop.permute.xlu0 %635 }
0x16e3   :  { %v2284_v9 = vpop.eup %2283  ;;  %v638_v13 = vmul.f32 %v636_v12, %v629_v34 }
0x16e4   :  { %901 = vrot.lane.b32.xlu1 %v2284_v9, %s2391_s7 }
0x1756   :  { %v902_v10 = vpop.permute.xlu1 %901 }
0x1757   :  { %v904_v11 = vmul.f32 %v902_v10, %v884_v45 }
0x1759   :  { %906 = vrot.lane.b32.xlu2 %v904_v11, %s2392_s0 }
0x1761   :  { %640 = vrot.lane.b32.xlu2 %v638_v13, %s2392_s0 }
0x17b3   :  { %v907_v15 = vpop.permute.xlu2 %906 }
0x17b4   :  { %909 = vst.msk [vmem:[#allocation3 + $0x4] sm:$0x3] %vm184_vm6, %v907_v15  ;;  %2159 = vmatmul.msk.f32.vlgmr.msrb.gmra.mxu0 %vm113_vm0, %v907_v15 }
0x17bb   :  { %v641_v26 = vpop.permute.xlu2 %640 }
0x17bc   :  { %v643_v31 = vadd.f32 %v641_v26, %v633_v28 }
0x1831   :  { %v930_v17 = vpop.f32.mrf.mxu0 }
0x1832   :  { %v933_v18 = vadd.f32 %v930_v17, %v910_v16 }
0x1834   :  { %v2160_v14 = vmul.f32 -1.442695, %v933_v18 }
0x1836   :  { %2285 = vpow2.f32 %v2160_v14 }
0x183c   :  { %v2286_v19 = vpop.eup %2285 }
0x183d   :  { %v937_v20 = vadd.f32 1.0, %v2286_v19 }
0x183f   :  { %2287 = vrcp.f32 %v937_v20  ;;  %v949_v24 = vand.u32 2147483648, %v937_v20  ;;  %v947_v4 = vand.u32 2147483647, %v937_v20  ;;  %vm943_vm9 = vweird.f32 %v937_v20 }
0x1840   :  { %2289 = vtanh.f32 %v643_v31 }
0x1841   :  { %v950_v25 = vor.u32 1.1754944e-38, %v949_v24  ;;  %vm948_vm11 = vcmp.eq.f32.partialorder %v947_v4, 8.507059e+37  ;;  %v2748_v24 = vld [vmem:[%s3062_s6 + $0x8] sm:$0xff] }
0x1845   :  { %v2288_v21 = vpop.eup %2287 }
0x1846   :  { %v939_v22 = vmul.f32 %v2288_v21, %v937_v20  ;;  %vm944_vm8 = vweird.f32 %v2288_v21  ;;  %v2290_v33 = vpop.eup %2289 }
0x1847   :  { %vm945_vm10 = vmor %vm943_vm9, %vm944_vm8 }
0x1848   :  { %v940_v23 = vsub.f32 1.0, %v939_v22  ;;  %v2736_v22 = vld [vmem:[%s3062_s6 + $0x18] sm:$0xff] }
0x1849   :  { %1310 = vmatpush.msra.mxu2 %v2736_v22  ;;  %1383 = vmatpush.msrb.mxu3 %v2736_v22 }
0x184a   :  { %v941_v3 = vmul.f32 %v2288_v21, %v940_v23  ;;  %v2741_v23 = vld [vmem:[%s3062_s6 + $0x10] sm:$0xff] }
0x184b   :  { %1311 = vmatpush.msra.mxu2 %v2741_v23  ;;  %1384 = vmatpush.msrb.mxu3 %v2741_v23 }
0x184c   :  { %v942_v8 = vadd.f32 %v2288_v21, %v941_v3  ;;  %v2756_v3 = vld [vmem:[%s3062_s6] sm:$0xff] }
0x184d   :  { %1312 = vmatpush.msra.mxu2 %v2748_v24  ;;  %1385 = vmatpush.msrb.mxu3 %v2748_v24 }
0x184e   :  { %v946_v27 = vsel %vm945_vm10, %v2288_v21, %v942_v8  ;;  %v2176_v8 = vld [vmem:[%s3066_s10 + $0x4] sm:$0x3] }
0x184f   :  { %v951_v29 = vsel %vm948_vm11, %v950_v25, %v946_v27  ;;  %1313 = vmatpush.msra.mxu2 %v2756_v3  ;;  %1386 = vmatpush.msrb.mxu3 %v2756_v3 }
0x1850   :  { %v953_v30 = vmul.f32 2.0, %v951_v29  ;;  %v955_v40 = vmul.f32 %v951_v29, %v898_v6 }
0x1852   :  { %v2161_v32 = vadd.f32 -1.0, %v953_v30 }
0x1854   :  { %957 = vrot.lane.b32.xlu1 %v2161_v32, %s2391_s7 }
0x185c   :  { %646 = vrot.lane.b32.xlu1 %v2290_v33, %s2391_s7 }
0x18c6   :  { %v958_v35 = vpop.permute.xlu1 %957 }
0x18c7   :  { %v960_v36 = vmul.f32 %v958_v35, %v951_v29 }
0x18c9   :  { %962 = vrot.lane.b32.xlu0 %v960_v36, %s2392_s0 }
0x18ce   :  { %v647_v37 = vpop.permute.xlu1 %646 }
0x18cf   :  { %v649_v38 = vmul.f32 %v647_v37, %v629_v34 }
0x18d1   :  { %651 = vrot.lane.b32.xlu0 %v649_v38, %s2392_s0 }
0x193b   :  { %v963_v7 = vpop.permute.xlu0 %962 }
0x193c   :  { %v965_v41 = vadd.f32 %v963_v7, %v955_v40 }
0x193e   :  { %2291 = vtanh.f32 %v965_v41 }
0x1943   :  { %v652_v42 = vpop.permute.xlu0 %651 }
0x1944   :  { %v2292_v43 = vpop.eup %2291  ;;  %654 = vst.msk [vmem:[#allocation3 + $0xe] sm:$0x3] %vm184_vm6, %v652_v42 }
0x1945   :  { %968 = vrot.lane.b32.xlu2 %v2292_v43, %s2391_s7 }
0x194b   :  { %v656_v44 = vld [vmem:[#allocation3 + $0x8] sm:$0xff] }
0x194c   :  { %2147 = vmatmul.msk.f32.gmra.mxu3 %vm113_vm0, %v656_v44 }
0x199f   :  { %v969_v45 = vpop.permute.xlu2 %968 }
0x19a0   :  { %v971_v46 = vmul.f32 %v969_v45, %v951_v29 }
0x19a2   :  { %973 = vrot.lane.b32.xlu1 %v971_v46, %s2392_s0 }
0x19cf   :  { %v691_v47 = vpop.f32.mrf.mxu3 }
0x19d0   :  { %v692_v48 = vadd.f32 %v2634_v39, %v691_v47 }
0x19d2   :  { %695 = vst [vmem:[#allocation2 + $0x8] sm:$0xff] %v692_v48 }
0x19d9   :  { %v977_v54 = vld [vmem:[#allocation2 + $0x8] sm:$0x3]  ;;  %v1044_v25 = vld [vmem:[#allocation2 + $0xa] sm:$0x3] }
0x1a14   :  { %v974_v39 = vpop.permute.xlu1 %973 }
0x1a15   :  { %976 = vst.msk [vmem:[#allocation3 + $0x6] sm:$0x3] %vm184_vm6, %v974_v39  ;;  %2162 = vmatmul.msk.f32.vlgmr.msrb.gmra.mxu1 %vm113_vm0, %v974_v39 }
0x1a16   :  { %1582 = vmatpush.msrb.mxu1 %v2736_v22 }
0x1a18   :  { %1583 = vmatpush.msrb.mxu1 %v2741_v23 }
0x1a1a   :  { %1584 = vmatpush.msrb.mxu1 %v2748_v24 }
0x1a1c   :  { %v1245_v53 = vld [vmem:[#allocation3] sm:$0xff]  ;;  %1585 = vmatpush.msrb.mxu1 %v2756_v3 }
0x1a1d   :  { %2174 = vmatmul.msk.f32.vlgmr.msra.gmra.mxu1 %vm113_vm0, %v1245_v53 }
0x1a1e   :  { %1762 = vmatpush.msra.mxu1 %v2736_v22 }
0x1a20   :  { %1763 = vmatpush.msra.mxu1 %v2741_v23 }
0x1a22   :  { %1764 = vmatpush.msra.mxu1 %v2748_v24 }
0x1a24   :  { %1765 = vmatpush.msra.mxu1 %v2756_v3 }
0x1a92   :  { %v997_v55 = vpop.f32.mrf.mxu1 }
0x1a93   :  { %v1000_v56 = vadd.f32 %v997_v55, %v977_v54 }
0x1a95   :  { %v2163_v57 = vmul.f32 -1.442695, %v1000_v56 }
0x1a97   :  { %2293 = vpow2.f32 %v2163_v57 }
0x1a9a   :  { %v1278_v59 = vpop.f32.mrf.mxu1 }
0x1a9b   :  { %v1279_v60 = vadd.f32 %v2723_v58, %v1278_v59 }
0x1a9d   :  { %v2294_v61 = vpop.eup %2293  ;;  %1284 = vst [vmem:[#allocation2] sm:$0xff] %v1279_v60 }
0x1a9e   :  { %v1004_v62 = vadd.f32 1.0, %v2294_v61  ;;  %v2177_v61 = vld [vmem:[%s3067_s11 + $0x4] sm:$0x3] }
0x1aa0   :  { %2295 = vrcp.f32 %v1004_v62  ;;  %v1016_v1 = vand.u32 2147483648, %v1004_v62  ;;  %v1014_v5 = vand.u32 2147483647, %v1004_v62  ;;  %vm1010_vm13 = vweird.f32 %v1004_v62 }
0x1aa2   :  { %v1017_v9 = vor.u32 1.1754944e-38, %v1016_v1  ;;  %vm1015_vm15 = vcmp.eq.f32.partialorder %v1014_v5, 8.507059e+37 }
0x1aa4   :  { %v1294_v29 = vld [vmem:[#allocation2] sm:$0x3] }
0x1aa6   :  { %v2296_v63 = vpop.eup %2295 }
0x1aa7   :  { %v1006_v34 = vmul.f32 %v2296_v63, %v1004_v62  ;;  %vm1011_vm12 = vweird.f32 %v2296_v63 }
0x1aa8   :  { %vm1012_vm14 = vmor %vm1010_vm13, %vm1011_vm12 }
0x1aa9   :  { %v1007_v0 = vsub.f32 1.0, %v1006_v34 }
0x1aab   :  { %v1008_v2 = vmul.f32 %v2296_v63, %v1007_v0 }
0x1aad   :  { %v1009_v6 = vadd.f32 %v2296_v63, %v1008_v2 }
0x1aaf   :  { %v1013_v10 = vsel %vm1012_vm14, %v2296_v63, %v1009_v6 }
0x1ab0   :  { %v1018_v11 = vsel %vm1015_vm15, %v1017_v9, %v1013_v10 }
0x1ab1   :  { %v1020_v12 = vmul.f32 2.0, %v1018_v11  ;;  %v1022_v17 = vmul.f32 %v1018_v11, %v965_v41 }
0x1ab3   :  { %v2164_v13 = vadd.f32 -1.0, %v1020_v12 }
0x1ab5   :  { %1024 = vrot.lane.b32.xlu2 %v2164_v13, %s2391_s7 }
0x1b0f   :  { %v1025_v15 = vpop.permute.xlu2 %1024 }
0x1b10   :  { %v1027_v16 = vmul.f32 %v1025_v15, %v1018_v11 }
0x1b12   :  { %1029 = vrot.lane.b32.xlu0 %v1027_v16, %s2392_s0 }
0x1b84   :  { %v1030_v18 = vpop.permute.xlu0 %1029 }
0x1b85   :  { %v2728_v14 = vadd.f32 %v1030_v18, %v1022_v17 }
0x1b87   :  { %2297 = vtanh.f32 %v2728_v14 }
0x1b8d   :  { %v2298_v19 = vpop.eup %2297 }
0x1b8e   :  { %1035 = vrot.lane.b32.xlu1 %v2298_v19, %s2391_s7  ;;  %v1364_v19 = vld [vmem:[%s3068_s12 + $0x18] sm:$0xff] }
0x1c00   :  { %v1036_v20 = vpop.permute.xlu1 %1035 }
0x1c01   :  { %v1038_v21 = vmul.f32 %v1036_v20, %v1018_v11  ;;  %v1363_v20 = vld [vmem:[%s3068_s12 + $0x10] sm:$0xff] }
0x1c03   :  { %1040 = vrot.lane.b32.xlu2 %v1038_v21, %s2392_s0  ;;  %v1362_v21 = vld [vmem:[%s3068_s12 + $0x8] sm:$0xff] }
0x1c5d   :  { %v1041_v4 = vpop.permute.xlu2 %1040 }
0x1c5e   :  { %1043 = vst.msk [vmem:[#allocation3 + $0x8] sm:$0x3] %vm184_vm6, %v1041_v4  ;;  %2165 = vmatmul.msk.f32.vlgmr.msrb.gmra.mxu2 %vm113_vm0, %v1041_v4  ;;  %v1361_v4 = vld [vmem:[%s3068_s12] sm:$0xff] }
0x1c5f   :  { %1471 = vmatpush.msrb.mxu2 %v1364_v19  ;;  %v1432_v19 = vld [vmem:[%s3068_s12 + $0x30] sm:$0xff] }
0x1c61   :  { %1472 = vmatpush.msrb.mxu2 %v1363_v20  ;;  %v1431_v20 = vld [vmem:[%s3068_s12 + $0x28] sm:$0xff] }
0x1c63   :  { %1473 = vmatpush.msrb.mxu2 %v1362_v21  ;;  %v1430_v21 = vld [vmem:[%s3068_s12 + $0x20] sm:$0xff] }
0x1c65   :  { %1474 = vmatpush.msrb.mxu2 %v1361_v4 }
0x1c66   :  { %2178 = vmatmul.msk.f32.vlgmr.msra.gmra.mxu2 %vm113_vm0, %v2176_v8 }
0x1ce1   :  { %v1064_v26 = vpop.f32.mrf.mxu2 }
0x1ce2   :  { %v1067_v27 = vadd.f32 %v1064_v26, %v1044_v25  ;;  %v1111_v26 = vld [vmem:[#allocation2 + $0xc] sm:$0x3] }
0x1ce4   :  { %v2166_v28 = vmul.f32 -1.442695, %v1067_v27 }
0x1ce6   :  { %2299 = vpow2.f32 %v2166_v28 }
0x1ce9   :  { %v1315_v30 = vpop.f32.mrf.mxu2 }
0x1cea   :  { %v1318_v31 = vadd.f32 %v1315_v30, %v1294_v29 }
0x1cec   :  { %v2300_v32 = vpop.eup %2299  ;;  %v2179_v33 = vmul.f32 -1.442695, %v1318_v31 }
0x1ced   :  { %v1071_v35 = vadd.f32 1.0, %v2300_v32 }
0x1cee   :  { %2301 = vpow2.f32 %v2179_v33 }
0x1cef   :  { %2303 = vrcp.f32 %v1071_v35  ;;  %v1083_v41 = vand.u32 2147483648, %v1071_v35  ;;  %v1081_v43 = vand.u32 2147483647, %v1071_v35  ;;  %vm1077_vm3 = vweird.f32 %v1071_v35 }
0x1cf1   :  { %v1084_v46 = vor.u32 1.1754944e-38, %v1083_v41  ;;  %vm1082_vm5 = vcmp.eq.f32.partialorder %v1081_v43, 8.507059e+37 }
0x1cf4   :  { %v2302_v36 = vpop.eup %2301 }
0x1cf5   :  { %v2304_v37 = vpop.eup %2303  ;;  %v1322_v38 = vadd.f32 1.0, %v2302_v36 }
0x1cf6   :  { %v1073_v40 = vmul.f32 %v2304_v37, %v1071_v35  ;;  %vm1078_vm2 = vweird.f32 %v2304_v37 }
0x1cf7   :  { %2305 = vrcp.f32 %v1322_v38  ;;  %vm1079_vm4 = vmor %vm1077_vm3, %vm1078_vm2  ;;  %v1334_v52 = vand.u32 2147483648, %v1322_v38  ;;  %v1332_v54 = vand.u32 2147483647, %v1322_v38  ;;  %vm1328_vm8 = vweird.f32 %v1322_v38 }
0x1cf8   :  { %v1074_v7 = vsub.f32 1.0, %v1073_v40 }
0x1cf9   :  { %v1335_v56 = vor.u32 1.1754944e-38, %v1334_v52  ;;  %vm1333_vm10 = vcmp.eq.f32.partialorder %v1332_v54, 8.507059e+37 }
0x1cfa   :  { %v1075_v42 = vmul.f32 %v2304_v37, %v1074_v7 }
0x1cfc   :  { %v1076_v44 = vadd.f32 %v2304_v37, %v1075_v42 }
0x1cfd   :  { %v2306_v45 = vpop.eup %2305 }
0x1cfe   :  { %v1324_v47 = vmul.f32 %v2306_v45, %v1322_v38  ;;  %v1080_v48 = vsel %vm1079_vm4, %v2304_v37, %v1076_v44  ;;  %vm1329_vm7 = vweird.f32 %v2306_v45  ;;  %v1365_v44 = vld [vmem:[#allocation2 + $0x2] sm:$0x3] }
0x1cff   :  { %v1085_v49 = vsel %vm1082_vm5, %v1084_v46, %v1080_v48  ;;  %vm1330_vm9 = vmor %vm1328_vm8, %vm1329_vm7 }
0x1d00   :  { %v1325_v50 = vsub.f32 1.0, %v1324_v47  ;;  %v1087_v51 = vmul.f32 2.0, %v1085_v49  ;;  %v1089_v2 = vmul.f32 %v1085_v49, %v2728_v14 }
0x1d02   :  { %v2167_v39 = vadd.f32 -1.0, %v1087_v51  ;;  %v1326_v53 = vmul.f32 %v2306_v45, %v1325_v50 }
0x1d04   :  { %1091 = vrot.lane.b32.xlu0 %v2167_v39, %s2391_s7  ;;  %v1327_v55 = vadd.f32 %v2306_v45, %v1326_v53 }
0x1d06   :  { %v1331_v57 = vsel %vm1330_vm9, %v2306_v45, %v1327_v55 }
0x1d07   :  { %v1336_v59 = vsel %vm1333_vm10, %v1335_v56, %v1331_v57 }
0x1d08   :  { %v1338_v60 = vmul.f32 2.0, %v1336_v59 }
0x1d0a   :  { %v2180_v62 = vadd.f32 -1.0, %v1338_v60 }
0x1d0c   :  { %1341 = vrot.lane.b32.xlu0 %v2177_v61, %s2392_s0  ;;  %1346 = vrot.lane.b32.xlu1 %v2180_v62, %s2391_s7 }
0x1d76   :  { %v1092_v63 = vpop.permute.xlu0 %1091 }
0x1d77   :  { %v1094_v34 = vmul.f32 %v1092_v63, %v1085_v49 }
0x1d79   :  { %1096 = vrot.lane.b32.xlu2 %v1094_v34, %s2392_s0 }
0x1d7e   :  { %v1347_v0 = vpop.permute.xlu1 %1346  ;;  %v1342_v10 = vpop.permute.xlu0 %1341 }
0x1d7f   :  { %v1349_v1 = vmul.f32 %v1347_v0, %v1336_v59  ;;  %v1344_v11 = vmul.f32 %v1342_v10, %v1336_v59 }
0x1d81   :  { %1351 = vrot.lane.b32.xlu1 %v1349_v1, %s2392_s0 }
0x1dd3   :  { %v1097_v5 = vpop.permute.xlu2 %1096 }
0x1dd4   :  { %v2784_v6 = vadd.f32 %v1097_v5, %v1089_v2 }
0x1dd6   :  { %2307 = vtanh.f32 %v2784_v6 }
0x1ddc   :  { %v2308_v9 = vpop.eup %2307 }
0x1ddd   :  { %1102 = vrot.lane.b32.xlu2 %v2308_v9, %s2391_s7 }
0x1df3   :  { %v1352_v12 = vpop.permute.xlu1 %1351 }
0x1df4   :  { %v2788_v13 = vadd.f32 %v1352_v12, %v1344_v11 }
0x1df6   :  { %2309 = vtanh.f32 %v2788_v13 }
0x1dfc   :  { %v2310_v15 = vpop.eup %2309 }
0x1dfd   :  { %1357 = vrot.lane.b32.xlu0 %v2310_v15, %s2391_s7 }
0x1e37   :  { %v1103_v16 = vpop.permute.xlu2 %1102 }
0x1e38   :  { %v1105_v17 = vmul.f32 %v1103_v16, %v1085_v49 }
0x1e3a   :  { %1107 = vrot.lane.b32.xlu1 %v1105_v17, %s2392_s0 }
0x1e6f   :  { %v1358_v18 = vpop.permute.xlu0 %1357 }
0x1e70   :  { %v1360_v14 = vmul.f32 %v1358_v18, %v1336_v59 }
0x1e72   :  { %1367 = vrot.lane.b32.xlu2 %v1360_v14, %s2392_s0 }
0x1eac   :  { %v1108_v8 = vpop.permute.xlu1 %1107 }
0x1ead   :  { %1110 = vst.msk [vmem:[#allocation3 + $0xa] sm:$0x3] %vm184_vm6, %v1108_v8  ;;  %2168 = vmatmul.msk.f32.vlgmr.msra.gmra.mxu3 %vm113_vm0, %v1108_v8 }
0x1eae   :  { %1492 = vmatpush.msra.mxu3 %v2736_v22 }
0x1eb0   :  { %1493 = vmatpush.msra.mxu3 %v2741_v23 }
0x1eb2   :  { %1494 = vmatpush.msra.mxu3 %v2748_v24 }
0x1eb4   :  { %1495 = vmatpush.msra.mxu3 %v2756_v3 }
0x1ecc   :  { %v1368_v25 = vpop.permute.xlu2 %1367 }
0x1ecd   :  { %2181 = vmatmul.msk.f32.vlgmr.msrb.gmra.mxu3 %vm113_vm0, %v1368_v25  ;;  %2185 = vmatmul.msk.f32.vlgmr.msrb.gmra.mxu2 %vm113_vm0, %v1368_v25  ;;  %v1178_v25 = vld [vmem:[#allocation2 + $0xe] sm:$0x3] }
0x1ece   :  { %1672 = vmatpush.msrb.mxu3 %v2736_v22 }
0x1ed0   :  { %1673 = vmatpush.msrb.mxu3 %v2741_v23 }
0x1ed2   :  { %1674 = vmatpush.msrb.mxu3 %v2748_v24 }
0x1ed4   :  { %1675 = vmatpush.msrb.mxu3 %v2756_v3 }
0x1f30   :  { %v1131_v27 = vpop.f32.mrf.mxu3 }
0x1f31   :  { %v1134_v28 = vadd.f32 %v1131_v27, %v1111_v26 }
0x1f33   :  { %v2169_v29 = vmul.f32 -1.442695, %v1134_v28 }
0x1f35   :  { %2311 = vpow2.f32 %v2169_v29 }
0x1f3b   :  { %v2312_v30 = vpop.eup %2311 }
0x1f3c   :  { %v1138_v31 = vadd.f32 1.0, %v2312_v30 }
0x1f3e   :  { %2313 = vrcp.f32 %v1138_v31  ;;  %v1150_v36 = vand.u32 2147483648, %v1138_v31  ;;  %v1148_v38 = vand.u32 2147483647, %v1138_v31  ;;  %vm1144_vm12 = vweird.f32 %v1138_v31 }
0x1f40   :  { %v1151_v7 = vor.u32 1.1754944e-38, %v1150_v36  ;;  %vm1149_vm14 = vcmp.eq.f32.partialorder %v1148_v38, 8.507059e+37 }
0x1f44   :  { %v2314_v32 = vpop.eup %2313 }
0x1f45   :  { %v1140_v33 = vmul.f32 %v2314_v32, %v1138_v31  ;;  %vm1145_vm11 = vweird.f32 %v2314_v32 }
0x1f46   :  { %vm1146_vm13 = vmor %vm1144_vm12, %vm1145_vm11 }
0x1f47   :  { %v1141_v35 = vsub.f32 1.0, %v1140_v33 }
0x1f49   :  { %v1142_v37 = vmul.f32 %v2314_v32, %v1141_v35 }
0x1f4b   :  { %v1143_v40 = vadd.f32 %v2314_v32, %v1142_v37 }
0x1f4d   :  { %v1147_v41 = vsel %vm1146_vm13, %v2314_v32, %v1143_v40 }
0x1f4e   :  { %v1152_v42 = vsel %vm1149_vm14, %v1151_v7, %v1147_v41 }
0x1f4f   :  { %v1154_v43 = vmul.f32 2.0, %v1152_v42  ;;  %v1156_v2 = vmul.f32 %v1152_v42, %v2784_v6 }
0x1f50   :  { %v1388_v45 = vpop.f32.mrf.mxu3 }
0x1f51   :  { %v1391_v46 = vadd.f32 %v1388_v45, %v1365_v44  ;;  %v2170_v47 = vadd.f32 -1.0, %v1154_v43  ;;  %v1479_v44 = vld [vmem:[#allocation2 + $0x4] sm:$0x3] }
0x1f53   :  { %v2182_v48 = vmul.f32 -1.442695, %v1391_v46  ;;  %1158 = vrot.lane.b32.xlu0 %v2170_v47, %s2391_s7 }
0x1f55   :  { %2315 = vpow2.f32 %v2182_v48 }
0x1f5b   :  { %v2316_v49 = vpop.eup %2315 }
0x1f5c   :  { %v1395_v50 = vadd.f32 1.0, %v2316_v49 }
0x1f5e   :  { %2317 = vrcp.f32 %v1395_v50  ;;  %v1407_v53 = vand.u32 2147483648, %v1395_v50  ;;  %v1405_v55 = vand.u32 2147483647, %v1395_v50  ;;  %vm1401_vm2 = vweird.f32 %v1395_v50 }
0x1f60   :  { %v1408_v57 = vor.u32 1.1754944e-38, %v1407_v53  ;;  %vm1406_vm4 = vcmp.eq.f32.partialorder %v1405_v55, 8.507059e+37 }
0x1f64   :  { %v2318_v51 = vpop.eup %2317 }
0x1f65   :  { %v1397_v52 = vmul.f32 %v2318_v51, %v1395_v50  ;;  %vm1402_vm15 = vweird.f32 %v2318_v51 }
0x1f66   :  { %vm1403_vm3 = vmor %vm1401_vm2, %vm1402_vm15 }
0x1f67   :  { %v1398_v39 = vsub.f32 1.0, %v1397_v52 }
0x1f69   :  { %v1399_v54 = vmul.f32 %v2318_v51, %v1398_v39 }
0x1f6b   :  { %v1400_v56 = vadd.f32 %v2318_v51, %v1399_v54 }
0x1f6d   :  { %v1404_v59 = vsel %vm1403_vm3, %v2318_v51, %v1400_v56 }
0x1f6e   :  { %v1409_v60 = vsel %vm1406_vm4, %v1408_v57, %v1404_v59 }
0x1f6f   :  { %v1411_v61 = vmul.f32 2.0, %v1409_v60  ;;  %v1413_v11 = vmul.f32 %v1409_v60, %v2788_v13  ;;  %v1433_v13 = vld [vmem:[%s3068_s12 + $0x38] sm:$0xff] }
0x1f70   :  { %1451 = vmatpush.msrb.mxu0 %v1433_v13  ;;  %v1542_v13 = vld [vmem:[%s3068_s12 + $0x58] sm:$0xff] }
0x1f71   :  { %v2183_v62 = vadd.f32 -1.0, %v1411_v61 }
0x1f72   :  { %1452 = vmatpush.msrb.mxu0 %v1432_v19  ;;  %v1540_v19 = vld [vmem:[%s3068_s12 + $0x48] sm:$0xff] }
0x1f73   :  { %1415 = vrot.lane.b32.xlu1 %v2183_v62, %s2391_s7 }
0x1f74   :  { %1453 = vmatpush.msrb.mxu0 %v1431_v20  ;;  %v1539_v20 = vld [vmem:[%s3068_s12 + $0x40] sm:$0xff] }
0x1f76   :  { %1454 = vmatpush.msrb.mxu0 %v1430_v21 }
0x1fc5   :  { %v1159_v63 = vpop.permute.xlu0 %1158 }
0x1fc6   :  { %v1161_v34 = vmul.f32 %v1159_v63, %v1152_v42 }
0x1fc8   :  { %1163 = vrot.lane.b32.xlu2 %v1161_v34, %s2392_s0 }
0x1fe5   :  { %v1416_v0 = vpop.permute.xlu1 %1415 }
0x1fe6   :  { %v1418_v1 = vmul.f32 %v1416_v0, %v1409_v60 }
0x1fe8   :  { %1420 = vrot.lane.b32.xlu0 %v1418_v1, %s2392_s0 }
0x2022   :  { %v1164_v5 = vpop.permute.xlu2 %1163 }
0x2023   :  { %v2823_v9 = vadd.f32 %v1164_v5, %v1156_v2 }
0x2025   :  { %2319 = vtanh.f32 %v2823_v9 }
0x202b   :  { %v2320_v10 = vpop.eup %2319 }
0x202c   :  { %1169 = vrot.lane.b32.xlu1 %v2320_v10, %s2391_s7 }
0x205a   :  { %v1421_v12 = vpop.permute.xlu0 %1420 }
0x205b   :  { %v2828_v15 = vadd.f32 %v1421_v12, %v1413_v11 }
0x205d   :  { %2321 = vtanh.f32 %v2828_v15 }
0x2063   :  { %v2322_v16 = vpop.eup %2321 }
0x2064   :  { %1426 = vrot.lane.b32.xlu2 %v2322_v16, %s2391_s7 }
0x209e   :  { %v1170_v17 = vpop.permute.xlu1 %1169 }
0x209f   :  { %v1172_v6 = vmul.f32 %v1170_v17, %v1152_v42 }
0x20a1   :  { %1174 = vrot.lane.b32.xlu0 %v1172_v6, %s2392_s0 }
0x20be   :  { %v1427_v18 = vpop.permute.xlu2 %1426 }
0x20bf   :  { %v1429_v14 = vmul.f32 %v1427_v18, %v1409_v60 }
0x20c1   :  { %1435 = vrot.lane.b32.xlu1 %v1429_v14, %s2392_s0 }
0x2113   :  { %v1175_v4 = vpop.permute.xlu0 %1174 }
0x2114   :  { %1177 = vst.msk [vmem:[#allocation3 + $0xc] sm:$0x3] %vm184_vm6, %v1175_v4  ;;  %2171 = vmatmul.msk.f32.vlgmr.msra.gmra.mxu0 %vm113_vm0, %v1175_v4 }
0x2115   :  { %1560 = vmatpush.msra.mxu0 %v1542_v13  ;;  %v1722_v13 = vld [vmem:[%s3068_s12 + $0x98] sm:$0xff] }
0x2133   :  { %v1436_v8 = vpop.permute.xlu1 %1435 }
0x2134   :  { %2184 = vmatmul.msk.f32.vlgmr.msrb.gmra.mxu0 %vm113_vm0, %v1436_v8  ;;  %2186 = vmatmul.msk.f32.vlgmr.msra.gmra.mxu3 %vm113_vm0, %v1436_v8 }
0x2135   :  { %1852 = vmatpush.msra.mxu3 %v2736_v22 }
0x2137   :  { %1853 = vmatpush.msra.mxu3 %v2741_v23 }
0x2139   :  { %1854 = vmatpush.msra.mxu3 %v2748_v24 }
0x213b   :  { %1855 = vmatpush.msra.mxu3 %v2756_v3 }
0x2191   :  { %v1198_v26 = vpop.f32.mrf.mxu0 }
0x2192   :  { %v1201_v27 = vadd.f32 %v1198_v26, %v1178_v25 }
0x2194   :  { %v2172_v28 = vmul.f32 -1.442695, %v1201_v27  ;;  %v1569_v27 = vld [vmem:[#allocation2 + $0x6] sm:$0x3] }
0x2196   :  { %2323 = vpow2.f32 %v2172_v28 }
0x219c   :  { %v2324_v29 = vpop.eup %2323 }
0x219d   :  { %v1205_v30 = vadd.f32 1.0, %v2324_v29 }
0x219f   :  { %2325 = vrcp.f32 %v1205_v30  ;;  %v1217_v35 = vand.u32 2147483648, %v1205_v30  ;;  %v1215_v37 = vand.u32 2147483647, %v1205_v30  ;;  %vm1211_vm7 = vweird.f32 %v1205_v30 }
0x21a1   :  { %v1218_v40 = vor.u32 1.1754944e-38, %v1217_v35  ;;  %vm1216_vm9 = vcmp.eq.f32.partialorder %v1215_v37, 8.507059e+37 }
0x21a5   :  { %v2326_v31 = vpop.eup %2325 }
0x21a6   :  { %v1207_v32 = vmul.f32 %v2326_v31, %v1205_v30  ;;  %vm1212_vm5 = vweird.f32 %v2326_v31 }
0x21a7   :  { %vm1213_vm8 = vmor %vm1211_vm7, %vm1212_vm5 }
0x21a8   :  { %v1208_v33 = vsub.f32 1.0, %v1207_v32 }
0x21aa   :  { %v1209_v36 = vmul.f32 %v2326_v31, %v1208_v33 }
0x21ac   :  { %v1210_v38 = vadd.f32 %v2326_v31, %v1209_v36 }
0x21ae   :  { %v1214_v7 = vsel %vm1213_vm8, %v2326_v31, %v1210_v38 }
0x21af   :  { %v1219_v41 = vsel %vm1216_vm9, %v1218_v40, %v1214_v7 }
0x21b0   :  { %v1221_v42 = vmul.f32 2.0, %v1219_v41  ;;  %v1223_v1 = vmul.f32 %v1219_v41, %v2823_v9 }
0x21b2   :  { %v2173_v43 = vadd.f32 -1.0, %v1221_v42 }
0x21b4   :  { %1225 = vrot.lane.b32.xlu2 %v2173_v43, %s2391_s7 }
0x21b7   :  { %v1497_v45 = vpop.f32.mrf.mxu3 }
0x21b8   :  { %v1500_v46 = vadd.f32 %v1497_v45, %v1479_v44 }
0x21ba   :  { %v2187_v47 = vmul.f32 -1.442695, %v1500_v46 }
0x21bc   :  { %2327 = vpow2.f32 %v2187_v47  ;;  %v1632_v47 = vld [vmem:[%s3068_s12 + $0x78] sm:$0xff] }
0x21bd   :  { %1650 = vmatpush.msra.mxu2 %v1632_v47  ;;  %v1810_v47 = vld [vmem:[%s3068_s12 + $0xa8] sm:$0xff] }
0x21c2   :  { %v2328_v48 = vpop.eup %2327 }
0x21c3   :  { %v1504_v49 = vadd.f32 1.0, %v2328_v48  ;;  %v1631_v48 = vld [vmem:[%s3068_s12 + $0x70] sm:$0xff] }
0x21c4   :  { %1651 = vmatpush.msra.mxu2 %v1631_v48  ;;  %v1809_v48 = vld [vmem:[%s3068_s12 + $0xa0] sm:$0xff] }
0x21c5   :  { %2329 = vrcp.f32 %v1504_v49  ;;  %v1516_v39 = vand.u32 2147483648, %v1504_v49  ;;  %v1514_v54 = vand.u32 2147483647, %v1504_v49  ;;  %vm1510_vm11 = vweird.f32 %v1504_v49 }
0x21c7   :  { %v1517_v56 = vor.u32 1.1754944e-38, %v1516_v39  ;;  %vm1515_vm13 = vcmp.eq.f32.partialorder %v1514_v54, 8.507059e+37 }
0x21cb   :  { %v2330_v50 = vpop.eup %2329 }
0x21cc   :  { %v1506_v51 = vmul.f32 %v2330_v50, %v1504_v49  ;;  %vm1511_vm10 = vweird.f32 %v2330_v50  ;;  %v1630_v49 = vld [vmem:[%s3068_s12 + $0x68] sm:$0xff] }
0x21cd   :  { %vm1512_vm12 = vmor %vm1510_vm11, %vm1511_vm10  ;;  %1652 = vmatpush.msra.mxu2 %v1630_v49 }
0x21ce   :  { %v1507_v52 = vsub.f32 1.0, %v1506_v51 }
0x21d0   :  { %v1508_v53 = vmul.f32 %v2330_v50, %v1507_v52 }
0x21d2   :  { %v1509_v55 = vadd.f32 %v2330_v50, %v1508_v53 }
0x21d4   :  { %v1513_v57 = vsel %vm1512_vm12, %v2330_v50, %v1509_v55  ;;  %v1629_v50 = vld [vmem:[%s3068_s12 + $0x60] sm:$0xff] }
0x21d5   :  { %v1518_v59 = vsel %vm1515_vm13, %v1517_v56, %v1513_v57  ;;  %1653 = vmatpush.msra.mxu2 %v1629_v50 }
0x21d6   :  { %v1520_v60 = vmul.f32 2.0, %v1518_v59  ;;  %v1522_v11 = vmul.f32 %v1518_v59, %v2828_v15  ;;  %v1541_v15 = vld [vmem:[%s3068_s12 + $0x50] sm:$0xff] }
0x21d7   :  { %1561 = vmatpush.msra.mxu0 %v1541_v15  ;;  %v1721_v15 = vld [vmem:[%s3068_s12 + $0x90] sm:$0xff] }
0x21d8   :  { %v2188_v61 = vadd.f32 -1.0, %v1520_v60 }
0x21d9   :  { %1562 = vmatpush.msra.mxu0 %v1540_v19  ;;  %v1720_v19 = vld [vmem:[%s3068_s12 + $0x88] sm:$0xff] }
0x21da   :  { %1524 = vrot.lane.b32.xlu0 %v2188_v61, %s2391_s7 }
0x21db   :  { %1563 = vmatpush.msra.mxu0 %v1539_v20  ;;  %v1719_v20 = vld [vmem:[%s3068_s12 + $0x80] sm:$0xff] }
0x21dd   :  { %1740 = vmatpush.msrb.mxu0 %v1722_v13  ;;  %v1900_v13 = vld [vmem:[%s3068_s12 + $0xc8] sm:$0xff] }
0x21df   :  { %1741 = vmatpush.msrb.mxu0 %v1721_v15  ;;  %v1899_v15 = vld [vmem:[%s3068_s12 + $0xc0] sm:$0xff] }
0x21e1   :  { %1742 = vmatpush.msrb.mxu0 %v1720_v19 }
0x21e3   :  { %1743 = vmatpush.msrb.mxu0 %v1719_v20 }
0x220e   :  { %v1226_v62 = vpop.permute.xlu2 %1225 }
0x220f   :  { %v1228_v63 = vmul.f32 %v1226_v62, %v1219_v41 }
0x2211   :  { %1230 = vrot.lane.b32.xlu1 %v1228_v63, %s2392_s0 }
0x224c   :  { %v1525_v34 = vpop.permute.xlu0 %1524 }
0x224d   :  { %v1527_v0 = vmul.f32 %v1525_v34, %v1518_v59 }
0x224f   :  { %1529 = vrot.lane.b32.xlu2 %v1527_v0, %s2392_s0 }
0x2283   :  { %v1231_v2 = vpop.permute.xlu1 %1230 }
0x2284   :  { %v1233_v5 = vadd.f32 %v1231_v2, %v1223_v1 }
0x2286   :  { %2331 = vtanh.f32 %v1233_v5 }
0x228c   :  { %v2332_v10 = vpop.eup %2331 }
0x228d   :  { %1236 = vrot.lane.b32.xlu0 %v2332_v10, %s2391_s7 }
0x22a9   :  { %v1530_v12 = vpop.permute.xlu2 %1529 }
0x22aa   :  { %v1532_v16 = vadd.f32 %v1530_v12, %v1522_v11 }
0x22ac   :  { %2333 = vtanh.f32 %v1532_v16 }
0x22b2   :  { %v2334_v17 = vpop.eup %2333 }
0x22b3   :  { %1535 = vrot.lane.b32.xlu1 %v2334_v17, %s2391_s7 }
0x22ff   :  { %v1237_v6 = vpop.permute.xlu0 %1236 }
0x2300   :  { %v1239_v18 = vmul.f32 %v1237_v6, %v1219_v41 }
0x2302   :  { %1241 = vrot.lane.b32.xlu2 %v1239_v18, %s2392_s0 }
0x2325   :  { %v1536_v14 = vpop.permute.xlu1 %1535 }
0x2326   :  { %v1538_v9 = vmul.f32 %v1536_v14, %v1518_v59 }
0x2328   :  { %1544 = vrot.lane.b32.xlu0 %v1538_v9, %s2392_s0 }
0x235c   :  { %v1242_v21 = vpop.permute.xlu2 %1241 }
0x235d   :  { %1244 = vst.msk [vmem:[#allocation3 + $0xe] sm:$0x3] %vm184_vm6, %v1242_v21 }
0x2364   :  { %v1246_v4 = vld [vmem:[#allocation3 + $0x8] sm:$0xff] }
0x2365   :  { %2175 = vmatmul.msk.f32.gmra.mxu1 %vm113_vm0, %v1246_v4 }
0x239a   :  { %v1545_v8 = vpop.permute.xlu0 %1544 }
0x239b   :  { %2189 = vmatmul.msk.f32.vlgmr.msra.gmra.mxu0 %vm113_vm0, %v1545_v8  ;;  %2190 = vmatmul.msk.f32.vlgmr.msrb.gmra.mxu1 %vm113_vm0, %v1545_v8 }
0x239c   :  { %1942 = vmatpush.msrb.mxu1 %v2736_v22 }
0x239e   :  { %1943 = vmatpush.msrb.mxu1 %v2741_v23 }
0x23a0   :  { %1944 = vmatpush.msrb.mxu1 %v2748_v24 }
0x23a2   :  { %1945 = vmatpush.msrb.mxu1 %v2756_v3 }
0x23e2   :  { %v1281_v25 = vpop.f32.mrf.mxu1 }
0x23e3   :  { %v1282_v26 = vadd.f32 %v2723_v58, %v1281_v25 }
0x23e5   :  { %1285 = vst [vmem:[#allocation2 + $0x8] sm:$0xff] %v1282_v26 }
0x23ec   :  { %v1659_v53 = vld [vmem:[#allocation2 + $0x8] sm:$0x3]  ;;  %v1749_v25 = vld [vmem:[#allocation2 + $0xa] sm:$0x3] }
0x2418   :  { %v1587_v28 = vpop.f32.mrf.mxu1 }
0x2419   :  { %v1590_v29 = vadd.f32 %v1587_v28, %v1569_v27 }
0x241b   :  { %v2191_v30 = vmul.f32 -1.442695, %v1590_v29 }
0x241d   :  { %2335 = vpow2.f32 %v2191_v30 }
0x2423   :  { %v2336_v31 = vpop.eup %2335 }
0x2424   :  { %v1594_v32 = vadd.f32 1.0, %v2336_v31 }
0x2426   :  { %2337 = vrcp.f32 %v1594_v32  ;;  %v1606_v23 = vand.u32 2147483648, %v1594_v32  ;;  %v1604_v24 = vand.u32 2147483647, %v1594_v32  ;;  %vm1600_vm14 = vweird.f32 %v1594_v32 }
0x2428   :  { %v1607_v58 = vor.u32 1.1754944e-38, %v1606_v23  ;;  %vm1605_vm2 = vcmp.eq.f32.partialorder %v1604_v24, 8.507059e+37 }
0x242c   :  { %v2338_v33 = vpop.eup %2337 }
0x242d   :  { %v1596_v22 = vmul.f32 %v2338_v33, %v1594_v32  ;;  %vm1601_vm6 = vweird.f32 %v2338_v33 }
0x242e   :  { %vm1602_vm15 = vmor %vm1600_vm14, %vm1601_vm6 }
0x242f   :  { %v1597_v35 = vsub.f32 1.0, %v1596_v22 }
0x2431   :  { %v1598_v36 = vmul.f32 %v2338_v33, %v1597_v35 }
0x2433   :  { %v1599_v3 = vadd.f32 %v2338_v33, %v1598_v36 }
0x2435   :  { %v1603_v37 = vsel %vm1602_vm15, %v2338_v33, %v1599_v3 }
0x2436   :  { %v1608_v38 = vsel %vm1605_vm2, %v1607_v58, %v1603_v37 }
0x2437   :  { %v1610_v40 = vmul.f32 2.0, %v1608_v38  ;;  %v1612_v43 = vmul.f32 %v1608_v38, %v1532_v16 }
0x2439   :  { %v2192_v7 = vadd.f32 -1.0, %v1610_v40 }
0x243b   :  { %1614 = vrot.lane.b32.xlu1 %v2192_v7, %s2391_s7 }
0x24ad   :  { %v1615_v41 = vpop.permute.xlu1 %1614 }
0x24ae   :  { %v1617_v42 = vmul.f32 %v1615_v41, %v1608_v38 }
0x24b0   :  { %1619 = vrot.lane.b32.xlu2 %v1617_v42, %s2392_s0 }
0x250a   :  { %v1620_v44 = vpop.permute.xlu2 %1619 }
0x250b   :  { %v1622_v45 = vadd.f32 %v1620_v44, %v1612_v43 }
0x250d   :  { %2339 = vtanh.f32 %v1622_v45 }
0x2513   :  { %v2340_v46 = vpop.eup %2339 }
0x2514   :  { %1625 = vrot.lane.b32.xlu0 %v2340_v46, %s2391_s7  ;;  %v1811_v46 = vld [vmem:[%s3068_s12 + $0xb0] sm:$0xff] }
0x2586   :  { %v1626_v51 = vpop.permute.xlu0 %1625 }
0x2587   :  { %v1628_v52 = vmul.f32 %v1626_v51, %v1608_v38 }
0x2589   :  { %1634 = vrot.lane.b32.xlu1 %v1628_v52, %s2392_s0  ;;  %v1839_v52 = vld [vmem:[#allocation2 + $0xc] sm:$0x3] }
0x25fb   :  { %v1635_v39 = vpop.permute.xlu1 %1634 }
0x25fc   :  { %2193 = vmatmul.msk.f32.vlgmr.msra.gmra.mxu2 %vm113_vm0, %v1635_v39  ;;  %2194 = vmatmul.msk.f32.vlgmr.msrb.gmra.mxu3 %vm113_vm0, %v1635_v39 }
0x267f   :  { %v1677_v54 = vpop.f32.mrf.mxu3 }
0x2680   :  { %v1680_v55 = vadd.f32 %v1677_v54, %v1659_v53 }
0x2682   :  { %v2195_v56 = vmul.f32 -1.442695, %v1680_v55 }
0x2684   :  { %2341 = vpow2.f32 %v2195_v56 }
0x268a   :  { %v2342_v57 = vpop.eup %2341 }
0x268b   :  { %v1684_v59 = vadd.f32 1.0, %v2342_v57 }
0x268d   :  { %2343 = vrcp.f32 %v1684_v59  ;;  %v1696_v63 = vand.u32 2147483648, %v1684_v59  ;;  %v1694_v0 = vand.u32 2147483647, %v1684_v59  ;;  %vm1690_vm4 = vweird.f32 %v1684_v59 }
0x268f   :  { %v1697_v2 = vor.u32 1.1754944e-38, %v1696_v63  ;;  %vm1695_vm7 = vcmp.eq.f32.partialorder %v1694_v0, 8.507059e+37 }
0x2693   :  { %v2344_v60 = vpop.eup %2343 }
0x2694   :  { %v1686_v61 = vmul.f32 %v2344_v60, %v1684_v59  ;;  %vm1691_vm3 = vweird.f32 %v2344_v60 }
0x2695   :  { %vm1692_vm5 = vmor %vm1690_vm4, %vm1691_vm3 }
0x2696   :  { %v1687_v62 = vsub.f32 1.0, %v1686_v61 }
0x2698   :  { %v1688_v34 = vmul.f32 %v2344_v60, %v1687_v62 }
0x269a   :  { %v1689_v1 = vadd.f32 %v2344_v60, %v1688_v34 }
0x269c   :  { %v1693_v5 = vsel %vm1692_vm5, %v2344_v60, %v1689_v1  ;;  %vm2102_vm5 = vcmask 9216  }
0x269d   :  { %v1698_v10 = vsel %vm1695_vm7, %v1697_v2, %v1693_v5 }
0x269e   :  { %v1700_v11 = vmul.f32 2.0, %v1698_v10  ;;  %v1702_v6 = vmul.f32 %v1698_v10, %v1622_v45  ;;  %v1812_v45 = vld [vmem:[%s3068_s12 + $0xb8] sm:$0xff] }
0x269f   :  { %1830 = vmatpush.msrb.mxu2 %v1812_v45  ;;  %v1990_v45 = vld [vmem:[%s3068_s12 + $0xe8] sm:$0xff] }
0x26a0   :  { %v2196_v12 = vadd.f32 -1.0, %v1700_v11 }
0x26a1   :  { %1831 = vmatpush.msrb.mxu2 %v1811_v46  ;;  %v1989_v46 = vld [vmem:[%s3068_s12 + $0xe0] sm:$0xff] }
0x26a2   :  { %1704 = vrot.lane.b32.xlu2 %v2196_v12, %s2391_s7 }
0x26a3   :  { %1832 = vmatpush.msrb.mxu2 %v1810_v47 }
0x26a5   :  { %1833 = vmatpush.msrb.mxu2 %v1809_v48 }
0x26fc   :  { %v1705_v16 = vpop.permute.xlu2 %1704 }
0x26fd   :  { %v1707_v17 = vmul.f32 %v1705_v16, %v1698_v10 }
0x26ff   :  { %1709 = vrot.lane.b32.xlu0 %v1707_v17, %s2392_s0 }
0x2771   :  { %v1710_v18 = vpop.permute.xlu0 %1709 }
0x2772   :  { %v1712_v14 = vadd.f32 %v1710_v18, %v1702_v6 }
0x2774   :  { %2345 = vtanh.f32 %v1712_v14 }
0x277a   :  { %v2346_v9 = vpop.eup %2345 }
0x277b   :  { %1715 = vrot.lane.b32.xlu1 %v2346_v9, %s2391_s7  ;;  %v1901_v9 = vld [vmem:[%s3068_s12 + $0xd0] sm:$0xff] }
0x27ed   :  { %v1716_v21 = vpop.permute.xlu1 %1715 }
0x27ee   :  { %v1718_v4 = vmul.f32 %v1716_v21, %v1698_v10 }
0x27f0   :  { %1724 = vrot.lane.b32.xlu2 %v1718_v4, %s2392_s0  ;;  %v1929_v4 = vld [vmem:[#allocation2 + $0xe] sm:$0x3] }
0x284a   :  { %v1725_v8 = vpop.permute.xlu2 %1724 }
0x284b   :  { %2197 = vmatmul.msk.f32.vlgmr.msrb.gmra.mxu0 %vm113_vm0, %v1725_v8  ;;  %2198 = vmatmul.msk.f32.vlgmr.msra.gmra.mxu1 %vm113_vm0, %v1725_v8 }
0x28c8   :  { %v1767_v26 = vpop.f32.mrf.mxu1 }
0x28c9   :  { %v1770_v27 = vadd.f32 %v1767_v26, %v1749_v25 }
0x28cb   :  { %v2199_v28 = vmul.f32 -1.442695, %v1770_v27 }
0x28cd   :  { %2347 = vpow2.f32 %v2199_v28 }
0x28d3   :  { %v2348_v29 = vpop.eup %2347 }
0x28d4   :  { %v1774_v30 = vadd.f32 1.0, %v2348_v29 }
0x28d6   :  { %2349 = vrcp.f32 %v1774_v30  ;;  %v1786_v22 = vand.u32 2147483648, %v1774_v30  ;;  %v1784_v23 = vand.u32 2147483647, %v1774_v30  ;;  %vm1780_vm9 = vweird.f32 %v1774_v30 }
0x28d8   :  { %v1787_v24 = vor.u32 1.1754944e-38, %v1786_v22  ;;  %vm1785_vm11 = vcmp.eq.f32.partialorder %v1784_v23, 8.507059e+37 }
0x28dc   :  { %v2350_v31 = vpop.eup %2349 }
0x28dd   :  { %v1776_v32 = vmul.f32 %v2350_v31, %v1774_v30  ;;  %vm1781_vm8 = vweird.f32 %v2350_v31 }
0x28de   :  { %vm1782_vm10 = vmor %vm1780_vm9, %vm1781_vm8 }
0x28df   :  { %v1777_v33 = vsub.f32 1.0, %v1776_v32 }
0x28e1   :  { %v1778_v35 = vmul.f32 %v2350_v31, %v1777_v33 }
0x28e3   :  { %v1779_v36 = vadd.f32 %v2350_v31, %v1778_v35 }
0x28e5   :  { %v1783_v3 = vsel %vm1782_vm10, %v2350_v31, %v1779_v36 }
0x28e6   :  { %v1788_v58 = vsel %vm1785_vm11, %v1787_v24, %v1783_v3 }
0x28e7   :  { %v1790_v37 = vmul.f32 2.0, %v1788_v58  ;;  %v1792_v41 = vmul.f32 %v1788_v58, %v1712_v14  ;;  %v1902_v14 = vld [vmem:[%s3068_s12 + $0xd8] sm:$0xff] }
0x28e8   :  { %1920 = vmatpush.msra.mxu0 %v1902_v14 }
0x28e9   :  { %v2200_v38 = vadd.f32 -1.0, %v1790_v37 }
0x28ea   :  { %1921 = vmatpush.msra.mxu0 %v1901_v9 }
0x28eb   :  { %1794 = vrot.lane.b32.xlu0 %v2200_v38, %s2391_s7 }
0x28ec   :  { %1922 = vmatpush.msra.mxu0 %v1900_v13 }
0x28ee   :  { %1923 = vmatpush.msra.mxu0 %v1899_v15 }
0x295d   :  { %v1795_v40 = vpop.permute.xlu0 %1794 }
0x295e   :  { %v1797_v7 = vmul.f32 %v1795_v40, %v1788_v58 }
0x2960   :  { %1799 = vrot.lane.b32.xlu1 %v1797_v7, %s2392_s0 }
0x29d2   :  { %v1800_v42 = vpop.permute.xlu1 %1799 }
0x29d3   :  { %v1802_v43 = vadd.f32 %v1800_v42, %v1792_v41 }
0x29d5   :  { %2351 = vtanh.f32 %v1802_v43 }
0x29db   :  { %v2352_v44 = vpop.eup %2351 }
0x29dc   :  { %1805 = vrot.lane.b32.xlu2 %v2352_v44, %s2391_s7  ;;  %v1991_v44 = vld [vmem:[%s3068_s12 + $0xf0] sm:$0xff] }
0x2a36   :  { %v1806_v49 = vpop.permute.xlu2 %1805 }
0x2a37   :  { %v1808_v50 = vmul.f32 %v1806_v49, %v1788_v58  ;;  %v2038_v49 = vld [vmem:[%s3070_s14 + $0x70] sm:$0xff] }
0x2a38   :  { %2048 = vmatpush.msrb.mxu3 %v2038_v49 }
0x2a39   :  { %1814 = vrot.lane.b32.xlu0 %v1808_v50, %s2392_s0  ;;  %v2037_v50 = vld [vmem:[%s3070_s14 + $0x68] sm:$0xff] }
0x2a3a   :  { %2049 = vmatpush.msrb.mxu3 %v2037_v50 }
0x2aab   :  { %v1815_v51 = vpop.permute.xlu0 %1814 }
0x2aac   :  { %2201 = vmatmul.msk.f32.vlgmr.msrb.gmra.mxu2 %vm113_vm0, %v1815_v51  ;;  %2202 = vmatmul.msk.f32.vlgmr.msra.gmra.mxu3 %vm113_vm0, %v1815_v51  ;;  %v2036_v51 = vld [vmem:[%s3070_s14 + $0x60] sm:$0xff] }
0x2aad   :  { %2050 = vmatpush.msrb.mxu3 %v2036_v51 }
0x2b2f   :  { %v1857_v39 = vpop.f32.mrf.mxu3 }
0x2b30   :  { %v1860_v53 = vadd.f32 %v1857_v39, %v1839_v52  ;;  %v2035_v52 = vld [vmem:[%s3070_s14 + $0x58] sm:$0xff]  ;;  %v2034_v39 = vld [vmem:[%s3070_s14 + $0x50] sm:$0xff] }
0x2b31   :  { %2051 = vmatpush.msrb.mxu3 %v2035_v52 }
0x2b32   :  { %v2203_v54 = vmul.f32 -1.442695, %v1860_v53  ;;  %v2033_v53 = vld [vmem:[%s3070_s14 + $0x48] sm:$0xff] }
0x2b33   :  { %2052 = vmatpush.msrb.mxu3 %v2034_v39 }
0x2b34   :  { %2353 = vpow2.f32 %v2203_v54  ;;  %v2032_v54 = vld [vmem:[%s3070_s14 + $0x40] sm:$0xff] }
0x2b35   :  { %2053 = vmatpush.msrb.mxu3 %v2033_v53 }
0x2b37   :  { %2054 = vmatpush.msrb.mxu3 %v2032_v54 }
0x2b3a   :  { %v2354_v55 = vpop.eup %2353 }
0x2b3b   :  { %v1864_v56 = vadd.f32 1.0, %v2354_v55  ;;  %v2031_v55 = vld [vmem:[%s3070_s14 + $0x38] sm:$0xff] }
0x2b3c   :  { %2055 = vmatpush.msrb.mxu3 %v2031_v55 }
0x2b3d   :  { %2355 = vrcp.f32 %v1864_v56  ;;  %v1876_v61 = vand.u32 2147483648, %v1864_v56  ;;  %v1874_v63 = vand.u32 2147483647, %v1864_v56  ;;  %vm1870_vm13 = vweird.f32 %v1864_v56 }
0x2b3f   :  { %v1877_v0 = vor.u32 1.1754944e-38, %v1876_v61  ;;  %vm1875_vm14 = vcmp.eq.f32.partialorder %v1874_v63, 8.507059e+37  ;;  %v2025_v63 = vld [vmem:[%s3070_s14 + $0x8] sm:$0xff] }
0x2b43   :  { %v2356_v57 = vpop.eup %2355 }
0x2b44   :  { %v1866_v59 = vmul.f32 %v2356_v57, %v1864_v56  ;;  %vm1871_vm12 = vweird.f32 %v2356_v57  ;;  %v2030_v56 = vld [vmem:[%s3070_s14 + $0x30] sm:$0xff] }
0x2b45   :  { %vm1872_vm6 = vmor %vm1870_vm13, %vm1871_vm12  ;;  %2056 = vmatpush.msrb.mxu3 %v2030_v56 }
0x2b46   :  { %v1867_v60 = vsub.f32 1.0, %v1866_v59  ;;  %v2028_v59 = vld [vmem:[%s3070_s14 + $0x20] sm:$0xff] }
0x2b48   :  { %v1868_v62 = vmul.f32 %v2356_v57, %v1867_v60  ;;  %v2027_v60 = vld [vmem:[%s3070_s14 + $0x18] sm:$0xff] }
0x2b4a   :  { %v1869_v34 = vadd.f32 %v2356_v57, %v1868_v62  ;;  %v2026_v62 = vld [vmem:[%s3070_s14 + $0x10] sm:$0xff] }
0x2b4c   :  { %v1873_v1 = vsel %vm1872_vm6, %v2356_v57, %v1869_v34  ;;  %v2029_v57 = vld [vmem:[%s3070_s14 + $0x28] sm:$0xff]  ;;  %v2024_v34 = vld [vmem:[%s3070_s14] sm:$0xff] }
0x2b4d   :  { %v1878_v2 = vsel %vm1875_vm14, %v1877_v0, %v1873_v1  ;;  %2057 = vmatpush.msrb.mxu3 %v2029_v57  ;;  %v1456_v0 = vpop.f32.mrf.mxu0  ;;  %v2074_v1 = vld [vmem:[%s3072_s16 + $0x38] sm:$0xff] }
0x2b4e   :  { %v1880_v5 = vmul.f32 2.0, %v1878_v2  ;;  %v1882_v16 = vmul.f32 %v1878_v2, %v1802_v43  ;;  %v1992_v43 = vld [vmem:[%s3068_s12 + $0xf8] sm:$0xff]  ;;  %2090 = vmatpush.msrb.mxu0 %v2074_v1 }
0x2b4f   :  { %2010 = vmatpush.msra.mxu2 %v1992_v43  ;;  %2058 = vmatpush.msrb.mxu3 %v2028_v59 }
0x2b50   :  { %v2204_v10 = vadd.f32 -1.0, %v1880_v5  ;;  %v2072_v5 = vld [vmem:[%s3072_s16 + $0x28] sm:$0xff] }
0x2b51   :  { %2011 = vmatpush.msra.mxu2 %v1991_v44  ;;  %2059 = vmatpush.msrb.mxu3 %v2027_v60 }
0x2b52   :  { %1884 = vrot.lane.b32.xlu1 %v2204_v10, %s2391_s7  ;;  %v1476_v10 = vpop.f32.mrf.mxu2 }
0x2b53   :  { %2012 = vmatpush.msra.mxu2 %v1990_v45  ;;  %2060 = vmatpush.msrb.mxu3 %v2026_v62  ;;  %v1477_v14 = vadd.f32 %v1476_v10, %v1456_v0 }
0x2b55   :  { %2013 = vmatpush.msra.mxu2 %v1989_v46  ;;  %2061 = vmatpush.msrb.mxu3 %v2025_v63 }
0x2b57   :  { %2062 = vmatpush.msrb.mxu3 %v2024_v34 }
0x2bc4   :  { %v1885_v11 = vpop.permute.xlu1 %1884 }
0x2bc5   :  { %v1887_v12 = vmul.f32 %v1885_v11, %v1878_v2  ;;  %v2071_v11 = vld [vmem:[%s3072_s16 + $0x20] sm:$0xff] }
0x2bc7   :  { %1889 = vrot.lane.b32.xlu2 %v1887_v12, %s2392_s0  ;;  %v2070_v12 = vld [vmem:[%s3072_s16 + $0x18] sm:$0xff] }
0x2c21   :  { %v1890_v17 = vpop.permute.xlu2 %1889 }
0x2c22   :  { %v1892_v6 = vadd.f32 %v1890_v17, %v1882_v16  ;;  %v1565_v16 = vpop.f32.mrf.mxu0  ;;  %v2069_v17 = vld [vmem:[%s3072_s16 + $0x10] sm:$0xff] }
0x2c23   :  { %v1568_v9 = vadd.f32 %v1565_v16, %v1477_v14 }
0x2c24   :  { %2357 = vtanh.f32 %v1892_v6 }
0x2c2a   :  { %v2358_v18 = vpop.eup %2357 }
0x2c2b   :  { %1895 = vrot.lane.b32.xlu0 %v2358_v18, %s2391_s7  ;;  %v1745_v18 = vpop.f32.mrf.mxu0 }
0x2c9d   :  { %v1896_v19 = vpop.permute.xlu0 %1895 }
0x2c9e   :  { %v1898_v20 = vmul.f32 %v1896_v19, %v1878_v2  ;;  %v2073_v2 = vld [vmem:[%s3072_s16 + $0x30] sm:$0xff] }
0x2c9f   :  { %2091 = vmatpush.msrb.mxu0 %v2073_v2 }
0x2ca0   :  { %1904 = vrot.lane.b32.xlu1 %v1898_v20, %s2392_s0 }
0x2ca1   :  { %2092 = vmatpush.msrb.mxu0 %v2072_v5 }
0x2ca3   :  { %2093 = vmatpush.msrb.mxu0 %v2071_v11 }
0x2ca5   :  { %2094 = vmatpush.msrb.mxu0 %v2070_v12 }
0x2ca7   :  { %2095 = vmatpush.msrb.mxu0 %v2069_v17 }
0x2d12   :  { %v1905_v21 = vpop.permute.xlu1 %1904 }
0x2d13   :  { %2205 = vmatmul.msk.f32.vlgmr.msra.gmra.mxu0 %vm113_vm0, %v1905_v21  ;;  %2206 = vmatmul.msk.f32.vlgmr.msrb.gmra.mxu1 %vm113_vm0, %v1905_v21 }
0x2d90   :  { %v1947_v8 = vpop.f32.mrf.mxu1  ;;  %v1925_v20 = vpop.f32.mrf.mxu0 }
0x2d91   :  { %v1950_v25 = vadd.f32 %v1947_v8, %v1929_v4  ;;  %v2218_v8 = vld [vmem:[%s3069_s13] ss:$0 sm:$0xff] }
0x2d93   :  { %v2207_v26 = vmul.f32 -1.442695, %v1950_v25 }
0x2d95   :  { %2359 = vpow2.f32 %v2207_v26 }
0x2d9b   :  { %v2360_v27 = vpop.eup %2359 }
0x2d9c   :  { %v1954_v28 = vadd.f32 1.0, %v2360_v27 }
0x2d9e   :  { %2361 = vrcp.f32 %v1954_v28  ;;  %v1966_v32 = vand.u32 2147483648, %v1954_v28  ;;  %v1964_v22 = vand.u32 2147483647, %v1954_v28  ;;  %vm1960_vm2 = vweird.f32 %v1954_v28 }
0x2da0   :  { %v1967_v23 = vor.u32 1.1754944e-38, %v1966_v32  ;;  %vm1965_vm4 = vcmp.eq.f32.partialorder %v1964_v22, 8.507059e+37 }
0x2da4   :  { %v2362_v29 = vpop.eup %2361 }
0x2da5   :  { %v1956_v30 = vmul.f32 %v2362_v29, %v1954_v28  ;;  %vm1961_vm15 = vweird.f32 %v2362_v29  ;;  %v2068_v28 = vld [vmem:[%s3072_s16 + $0x8] sm:$0xff] }
0x2da6   :  { %vm1962_vm3 = vmor %vm1960_vm2, %vm1961_vm15  ;;  %2096 = vmatpush.msrb.mxu0 %v2068_v28 }
0x2da7   :  { %v1957_v31 = vsub.f32 1.0, %v1956_v30  ;;  %v2219_v30 = vld [vmem:[%s3071_s15] ss:$0 sm:$0xff] }
0x2da9   :  { %v1958_v33 = vmul.f32 %v2362_v29, %v1957_v31 }
0x2dab   :  { %v1959_v35 = vadd.f32 %v2362_v29, %v1958_v33  ;;  %v2220_v33 = vld [vmem:[%s3073_s17] ss:$0 sm:$0xff] }
0x2dad   :  { %v1963_v36 = vsel %vm1962_vm3, %v2362_v29, %v1959_v35  ;;  %v2067_v29 = vld [vmem:[%s3072_s16] sm:$0xff] }
0x2dae   :  { %v1968_v24 = vsel %vm1965_vm4, %v1967_v23, %v1963_v36  ;;  %2097 = vmatpush.msrb.mxu0 %v2067_v29 }
0x2daf   :  { %v1970_v3 = vmul.f32 2.0, %v1968_v24  ;;  %v1972_v40 = vmul.f32 %v1968_v24, %v1892_v6  ;;  %v1655_v6 = vpop.f32.mrf.mxu2 }
0x2db0   :  { %v1658_v15 = vadd.f32 %v1655_v6, %v1568_v9 }
0x2db1   :  { %v2208_v58 = vadd.f32 -1.0, %v1970_v3 }
0x2db2   :  { %v1748_v19 = vadd.f32 %v1745_v18, %v1658_v15 }
0x2db3   :  { %1974 = vrot.lane.b32.xlu2 %v2208_v58, %s2391_s7 }
0x2db7   :  { %v1835_v13 = vpop.f32.mrf.mxu2 }
0x2db8   :  { %v1838_v21 = vadd.f32 %v1835_v13, %v1748_v19 }
0x2dba   :  { %v1928_v4 = vadd.f32 %v1925_v20, %v1838_v21 }
0x2e0d   :  { %v1975_v37 = vpop.permute.xlu2 %1974 }
0x2e0e   :  { %v1977_v38 = vmul.f32 %v1975_v37, %v1968_v24 }
0x2e10   :  { %1979 = vrot.lane.b32.xlu0 %v1977_v38, %s2392_s0 }
0x2e82   :  { %v1980_v7 = vpop.permute.xlu0 %1979 }
0x2e83   :  { %v1982_v41 = vadd.f32 %v1980_v7, %v1972_v40 }
0x2e85   :  { %2363 = vtanh.f32 %v1982_v41 }
0x2e8b   :  { %v2364_v42 = vpop.eup %2363 }
0x2e8c   :  { %1985 = vrot.lane.b32.xlu1 %v2364_v42, %s2391_s7  ;;  %s2393_s7 = smov [#allocation4]  }
0x2e8d   :  { %s2109_s10 = sshll.u32 %s2393_s7, 4  ;;  %s2110_s10 = int_to_ptr.vmem [resolvable:$true] %s2109_s10 }
0x2efe   :  { %v1986_v47 = vpop.permute.xlu1 %1985 }
0x2eff   :  { %v1988_v48 = vmul.f32 %v1986_v47, %v1968_v24 }
0x2f01   :  { %1994 = vrot.lane.b32.xlu2 %v1988_v48, %s2392_s0 }
0x2f5b   :  { %v1995_v61 = vpop.permute.xlu2 %1994 }
0x2f5c   :  { %2209 = vmatmul.msk.f32.vlgmr.msra.gmra.mxu2 %vm113_vm0, %v1995_v61  ;;  %vm2043_vm0 = vcmask 982016  }
0x2fdf   :  { %v2015_v25 = vpop.f32.mrf.mxu2 }
0x2fe0   :  { %v2018_v26 = vadd.f32 %v2015_v25, %v1928_v4 }
0x2fe2   :  { %v2023_v27 = vadd.f32 %v2218_v8, %v2018_v26 }
0x2fe4   :  { %2210 = vmatmul.msk.f32.vlgmr.msrb.gmra.mxu3 %vm2043_vm0, %v2023_v27 }
0x3067   :  { %v2064_v31 = vpop.f32.mrf.mxu3 }
0x3068   :  { %v2065_v32 = vadd.f32 %v2219_v30, %v2064_v31 }
0x306a   :  { %2211 = vmatmul.msk.f32.vlgmr.msrb.gmra.mxu0 %vm74_vm1, %v2065_v32 }
0x30e7   :  { %v2099_v22 = vpop.f32.mrf.mxu0 }
0x30e8   :  { %v2100_v35 = vadd.f32 %v2220_v33, %v2099_v22 }
0x30ea   :  { %2103 = vst.msk [vmem:[#allocation4] sm:$0x3] %vm2102_vm5, %v2100_v35 }
0x30eb   :  { %2114 = dma.vmem_to_hbm [thread:$0]  %s2110_s10, 32, %s2112_s25, [#allocation5]  }
0x30ec   :  { %2389 = dma.done.wait [#allocation5], 32  }
0x30ed   :  { %2390 = vsyncadd [#allocation5], 4294967264 }
0x30ee   :  { %2119 = vsyncpa [#allocation5], 1 }

</bundles_post_ra>
